<compile_context>
chip_gen: v7x
topology: tpu7x:2x2x1
jax: 0.10.0
libtpu: 0.0.40
codegen_flags: <defaults>
</compile_context>

<pallas_src>
import functools

import jax
import jax.numpy as jnp
from jax.experimental import pallas as pl
from jax.experimental.pallas import tpu as pltpu


_VMEM_LIMIT = 64 * 1024 * 1024   # raise the 16/32 MiB default; tiled blocks stay far below


def _pick_tile(total, pref, align):
    """Largest divisor of `total` <= `pref` that is a multiple of `align`.

    Falls back to the full extent (always a legal Pallas block shape).
    """
    if total <= pref:
        return total
    t = (pref // align) * align
    while t >= align:
        if total % t == 0:
            return t
        t -= align
    # TODO(synk): pad + mask the last tile instead of falling back to the full
    # extent when `total` has no aligned divisor (e.g. N = 3136).
    return total


# --------------------- 1x1 conv + cross-tile BatchNorm stats ---------------------

def _conv_stats_kernel(x_ref, w_ref, y_ref, sum_ref, ssq_ref):
    # x block: (1, Cin, nt); w block: (ct, Cin) bf16
    # y block: (1, ct, nt) bf16 (pre-BN conv output)
    # sum/ssq blocks: (ct, 1) f32, resident across the (b, n-tile) reduction axes.
    @pl.when(jnp.logical_and(pl.program_id(1) == 0, pl.program_id(2) == 0))
    def _init():
        sum_ref[...] = jnp.zeros_like(sum_ref)
        ssq_ref[...] = jnp.zeros_like(ssq_ref)

    x16 = x_ref[0].astype(jnp.bfloat16)                                   # (Cin, nt)
    y = jnp.dot(w_ref[...], x16, preferred_element_type=jnp.float32)      # (ct, nt)
    y_ref[0] = y.astype(y_ref.dtype)
    sum_ref[...] += jnp.sum(y, axis=1, keepdims=True)
    ssq_ref[...] += jnp.sum(y * y, axis=1, keepdims=True)


def conv_stats(x, w16):
    """1x1 conv (bias dropped: cancelled by training-mode BN) + per-channel
    sum / sum-of-squares accumulated across all (B, N) tiles.

    x: (B, Cin, N) f32/bf16 -> y: (B, Cout, N) bf16, sum/ssq: (Cout, 1) f32.
    """
    B, Cin, N = x.shape
    Cout = w16.shape[0]
    ct = _pick_tile(Cout, 256, 8)      # 256-row tiles fill the v6e/v7x 256x256 MXU
    nt = _pick_tile(N, 512, 128)       # lane-dense tiles
    grid = (Cout // ct, B, N // nt)
    return pl.pallas_call(
        _conv_stats_kernel,
        out_shape=(jax.ShapeDtypeStruct((B, Cout, N), jnp.bfloat16),
                   jax.ShapeDtypeStruct((Cout, 1), jnp.float32),
                   jax.ShapeDtypeStruct((Cout, 1), jnp.float32)),
        grid=grid,
        in_specs=[pl.BlockSpec((1, Cin, nt), lambda i, b, j: (b, 0, j)),
                  pl.BlockSpec((ct, Cin), lambda i, b, j: (i, 0))],
        out_specs=(pl.BlockSpec((1, ct, nt), lambda i, b, j: (b, i, j)),
                   pl.BlockSpec((ct, 1), lambda i, b, j: (i, 0)),
                   pl.BlockSpec((ct, 1), lambda i, b, j: (i, 0))),
        compiler_params=pltpu.CompilerParams(
            dimension_semantics=("parallel", "arbitrary", "arbitrary"),
            vmem_limit_bytes=_VMEM_LIMIT),
    )(x, w16)


def _bn_scale_shift(s, ss, gamma, beta, count):
    # Training-mode BatchNorm1d: biased variance over the (B, N) axes.
    mean = s / count
    var = jnp.maximum(ss / count - mean * mean, 0.0)
    scale = gamma * jax.lax.rsqrt(var + 1e-5)
    shift = beta - mean * scale
    return scale, shift


# --------------------- BN finalize (affine) + optional residual ---------------------

def _bn_apply_kernel(y_ref, sc_ref, sh_ref, *rest, has_residual):
    if has_residual:
        r_ref, o_ref = rest
    else:
        (o_ref,) = rest
        r_ref = None
    out = y_ref[0].astype(jnp.float32) * sc_ref[...] + sh_ref[...]
    if has_residual:
        out = out + r_ref[0].astype(jnp.float32)
    o_ref[0] = out.astype(o_ref.dtype)


def bn_apply(y, scale, shift, residual=None, out_dtype=jnp.float32):
    """Finalize BatchNorm (per-channel affine from the global stats) (+ residual)."""
    B, Cout, N = y.shape
    ct = _pick_tile(Cout, 256, 8)
    nt = _pick_tile(N, 512, 128)
    grid = (Cout // ct, B, N // nt)
    in_specs = [pl.BlockSpec((1, ct, nt), lambda i, b, j: (b, i, j)),
                pl.BlockSpec((ct, 1), lambda i, b, j: (i, 0)),
                pl.BlockSpec((ct, 1), lambda i, b, j: (i, 0))]
    args = [y, scale, shift]
    if residual is not None:
        in_specs.append(pl.BlockSpec((1, ct, nt), lambda i, b, j: (b, i, j)))
        args.append(residual)
    return pl.pallas_call(
        functools.partial(_bn_apply_kernel, has_residual=residual is not None),
        out_shape=jax.ShapeDtypeStruct((B, Cout, N), out_dtype),
        grid=grid,
        in_specs=in_specs,
        out_specs=pl.BlockSpec((1, ct, nt), lambda i, b, j: (b, i, j)),
        compiler_params=pltpu.CompilerParams(
            dimension_semantics=("parallel", "parallel", "parallel"),
            vmem_limit_bytes=_VMEM_LIMIT),
    )(*args)


# --------------------- fused knn (cosine similarity) + top-k ---------------------

def _knn_topk_kernel(yk_ref, yq_ref, sc_ref, sh_ref, idx_ref, kn_ref, *, K):
    # yk: (1, C, N) bf16 pre-BN fc1 output (keys); yq: (1, C, tq) query tile
    # sc/sh: (C, 1) fc1-BN affine; idx out: (1, K, tq) int32
    # kn scratch: (C, N) bf16 L2-normalized keys, built once per batch (q == 0).
    @pl.when(pl.program_id(1) == 0)
    def _build_keys():
        hk = yk_ref[0].astype(jnp.float32) * sc_ref[...] + sh_ref[...]    # fc1+BN output
        hk = hk * jax.lax.rsqrt(
            jnp.maximum(jnp.sum(hk * hk, axis=0, keepdims=True), 1e-24))  # F.normalize(dim=1)
        kn_ref[...] = hk.astype(jnp.bfloat16)

    hq = yq_ref[0].astype(jnp.float32) * sc_ref[...] + sh_ref[...]
    hq = hq * jax.lax.rsqrt(
        jnp.maximum(jnp.sum(hq * hq, axis=0, keepdims=True), 1e-24))

    # Keys on sublanes, queries on lanes -> per-k reductions run along sublanes
    # and the (K, tq) index rows are written lane-dense.  bf16 MXU operands
    # (single-pass) with f32 accumulation; the discrete selection tolerates the
    # ~1e-3 score noise (near-ties may flip, as noted in the review).
    s = jax.lax.dot_general(kn_ref[...], hq.astype(jnp.bfloat16),
                            (((0,), (0,)), ((), ())),
                            preferred_element_type=jnp.float32)           # (N, tq)
    n = s.shape[0]
    row = jax.lax.broadcasted_iota(jnp.int32, s.shape, 0)
    for kk in range(K):   # iterative top-k: max, first-index-of-max, mask
        m = jnp.max(s, axis=0, keepdims=True)                             # (1, tq)
        sel = jnp.min(jnp.where(s >= m, row, n), axis=0, keepdims=True)   # (1, tq)
        idx_ref[0, kk:kk + 1, :] = sel
        s = jnp.where(row == sel, -jnp.inf, s)


def knn_topk(y1, scale, shift, K):
    """Dynamic knn graph on the fc1 output: cosine top-K fused in-kernel.

    Only the (B, K, N) int32 neighbor indices reach HBM (the (N, N) score
    matrix never leaves VMEM).  Includes the self node, like dense_knn_matrix;
    dilation d = 1 (module default).
    """
    B, C, N = y1.shape
    tq = _pick_tile(N, 512, 128)
    grid = (B, N // tq)
    return pl.pallas_call(
        functools.partial(_knn_topk_kernel, K=K),
        out_shape=jax.ShapeDtypeStruct((B, K, N), jnp.int32),
        grid=grid,
        in_specs=[pl.BlockSpec((1, C, N), lambda b, q: (b, 0, 0)),
                  pl.BlockSpec((1, C, tq), lambda b, q: (b, 0, q)),
                  pl.BlockSpec((C, 1), lambda b, q: (0, 0)),
                  pl.BlockSpec((C, 1), lambda b, q: (0, 0))],
        out_specs=pl.BlockSpec((1, K, tq), lambda b, q: (b, 0, q)),
        scratch_shapes=[pltpu.VMEM((C, N), jnp.bfloat16)],
        compiler_params=pltpu.CompilerParams(
            # q is "arbitrary": the normalized-key scratch built at q == 0 must
            # stay on the same core for the later query tiles of that batch.
            dimension_semantics=("parallel", "arbitrary"),
            vmem_limit_bytes=_VMEM_LIMIT),
    )(y1, y1, scale, shift)


# --------------------- MRConv1d (max-relative + 1x1 conv + ReLU) ---------------------

def _mrconv_kernel(yall_ref, yctr_ref, idx_ref, sc_ref, sh_ref,
                   wx_ref, wj_ref, b_ref, o_ref, *, K):
    # yall: (1, C, N) bf16 pre-BN fc1 output; yctr: (1, C, tn) destination slice
    # idx: (1, K, tn) int32; sc/sh: (C, 1) fc1-BN affine (fused here)
    # wx/wj: (Cout, C) bf16 halves of the (Cout, 2C) weight; b: (Cout, 1)
    y_all = yall_ref[0]                                                   # (C, N) bf16
    y_ctr = yctr_ref[0].astype(jnp.float32)                               # (C, tn)
    sc = sc_ref[...]
    sh = sh_ref[...]
    idx = idx_ref[0]                                                      # (K, tn)
    n = y_all.shape[1]
    tn = idx.shape[1]

    # Per-k one-hot gather (cheap compare + convert) + running VPU maximum.
    # Per-step VMEM is O(N * tn).  The BN shift cancels in (h_j - h_i); the
    # scale is applied per k, so arbitrary-sign gamma stays exact.
    row = jax.lax.broadcasted_iota(jnp.int32, (n, tn), 0)
    xjmax = None
    # TODO(synk): switch to lax.fori_loop(..., unroll=True) for large K; with
    # K <= ~16 only the (C, tn) running max stays live across iterations.
    for k in range(K):
        onehot = (row == idx[k:k + 1, :]).astype(jnp.bfloat16)            # (N, tn)
        gath = jnp.dot(y_all, onehot, preferred_element_type=jnp.float32)  # y1[:, idx_k]
        rel = (gath - y_ctr) * sc                                         # h_j - h_i
        xjmax = rel if xjmax is None else jnp.maximum(xjmax, rel)

    h_ctr16 = (y_ctr * sc + sh).astype(jnp.bfloat16)                      # "x" half of concat
    y = (jnp.dot(wx_ref[...], h_ctr16, preferred_element_type=jnp.float32)
         + jnp.dot(wj_ref[...], xjmax.astype(jnp.bfloat16),
                   preferred_element_type=jnp.float32)
         + b_ref[...])
    o_ref[0] = jnp.maximum(y, 0.0).astype(o_ref.dtype)


def mrconv(y1, idx, scale, shift, wx16, wj16, bg):
    """MRConv1d with the fc1-BN affine fused in: max-relative gather +
    Conv1d(2C, 2C, 1) + bias + ReLU, tiled over destination nodes."""
    B, C, N = y1.shape
    K = idx.shape[1]
    Cout = wx16.shape[0]
    tn = _pick_tile(N, 512, 128)
    grid = (B, N // tn)
    return pl.pallas_call(
        functools.partial(_mrconv_kernel, K=K),
        out_shape=jax.ShapeDtypeStruct((B, Cout, N), jnp.bfloat16),
        grid=grid,
        in_specs=[pl.BlockSpec((1, C, N), lambda b, j: (b, 0, 0)),
                  pl.BlockSpec((1, C, tn), lambda b, j: (b, 0, j)),
                  pl.BlockSpec((1, K, tn), lambda b, j: (b, 0, j)),
                  pl.BlockSpec((C, 1), lambda b, j: (0, 0)),
                  pl.BlockSpec((C, 1), lambda b, j: (0, 0)),
                  pl.BlockSpec((Cout, C), lambda b, j: (0, 0)),
                  pl.BlockSpec((Cout, C), lambda b, j: (0, 0)),
                  pl.BlockSpec((Cout, 1), lambda b, j: (0, 0))],
        out_specs=pl.BlockSpec((1, Cout, tn), lambda b, j: (b, 0, j)),
        compiler_params=pltpu.CompilerParams(
            dimension_semantics=("parallel", "parallel"),
            vmem_limit_bytes=_VMEM_LIMIT),
    )(y1, y1, idx, scale, shift, wx16, wj16, bg)


# --------------------------- Grapher forward ---------------------------

@functools.partial(jax.jit, static_argnames=("k", "return_aux"))
def grapher_forward(x, params, k, return_aux=False):
    B, C, N = x.shape
    count = B * N
    # Weights pre-cast to bf16 once (outside the kernels / grid loops).
    w1 = params["w1"].astype(jnp.bfloat16)
    wgx = params["wg_x"].astype(jnp.bfloat16)
    wgj = params["wg_j"].astype(jnp.bfloat16)
    w2 = params["w2"].astype(jnp.bfloat16)

    # fc1: Conv1d(C, C, 1) + BatchNorm1d.  Conv bias cancels in training-mode
    # BN; the BN affine is folded into the knn / MRConv consumers, so the fc1
    # activation crosses HBM exactly once (in bf16).
    y1, s1, ss1 = conv_stats(x, w1)
    sc1, sh1 = _bn_scale_shift(s1, ss1, params["g1"], params["be1"], count)

    # Dynamic knn graph (cosine top-k, self node included) -> indices only.
    nn_idx = knn_topk(y1, sc1, sh1, k)                                    # (B, k, N)

    # MRConv1d: max-relative gather + Conv1d(2C, 2C, 1) + bias + ReLU.
    g = mrconv(y1, nn_idx, sc1, sh1, wgx, wgj, params["bg"])              # (B, 2C, N) bf16

    # fc2: Conv1d(2C, C, 1) + BatchNorm1d, finalized fused with the residual.
    y2, s2, ss2 = conv_stats(g, w2)
    sc2, sh2 = _bn_scale_shift(s2, ss2, params["g2"], params["be2"], count)
    out = bn_apply(y2, sc2, sh2, residual=x, out_dtype=x.dtype)           # (B, C, N)

    if return_aux:
        h = sc1[None] * y1.astype(jnp.float32) + sh1[None]                # fc1+BN output
        return out, (h, nn_idx)
    return out


def init_grapher_params(key, C):
    # PyTorch Conv1d default init: U(-1/sqrt(fan_in), +1/sqrt(fan_in)).
    k1, k2, k3, k4 = jax.random.split(key, 4)

    def u(kk, shape, fan_in):
        b = 1.0 / (fan_in ** 0.5)
        return jax.random.uniform(kk, shape, jnp.float32, -b, b)

    w1 = u(k1, (C, C), C)                  # fc1 conv (bias dropped: cancelled by BN)
    wg = u(k2, (2 * C, 2 * C), 2 * C)      # MRConv BasicConv([2C, 2C]) weight
    bg = u(k3, (2 * C, 1), 2 * C)          # MRConv bias (kept: precedes ReLU)
    w2 = u(k4, (C, 2 * C), 2 * C)          # fc2 conv (bias dropped: cancelled by BN)
    ones = jnp.ones((C, 1), jnp.float32)
    zeros = jnp.zeros((C, 1), jnp.float32)
    return dict(w1=w1, g1=ones, be1=zeros,
                wg_x=wg[:, :C], wg_j=wg[:, C:], bg=bg,
                w2=w2, g2=ones, be2=zeros)


# ------------- pure-JAX reference (mirrors bf16 activation / operand precision) -------------

def _ref_conv(w, a):
    return jnp.einsum("oc,bcn->bon", w.astype(jnp.bfloat16), a.astype(jnp.bfloat16),
                      preferred_element_type=jnp.float32)


def _ref_bn_affine(y, g, be):
    mean = y.mean(axis=(0, 2), keepdims=True)
    var = jnp.maximum((y * y).mean(axis=(0, 2), keepdims=True) - mean * mean, 0.0)
    scale = g[None] * jax.lax.rsqrt(var + 1e-5)
    shift = be[None] - mean * scale
    return scale, shift


def _bf16_round(y):
    return y.astype(jnp.bfloat16).astype(jnp.float32)   # kernels store activations in bf16


def reference_head(x, params):
    y1 = _ref_conv(params["w1"], x)
    sc1, sh1 = _ref_bn_affine(y1, params["g1"], params["be1"])
    h = sc1 * _bf16_round(y1) + sh1
    hn = h * jax.lax.rsqrt(jnp.maximum(jnp.sum(h * h, axis=1, keepdims=True), 1e-24))
    inner = jnp.einsum("bcn,bcm->bnm", hn, hn, precision=jax.lax.Precision.HIGHEST)
    return h, inner


def reference_tail(x, h, nn_idx, params):
    idx_bnk = jnp.transpose(nn_idx, (0, 2, 1))                            # (B, N, K)
    h_j = jax.vmap(lambda hb, ib: hb[:, ib])(h, idx_bnk)                  # (B, C, N, K)
    xjmax = jnp.max(h_j - h[..., None], axis=-1)
    gc = jax.nn.relu(_ref_conv(params["wg_x"], h) + _ref_conv(params["wg_j"], xjmax)
                     + params["bg"][None])
    y2 = _ref_conv(params["w2"], _bf16_round(gc))
    sc2, sh2 = _ref_bn_affine(y2, params["g2"], params["be2"])
    return sc2 * _bf16_round(y2) + sh2 + x


# --------------------------------- main ---------------------------------

if __name__ == "__main__":
    B, C, N, K = 2, 8, 16, 4   # batch, channels, sequence length, knn kernel_size
    x = jax.random.normal(jax.random.PRNGKey(0), (B, C, N), jnp.float32)
    params = init_grapher_params(jax.random.PRNGKey(1), C)

    out = jax.block_until_ready(grapher_forward(x, params, K))
    assert out.shape == (B, C, N)
    assert bool(jnp.all(jnp.isfinite(out)))

    # Correctness self-check against a pure-JAX reference that mirrors the
    # kernels' bf16 activation storage / matmul-operand precision.  The
    # discrete knn indices from the Pallas path are shared with the reference
    # tail so the comparison is robust to floating-point ties in selection.
    out_p, (h_p, nn_idx) = grapher_forward(x, params, K, return_aux=True)
    h_r, inner_r = reference_head(x, params)
    assert float(jnp.max(jnp.abs(h_p - h_r))) < 2e-2

    # knn plausibility: every chosen neighbor's reference score is within tol
    # of the true k-th best score (tolerant of bf16 near-ties, catches bugs).
    kth_best = jax.lax.top_k(inner_r, K)[0][..., K - 1]                   # (B, N)
    chosen = jnp.take_along_axis(inner_r, jnp.transpose(nn_idx, (0, 2, 1)), axis=2)
    assert float(jnp.max(kth_best - jnp.min(chosen, axis=-1))) < 3e-2
    assert int(jnp.min(nn_idx)) >= 0 and int(jnp.max(nn_idx)) < N

    out_r = reference_tail(x, h_r, nn_idx, params)
    err = float(jnp.max(jnp.abs(out_p - out_r)))
    assert err < 5e-2, f"mismatch vs reference: {err}"

    print("KERNEL_OK")
</pallas_src>

<mosaic_0001>
module attributes {stable_mosaic.version = 11 : i64} {
  func.func @_conv_stats_kernel(%arg0: i32, %arg1: i32, %arg2: i32, %arg3: memref<1x8x16xf32, #tpu.memory_space<vmem>>, %arg4: memref<8x8xbf16, #tpu.memory_space<vmem>>, %arg5: memref<1x8x16xbf16, #tpu.memory_space<vmem>>, %arg6: memref<8x1xf32, #tpu.memory_space<vmem>>, %arg7: memref<8x1xf32, #tpu.memory_space<vmem>>) attributes {dimension_semantics = [#tpu.dimension_semantics<parallel>, #tpu.dimension_semantics<arbitrary>, #tpu.dimension_semantics<arbitrary>], iteration_bounds = array<i64: 1, 2, 1>, scalar_prefetch = 0 : i64, scratch_operands = 0 : i64, tpu.core_type = #tpu.core_type<tc>, window_params = [{transform_indices = @transform_0, window_bounds = array<i64: 1, 8, 16>}, {transform_indices = @transform_1, window_bounds = array<i64: 8, 8>}, {transform_indices = @transform_2, window_bounds = array<i64: 1, 8, 16>}, {transform_indices = @transform_3, window_bounds = array<i64: 8, 1>}, {transform_indices = @transform_4, window_bounds = array<i64: 8, 1>}]} {
    %c0_i32 = arith.constant 0 : i32
    %0 = arith.cmpi eq, %arg1, %c0_i32 : i32
    %c0_i32_0 = arith.constant 0 : i32
    %1 = arith.cmpi eq, %arg2, %c0_i32_0 : i32
    %2 = arith.andi %0, %1 : i1
    %3 = arith.extui %2 : i1 to i32
    %c0_i32_1 = arith.constant 0 : i32
    %4 = arith.cmpi ne, %3, %c0_i32_1 : i32
    scf.if %4 {
      %cst_19 = arith.constant 0.000000e+00 : f32
      %25 = vector.broadcast %cst_19 : f32 to vector<8x1xf32>
      %c0_20 = arith.constant 0 : index
      %c0_21 = arith.constant 0 : index
      %26 = vector.load %arg6[%c0_20, %c0_21] : memref<8x1xf32, #tpu.memory_space<vmem>>, vector<8x1xf32>
      tpu.vector_store %arg6[%c0_20, %c0_21], %25 {strides = array<i32>} : memref<8x1xf32, #tpu.memory_space<vmem>>, vector<8x1xf32>,
      %cst_22 = arith.constant 0.000000e+00 : f32
      %27 = vector.broadcast %cst_22 : f32 to vector<8x1xf32>
      %c0_23 = arith.constant 0 : index
      %c0_24 = arith.constant 0 : index
      %28 = vector.load %arg7[%c0_23, %c0_24] : memref<8x1xf32, #tpu.memory_space<vmem>>, vector<8x1xf32>
      tpu.vector_store %arg7[%c0_23, %c0_24], %27 {strides = array<i32>} : memref<8x1xf32, #tpu.memory_space<vmem>>, vector<8x1xf32>,
    } else {
    }
    %c0 = arith.constant 0 : index
    %c0_2 = arith.constant 0 : index
    %c0_3 = arith.constant 0 : index
    %5 = vector.load %arg3[%c0, %c0_2, %c0_3] : memref<1x8x16xf32, #tpu.memory_space<vmem>>, vector<1x8x16xf32>
    %6 = vector.shape_cast %5 : vector<1x8x16xf32> to vector<8x16xf32>
    %7 = arith.truncf %6 : vector<8x16xf32> to vector<8x16xbf16>
    %c0_4 = arith.constant 0 : index
    %c0_5 = arith.constant 0 : index
    %8 = vector.load %arg4[%c0_4, %c0_5] : memref<8x8xbf16, #tpu.memory_space<vmem>>, vector<8x8xbf16>
    %cst = arith.constant dense<0.000000e+00> : vector<8x16xf32>
    %9 = tpu.matmul %8, %7, %cst {dimension_numbers = #tpu.dot_dimension_numbers<[1], [0], [0], [1], [0, 0, 1, 1], [], []>} : vector<8x8xbf16>, vector<8x16xbf16>, vector<8x16xf32> -> vector<8x16xf32>
    %10 = arith.truncf %9 : vector<8x16xf32> to vector<8x16xbf16>
    %c0_6 = arith.constant 0 : index
    %c0_7 = arith.constant 0 : index
    %c0_8 = arith.constant 0 : index
    %11 = vector.load %arg5[%c0_6, %c0_7, %c0_8] : memref<1x8x16xbf16, #tpu.memory_space<vmem>>, vector<1x8x16xbf16>
    %12 = vector.shape_cast %11 : vector<1x8x16xbf16> to vector<8x16xbf16>
    %13 = vector.shape_cast %10 : vector<8x16xbf16> to vector<1x8x16xbf16>
    tpu.vector_store %arg5[%c0_6, %c0_7, %c0_8], %13 {strides = array<i32>} : memref<1x8x16xbf16, #tpu.memory_space<vmem>>, vector<1x8x16xbf16>,
    %c0_9 = arith.constant 0 : index
    %c0_10 = arith.constant 0 : index
    %14 = vector.load %arg6[%c0_9, %c0_10] : memref<8x1xf32, #tpu.memory_space<vmem>>, vector<8x1xf32>
    %cst_11 = arith.constant dense<0.000000e+00> : vector<8xf32>
    %15 = vector.multi_reduction <add>, %9, %cst_11 [1] : vector<8x16xf32> to vector<8xf32>
    %16 = vector.shape_cast %15 : vector<8xf32> to vector<8x1xf32>
    %17 = arith.addf %14, %16 : vector<8x1xf32>
    %c0_12 = arith.constant 0 : index
    %c0_13 = arith.constant 0 : index
    %18 = vector.load %arg6[%c0_12, %c0_13] : memref<8x1xf32, #tpu.memory_space<vmem>>, vector<8x1xf32>
    tpu.vector_store %arg6[%c0_12, %c0_13], %17 {strides = array<i32>} : memref<8x1xf32, #tpu.memory_space<vmem>>, vector<8x1xf32>,
    %c0_14 = arith.constant 0 : index
    %c0_15 = arith.constant 0 : index
    %19 = vector.load %arg7[%c0_14, %c0_15] : memref<8x1xf32, #tpu.memory_space<vmem>>, vector<8x1xf32>
    %20 = arith.mulf %9, %9 : vector<8x16xf32>
    %cst_16 = arith.constant dense<0.000000e+00> : vector<8xf32>
    %21 = vector.multi_reduction <add>, %20, %cst_16 [1] : vector<8x16xf32> to vector<8xf32>
    %22 = vector.shape_cast %21 : vector<8xf32> to vector<8x1xf32>
    %23 = arith.addf %19, %22 : vector<8x1xf32>
    %c0_17 = arith.constant 0 : index
    %c0_18 = arith.constant 0 : index
    %24 = vector.load %arg7[%c0_17, %c0_18] : memref<8x1xf32, #tpu.memory_space<vmem>>, vector<8x1xf32>
    tpu.vector_store %arg7[%c0_17, %c0_18], %23 {strides = array<i32>} : memref<8x1xf32, #tpu.memory_space<vmem>>, vector<8x1xf32>,
    return
  }
  func.func @transform_0(%arg0: i32, %arg1: i32, %arg2: i32) -> (i32, i32, i32) {
    %c0_i32 = arith.constant 0 : i32
    %c0_i32_0 = arith.constant 0 : i32
    return %arg1, %c0_i32, %arg2 : i32, i32, i32
  }
  func.func @transform_1(%arg0: i32, %arg1: i32, %arg2: i32) -> (i32, i32) {
    %c0_i32 = arith.constant 0 : i32
    %c0_i32_0 = arith.constant 0 : i32
    return %arg0, %c0_i32 : i32, i32
  }
  func.func @transform_2(%arg0: i32, %arg1: i32, %arg2: i32) -> (i32, i32, i32) {
    %c0_i32 = arith.constant 0 : i32
    return %arg1, %arg0, %arg2 : i32, i32, i32
  }
  func.func @transform_3(%arg0: i32, %arg1: i32, %arg2: i32) -> (i32, i32) {
    %c0_i32 = arith.constant 0 : i32
    %c0_i32_0 = arith.constant 0 : i32
    return %arg0, %c0_i32 : i32, i32
  }
  func.func @transform_4(%arg0: i32, %arg1: i32, %arg2: i32) -> (i32, i32) {
    %c0_i32 = arith.constant 0 : i32
    %c0_i32_0 = arith.constant 0 : i32
    return %arg0, %c0_i32 : i32, i32
  }
}

module attributes {stable_mosaic.version = 11 : i64} {
  func.func @_knn_topk_kernel(%arg0: i32, %arg1: i32, %arg2: memref<1x8x16xbf16, #tpu.memory_space<vmem>>, %arg3: memref<1x8x16xbf16, #tpu.memory_space<vmem>>, %arg4: memref<8x1xf32, #tpu.memory_space<vmem>>, %arg5: memref<8x1xf32, #tpu.memory_space<vmem>>, %arg6: memref<1x4x16xi32, #tpu.memory_space<vmem>>, %arg7: memref<8x16xbf16, #tpu.memory_space<vmem>>) attributes {dimension_semantics = [#tpu.dimension_semantics<parallel>, #tpu.dimension_semantics<arbitrary>], iteration_bounds = array<i64: 2, 1>, scalar_prefetch = 0 : i64, scratch_operands = 1 : i64, tpu.core_type = #tpu.core_type<tc>, window_params = [{transform_indices = @transform_0, window_bounds = array<i64: 1, 8, 16>}, {transform_indices = @transform_1, window_bounds = array<i64: 1, 8, 16>}, {pipeline_mode = #tpu.pipeline_mode<synchronous>, transform_indices = @transform_2, window_bounds = array<i64: 8, 1>}, {pipeline_mode = #tpu.pipeline_mode<synchronous>, transform_indices = @transform_3, window_bounds = array<i64: 8, 1>}, {transform_indices = @transform_4, window_bounds = array<i64: 1, 4, 16>}]} {
    %c0_i32 = arith.constant 0 : i32
    %0 = arith.cmpi eq, %arg1, %c0_i32 : i32
    %1 = arith.extui %0 : i1 to i32
    %c0_i32_0 = arith.constant 0 : i32
    %2 = arith.cmpi ne, %1, %c0_i32_0 : i32
    scf.if %2 {
      %c0_34 = arith.constant 0 : index
      %c0_35 = arith.constant 0 : index
      %c0_36 = arith.constant 0 : index
      %80 = vector.load %arg2[%c0_34, %c0_35, %c0_36] : memref<1x8x16xbf16, #tpu.memory_space<vmem>>, vector<1x8x16xbf16>
      %81 = vector.shape_cast %80 : vector<1x8x16xbf16> to vector<8x16xbf16>
      %82 = arith.extf %81 : vector<8x16xbf16> to vector<8x16xf32>
      %c0_37 = arith.constant 0 : index
      %c0_38 = arith.constant 0 : index
      %83 = vector.load %arg4[%c0_37, %c0_38] : memref<8x1xf32, #tpu.memory_space<vmem>>, vector<8x1xf32>
      %84 = vector.broadcast %83 : vector<8x1xf32> to vector<8x16xf32>
      %85 = arith.mulf %82, %84 : vector<8x16xf32>
      %c0_39 = arith.constant 0 : index
      %c0_40 = arith.constant 0 : index
      %86 = vector.load %arg5[%c0_39, %c0_40] : memref<8x1xf32, #tpu.memory_space<vmem>>, vector<8x1xf32>
      %87 = vector.broadcast %86 : vector<8x1xf32> to vector<8x16xf32>
      %88 = arith.addf %85, %87 : vector<8x16xf32>
      %89 = arith.mulf %88, %88 : vector<8x16xf32>
      %cst_41 = arith.constant dense<0.000000e+00> : vector<16xf32>
      %90 = vector.multi_reduction <add>, %89, %cst_41 [0] : vector<8x16xf32> to vector<16xf32>
      %91 = vector.shape_cast %90 : vector<16xf32> to vector<1x16xf32>
      %cst_42 = arith.constant 1.000000e-24 : f32
      %92 = vector.broadcast %cst_42 : f32 to vector<1x16xf32>
      %93 = arith.maximumf %91, %92 : vector<1x16xf32>
      %94 = math.rsqrt %93 : vector<1x16xf32>
      %95 = vector.broadcast %94 : vector<1x16xf32> to vector<8x16xf32>
      %96 = arith.mulf %88, %95 : vector<8x16xf32>
      %97 = arith.truncf %96 : vector<8x16xf32> to vector<8x16xbf16>
      %c0_43 = arith.constant 0 : index
      %c0_44 = arith.constant 0 : index
      %98 = vector.load %arg7[%c0_43, %c0_44] : memref<8x16xbf16, #tpu.memory_space<vmem>>, vector<8x16xbf16>
      tpu.vector_store %arg7[%c0_43, %c0_44], %97 {strides = array<i32>} : memref<8x16xbf16, #tpu.memory_space<vmem>>, vector<8x16xbf16>,
    } else {
    }
    %c0 = arith.constant 0 : index
    %c0_1 = arith.constant 0 : index
    %c0_2 = arith.constant 0 : index
    %3 = vector.load %arg3[%c0, %c0_1, %c0_2] : memref<1x8x16xbf16, #tpu.memory_space<vmem>>, vector<1x8x16xbf16>
    %4 = vector.shape_cast %3 : vector<1x8x16xbf16> to vector<8x16xbf16>
    %5 = arith.extf %4 : vector<8x16xbf16> to vector<8x16xf32>
    %c0_3 = arith.constant 0 : index
    %c0_4 = arith.constant 0 : index
    %6 = vector.load %arg4[%c0_3, %c0_4] : memref<8x1xf32, #tpu.memory_space<vmem>>, vector<8x1xf32>
    %7 = vector.broadcast %6 : vector<8x1xf32> to vector<8x16xf32>
    %8 = arith.mulf %5, %7 : vector<8x16xf32>
    %c0_5 = arith.constant 0 : index
    %c0_6 = arith.constant 0 : index
    %9 = vector.load %arg5[%c0_5, %c0_6] : memref<8x1xf32, #tpu.memory_space<vmem>>, vector<8x1xf32>
    %10 = vector.broadcast %9 : vector<8x1xf32> to vector<8x16xf32>
    %11 = arith.addf %8, %10 : vector<8x16xf32>
    %12 = arith.mulf %11, %11 : vector<8x16xf32>
    %cst = arith.constant dense<0.000000e+00> : vector<16xf32>
    %13 = vector.multi_reduction <add>, %12, %cst [0] : vector<8x16xf32> to vector<16xf32>
    %14 = vector.shape_cast %13 : vector<16xf32> to vector<1x16xf32>
    %cst_7 = arith.constant 1.000000e-24 : f32
    %15 = vector.broadcast %cst_7 : f32 to vector<1x16xf32>
    %16 = arith.maximumf %14, %15 : vector<1x16xf32>
    %17 = math.rsqrt %16 : vector<1x16xf32>
    %18 = vector.broadcast %17 : vector<1x16xf32> to vector<8x16xf32>
    %19 = arith.mulf %11, %18 : vector<8x16xf32>
    %c0_8 = arith.constant 0 : index
    %c0_9 = arith.constant 0 : index
    %20 = vector.load %arg7[%c0_8, %c0_9] : memref<8x16xbf16, #tpu.memory_space<vmem>>, vector<8x16xbf16>
    %21 = arith.truncf %19 : vector<8x16xf32> to vector<8x16xbf16>
    %cst_10 = arith.constant dense<0.000000e+00> : vector<16x16xf32>
    %22 = tpu.matmul %20, %21, %cst_10 {dimension_numbers = #tpu.dot_dimension_numbers<[0], [0], [1], [1], [0, 1, 1, 1], [], []>} : vector<8x16xbf16>, vector<8x16xbf16>, vector<16x16xf32> -> vector<16x16xf32>
    %23 = tpu.iota {dimensions = array<i32: 0>} : vector<16x16xi32>
    %cst_11 = arith.constant dense<0xFF800000> : vector<16xf32>
    %24 = vector.multi_reduction <maximumf>, %22, %cst_11 [0] : vector<16x16xf32> to vector<16xf32>
    %25 = vector.shape_cast %24 : vector<16xf32> to vector<1x16xf32>
    %26 = vector.broadcast %25 : vector<1x16xf32> to vector<16x16xf32>
    %27 = arith.cmpf oge, %22, %26 : vector<16x16xf32>
    %c16_i32 = arith.constant 16 : i32
    %28 = vector.broadcast %c16_i32 : i32 to vector<16x16xi32>
    %29 = arith.select %27, %23, %28 : vector<16x16xi1>, vector<16x16xi32>
    %cst_12 = arith.constant dense<2147483647> : vector<16xi32>
    %30 = vector.multi_reduction <minsi>, %29, %cst_12 [0] : vector<16x16xi32> to vector<16xi32>
    %31 = vector.shape_cast %30 : vector<16xi32> to vector<1x16xi32>
    %c0_13 = arith.constant 0 : index
    %c0_14 = arith.constant 0 : index
    %c0_15 = arith.constant 0 : index
    %32 = vector.load %arg6[%c0_13, %c0_14, %c0_15] : memref<1x4x16xi32, #tpu.memory_space<vmem>>, vector<1x1x16xi32>
    %33 = vector.shape_cast %32 : vector<1x1x16xi32> to vector<1x16xi32>
    %34 = vector.shape_cast %31 : vector<1x16xi32> to vector<1x1x16xi32>
    tpu.vector_store %arg6[%c0_13, %c0_14, %c0_15], %34 {strides = array<i32>} : memref<1x4x16xi32, #tpu.memory_space<vmem>>, vector<1x1x16xi32>,
    %35 = vector.broadcast %31 : vector<1x16xi32> to vector<16x16xi32>
    %36 = arith.cmpi eq, %23, %35 : vector<16x16xi32>
    %cst_16 = arith.constant 0xFF800000 : f32
    %37 = vector.broadcast %cst_16 : f32 to vector<16x16xf32>
    %38 = arith.select %36, %37, %22 : vector<16x16xi1>, vector<16x16xf32>
    %cst_17 = arith.constant dense<0xFF800000> : vector<16xf32>
    %39 = vector.multi_reduction <maximumf>, %38, %cst_17 [0] : vector<16x16xf32> to vector<16xf32>
    %40 = vector.shape_cast %39 : vector<16xf32> to vector<1x16xf32>
    %41 = vector.broadcast %40 : vector<1x16xf32> to vector<16x16xf32>
    %42 = arith.cmpf oge, %38, %41 : vector<16x16xf32>
    %c16_i32_18 = arith.constant 16 : i32
    %43 = vector.broadcast %c16_i32_18 : i32 to vector<16x16xi32>
    %44 = arith.select %42, %23, %43 : vector<16x16xi1>, vector<16x16xi32>
    %cst_19 = arith.constant dense<2147483647> : vector<16xi32>
    %45 = vector.multi_reduction <minsi>, %44, %cst_19 [0] : vector<16x16xi32> to vector<16xi32>
    %46 = vector.shape_cast %45 : vector<16xi32> to vector<1x16xi32>
    %c0_20 = arith.constant 0 : index
    %c1 = arith.constant 1 : index
    %c0_21 = arith.constant 0 : index
    %47 = vector.load %arg6[%c0_20, %c1, %c0_21] : memref<1x4x16xi32, #tpu.memory_space<vmem>>, vector<1x1x16xi32>
    %48 = vector.shape_cast %47 : vector<1x1x16xi32> to vector<1x16xi32>
    %49 = vector.shape_cast %46 : vector<1x16xi32> to vector<1x1x16xi32>
    tpu.vector_store %arg6[%c0_20, %c1, %c0_21], %49 {strides = array<i32>} : memref<1x4x16xi32, #tpu.memory_space<vmem>>, vector<1x1x16xi32>,
    %50 = vector.broadcast %46 : vector<1x16xi32> to vector<16x16xi32>
    %51 = arith.cmpi eq, %23, %50 : vector<16x16xi32>
    %cst_22 = arith.constant 0xFF800000 : f32
    %52 = vector.broadcast %cst_22 : f32 to vector<16x16xf32>
    %53 = arith.select %51, %52, %38 : vector<16x16xi1>, vector<16x16xf32>
    %cst_23 = arith.constant dense<0xFF800000> : vector<16xf32>
    %54 = vector.multi_reduction <maximumf>, %53, %cst_23 [0] : vector<16x16xf32> to vector<16xf32>
    %55 = vector.shape_cast %54 : vector<16xf32> to vector<1x16xf32>
    %56 = vector.broadcast %55 : vector<1x16xf32> to vector<16x16xf32>
    %57 = arith.cmpf oge, %53, %56 : vector<16x16xf32>
    %c16_i32_24 = arith.constant 16 : i32
    %58 = vector.broadcast %c16_i32_24 : i32 to vector<16x16xi32>
    %59 = arith.select %57, %23, %58 : vector<16x16xi1>, vector<16x16xi32>
    %cst_25 = arith.constant dense<2147483647> : vector<16xi32>
    %60 = vector.multi_reduction <minsi>, %59, %cst_25 [0] : vector<16x16xi32> to vector<16xi32>
    %61 = vector.shape_cast %60 : vector<16xi32> to vector<1x16xi32>
    %c0_26 = arith.constant 0 : index
    %c2 = arith.constant 2 : index
    %c0_27 = arith.constant 0 : index
    %62 = vector.load %arg6[%c0_26, %c2, %c0_27] : memref<1x4x16xi32, #tpu.memory_space<vmem>>, vector<1x1x16xi32>
    %63 = vector.shape_cast %62 : vector<1x1x16xi32> to vector<1x16xi32>
    %64 = vector.shape_cast %61 : vector<1x16xi32> to vector<1x1x16xi32>
    tpu.vector_store %arg6[%c0_26, %c2, %c0_27], %64 {strides = array<i32>} : memref<1x4x16xi32, #tpu.memory_space<vmem>>, vector<1x1x16xi32>,
    %65 = vector.broadcast %61 : vector<1x16xi32> to vector<16x16xi32>
    %66 = arith.cmpi eq, %23, %65 : vector<16x16xi32>
    %cst_28 = arith.constant 0xFF800000 : f32
    %67 = vector.broadcast %cst_28 : f32 to vector<16x16xf32>
    %68 = arith.select %66, %67, %53 : vector<16x16xi1>, vector<16x16xf32>
    %cst_29 = arith.constant dense<0xFF800000> : vector<16xf32>
    %69 = vector.multi_reduction <maximumf>, %68, %cst_29 [0] : vector<16x16xf32> to vector<16xf32>
    %70 = vector.shape_cast %69 : vector<16xf32> to vector<1x16xf32>
    %71 = vector.broadcast %70 : vector<1x16xf32> to vector<16x16xf32>
    %72 = arith.cmpf oge, %68, %71 : vector<16x16xf32>
    %c16_i32_30 = arith.constant 16 : i32
    %73 = vector.broadcast %c16_i32_30 : i32 to vector<16x16xi32>
    %74 = arith.select %72, %23, %73 : vector<16x16xi1>, vector<16x16xi32>
    %cst_31 = arith.constant dense<2147483647> : vector<16xi32>
    %75 = vector.multi_reduction <minsi>, %74, %cst_31 [0] : vector<16x16xi32> to vector<16xi32>
    %76 = vector.shape_cast %75 : vector<16xi32> to vector<1x16xi32>
    %c0_32 = arith.constant 0 : index
    %c3 = arith.constant 3 : index
    %c0_33 = arith.constant 0 : index
    %77 = vector.load %arg6[%c0_32, %c3, %c0_33] : memref<1x4x16xi32, #tpu.memory_space<vmem>>, vector<1x1x16xi32>
    %78 = vector.shape_cast %77 : vector<1x1x16xi32> to vector<1x16xi32>
    %79 = vector.shape_cast %76 : vector<1x16xi32> to vector<1x1x16xi32>
    tpu.vector_store %arg6[%c0_32, %c3, %c0_33], %79 {strides = array<i32>} : memref<1x4x16xi32, #tpu.memory_space<vmem>>, vector<1x1x16xi32>,
    return
  }
  func.func @transform_0(%arg0: i32, %arg1: i32) -> (i32, i32, i32) {
    %c0_i32 = arith.constant 0 : i32
    %c0_i32_0 = arith.constant 0 : i32
    %c0_i32_1 = arith.constant 0 : i32
    return %arg0, %c0_i32, %c0_i32_0 : i32, i32, i32
  }
  func.func @transform_1(%arg0: i32, %arg1: i32) -> (i32, i32, i32) {
    %c0_i32 = arith.constant 0 : i32
    %c0_i32_0 = arith.constant 0 : i32
    return %arg0, %c0_i32, %arg1 : i32, i32, i32
  }
  func.func @transform_2(%arg0: i32, %arg1: i32) -> (i32, i32) {
    %c0_i32 = arith.constant 0 : i32
    %c0_i32_0 = arith.constant 0 : i32
    %c0_i32_1 = arith.constant 0 : i32
    return %c0_i32, %c0_i32_0 : i32, i32
  }
  func.func @transform_3(%arg0: i32, %arg1: i32) -> (i32, i32) {
    %c0_i32 = arith.constant 0 : i32
    %c0_i32_0 = arith.constant 0 : i32
    %c0_i32_1 = arith.constant 0 : i32
    return %c0_i32, %c0_i32_0 : i32, i32
  }
  func.func @transform_4(%arg0: i32, %arg1: i32) -> (i32, i32, i32) {
    %c0_i32 = arith.constant 0 : i32
    %c0_i32_0 = arith.constant 0 : i32
    return %arg0, %c0_i32, %arg1 : i32, i32, i32
  }
}

module attributes {stable_mosaic.version = 11 : i64} {
  func.func @_mrconv_kernel(%arg0: i32, %arg1: i32, %arg2: memref<1x8x16xbf16, #tpu.memory_space<vmem>>, %arg3: memref<1x8x16xbf16, #tpu.memory_space<vmem>>, %arg4: memref<1x4x16xi32, #tpu.memory_space<vmem>>, %arg5: memref<8x1xf32, #tpu.memory_space<vmem>>, %arg6: memref<8x1xf32, #tpu.memory_space<vmem>>, %arg7: memref<16x8xbf16, #tpu.memory_space<vmem>>, %arg8: memref<16x8xbf16, #tpu.memory_space<vmem>>, %arg9: memref<16x1xf32, #tpu.memory_space<vmem>>, %arg10: memref<1x16x16xbf16, #tpu.memory_space<vmem>>) attributes {dimension_semantics = [#tpu.dimension_semantics<parallel>, #tpu.dimension_semantics<parallel>], iteration_bounds = array<i64: 2, 1>, scalar_prefetch = 0 : i64, scratch_operands = 0 : i64, tpu.core_type = #tpu.core_type<tc>, window_params = [{transform_indices = @transform_0, window_bounds = array<i64: 1, 8, 16>}, {transform_indices = @transform_1, window_bounds = array<i64: 1, 8, 16>}, {transform_indices = @transform_2, window_bounds = array<i64: 1, 4, 16>}, {pipeline_mode = #tpu.pipeline_mode<synchronous>, transform_indices = @transform_3, window_bounds = array<i64: 8, 1>}, {pipeline_mode = #tpu.pipeline_mode<synchronous>, transform_indices = @transform_4, window_bounds = array<i64: 8, 1>}, {pipeline_mode = #tpu.pipeline_mode<synchronous>, transform_indices = @transform_5, window_bounds = array<i64: 16, 8>}, {pipeline_mode = #tpu.pipeline_mode<synchronous>, transform_indices = @transform_6, window_bounds = array<i64: 16, 8>}, {pipeline_mode = #tpu.pipeline_mode<synchronous>, transform_indices = @transform_7, window_bounds = array<i64: 16, 1>}, {transform_indices = @transform_8, window_bounds = array<i64: 1, 16, 16>}]} {
    %c0 = arith.constant 0 : index
    %c0_0 = arith.constant 0 : index
    %c0_1 = arith.constant 0 : index
    %0 = vector.load %arg2[%c0, %c0_0, %c0_1] : memref<1x8x16xbf16, #tpu.memory_space<vmem>>, vector<1x8x16xbf16>
    %1 = vector.shape_cast %0 : vector<1x8x16xbf16> to vector<8x16xbf16>
    %c0_2 = arith.constant 0 : index
    %c0_3 = arith.constant 0 : index
    %c0_4 = arith.constant 0 : index
    %2 = vector.load %arg3[%c0_2, %c0_3, %c0_4] : memref<1x8x16xbf16, #tpu.memory_space<vmem>>, vector<1x8x16xbf16>
    %3 = vector.shape_cast %2 : vector<1x8x16xbf16> to vector<8x16xbf16>
    %4 = arith.extf %3 : vector<8x16xbf16> to vector<8x16xf32>
    %c0_5 = arith.constant 0 : index
    %c0_6 = arith.constant 0 : index
    %5 = vector.load %arg5[%c0_5, %c0_6] : memref<8x1xf32, #tpu.memory_space<vmem>>, vector<8x1xf32>
    %c0_7 = arith.constant 0 : index
    %c0_8 = arith.constant 0 : index
    %6 = vector.load %arg6[%c0_7, %c0_8] : memref<8x1xf32, #tpu.memory_space<vmem>>, vector<8x1xf32>
    %c0_9 = arith.constant 0 : index
    %c0_10 = arith.constant 0 : index
    %c0_11 = arith.constant 0 : index
    %7 = vector.load %arg4[%c0_9, %c0_10, %c0_11] : memref<1x4x16xi32, #tpu.memory_space<vmem>>, vector<1x4x16xi32>
    %8 = vector.shape_cast %7 : vector<1x4x16xi32> to vector<4x16xi32>
    %9 = tpu.iota {dimensions = array<i32: 0>} : vector<16x16xi32>
    %10 = vector.extract_strided_slice %8 {offsets = [0, 0], sizes = [1, 16], strides = [1, 1]} : vector<4x16xi32> to vector<1x16xi32>
    %11 = vector.broadcast %10 : vector<1x16xi32> to vector<16x16xi32>
    %12 = arith.cmpi eq, %9, %11 : vector<16x16xi32>
    %13 = arith.extui %12 : vector<16x16xi1> to vector<16x16xi32>
    %14 = arith.sitofp %13 : vector<16x16xi32> to vector<16x16xf32>
    %15 = arith.truncf %14 : vector<16x16xf32> to vector<16x16xbf16>
    %cst = arith.constant dense<0.000000e+00> : vector<8x16xf32>
    %16 = tpu.matmul %1, %15, %cst {dimension_numbers = #tpu.dot_dimension_numbers<[1], [0], [0], [1], [0, 0, 1, 1], [], []>} : vector<8x16xbf16>, vector<16x16xbf16>, vector<8x16xf32> -> vector<8x16xf32>
    %17 = arith.subf %16, %4 : vector<8x16xf32>
    %18 = vector.broadcast %5 : vector<8x1xf32> to vector<8x16xf32>
    %19 = arith.mulf %17, %18 : vector<8x16xf32>
    %20 = vector.extract_strided_slice %8 {offsets = [1, 0], sizes = [1, 16], strides = [1, 1]} : vector<4x16xi32> to vector<1x16xi32>
    %21 = vector.broadcast %20 : vector<1x16xi32> to vector<16x16xi32>
    %22 = arith.cmpi eq, %9, %21 : vector<16x16xi32>
    %23 = arith.extui %22 : vector<16x16xi1> to vector<16x16xi32>
    %24 = arith.sitofp %23 : vector<16x16xi32> to vector<16x16xf32>
    %25 = arith.truncf %24 : vector<16x16xf32> to vector<16x16xbf16>
    %cst_12 = arith.constant dense<0.000000e+00> : vector<8x16xf32>
    %26 = tpu.matmul %1, %25, %cst_12 {dimension_numbers = #tpu.dot_dimension_numbers<[1], [0], [0], [1], [0, 0, 1, 1], [], []>} : vector<8x16xbf16>, vector<16x16xbf16>, vector<8x16xf32> -> vector<8x16xf32>
    %27 = arith.subf %26, %4 : vector<8x16xf32>
    %28 = vector.broadcast %5 : vector<8x1xf32> to vector<8x16xf32>
    %29 = arith.mulf %27, %28 : vector<8x16xf32>
    %30 = arith.maximumf %19, %29 : vector<8x16xf32>
    %31 = vector.extract_strided_slice %8 {offsets = [2, 0], sizes = [1, 16], strides = [1, 1]} : vector<4x16xi32> to vector<1x16xi32>
    %32 = vector.broadcast %31 : vector<1x16xi32> to vector<16x16xi32>
    %33 = arith.cmpi eq, %9, %32 : vector<16x16xi32>
    %34 = arith.extui %33 : vector<16x16xi1> to vector<16x16xi32>
    %35 = arith.sitofp %34 : vector<16x16xi32> to vector<16x16xf32>
    %36 = arith.truncf %35 : vector<16x16xf32> to vector<16x16xbf16>
    %cst_13 = arith.constant dense<0.000000e+00> : vector<8x16xf32>
    %37 = tpu.matmul %1, %36, %cst_13 {dimension_numbers = #tpu.dot_dimension_numbers<[1], [0], [0], [1], [0, 0, 1, 1], [], []>} : vector<8x16xbf16>, vector<16x16xbf16>, vector<8x16xf32> -> vector<8x16xf32>
    %38 = arith.subf %37, %4 : vector<8x16xf32>
    %39 = vector.broadcast %5 : vector<8x1xf32> to vector<8x16xf32>
    %40 = arith.mulf %38, %39 : vector<8x16xf32>
    %41 = arith.maximumf %30, %40 : vector<8x16xf32>
    %42 = vector.extract_strided_slice %8 {offsets = [3, 0], sizes = [1, 16], strides = [1, 1]} : vector<4x16xi32> to vector<1x16xi32>
    %43 = vector.broadcast %42 : vector<1x16xi32> to vector<16x16xi32>
    %44 = arith.cmpi eq, %9, %43 : vector<16x16xi32>
    %45 = arith.extui %44 : vector<16x16xi1> to vector<16x16xi32>
    %46 = arith.sitofp %45 : vector<16x16xi32> to vector<16x16xf32>
    %47 = arith.truncf %46 : vector<16x16xf32> to vector<16x16xbf16>
    %cst_14 = arith.constant dense<0.000000e+00> : vector<8x16xf32>
    %48 = tpu.matmul %1, %47, %cst_14 {dimension_numbers = #tpu.dot_dimension_numbers<[1], [0], [0], [1], [0, 0, 1, 1], [], []>} : vector<8x16xbf16>, vector<16x16xbf16>, vector<8x16xf32> -> vector<8x16xf32>
    %49 = arith.subf %48, %4 : vector<8x16xf32>
    %50 = vector.broadcast %5 : vector<8x1xf32> to vector<8x16xf32>
    %51 = arith.mulf %49, %50 : vector<8x16xf32>
    %52 = arith.maximumf %41, %51 : vector<8x16xf32>
    %53 = vector.broadcast %5 : vector<8x1xf32> to vector<8x16xf32>
    %54 = arith.mulf %4, %53 : vector<8x16xf32>
    %55 = vector.broadcast %6 : vector<8x1xf32> to vector<8x16xf32>
    %56 = arith.addf %54, %55 : vector<8x16xf32>
    %57 = arith.truncf %56 : vector<8x16xf32> to vector<8x16xbf16>
    %c0_15 = arith.constant 0 : index
    %c0_16 = arith.constant 0 : index
    %58 = vector.load %arg7[%c0_15, %c0_16] : memref<16x8xbf16, #tpu.memory_space<vmem>>, vector<16x8xbf16>
    %cst_17 = arith.constant dense<0.000000e+00> : vector<16x16xf32>
    %59 = tpu.matmul %58, %57, %cst_17 {dimension_numbers = #tpu.dot_dimension_numbers<[1], [0], [0], [1], [0, 0, 1, 1], [], []>} : vector<16x8xbf16>, vector<8x16xbf16>, vector<16x16xf32> -> vector<16x16xf32>
    %c0_18 = arith.constant 0 : index
    %c0_19 = arith.constant 0 : index
    %60 = vector.load %arg8[%c0_18, %c0_19] : memref<16x8xbf16, #tpu.memory_space<vmem>>, vector<16x8xbf16>
    %61 = arith.truncf %52 : vector<8x16xf32> to vector<8x16xbf16>
    %cst_20 = arith.constant dense<0.000000e+00> : vector<16x16xf32>
    %62 = tpu.matmul %60, %61, %cst_20 {dimension_numbers = #tpu.dot_dimension_numbers<[1], [0], [0], [1], [0, 0, 1, 1], [], []>} : vector<16x8xbf16>, vector<8x16xbf16>, vector<16x16xf32> -> vector<16x16xf32>
    %63 = arith.addf %59, %62 : vector<16x16xf32>
    %c0_21 = arith.constant 0 : index
    %c0_22 = arith.constant 0 : index
    %64 = vector.load %arg9[%c0_21, %c0_22] : memref<16x1xf32, #tpu.memory_space<vmem>>, vector<16x1xf32>
    %65 = vector.broadcast %64 : vector<16x1xf32> to vector<16x16xf32>
    %66 = arith.addf %63, %65 : vector<16x16xf32>
    %cst_23 = arith.constant 0.000000e+00 : f32
    %67 = vector.broadcast %cst_23 : f32 to vector<16x16xf32>
    %68 = arith.maximumf %66, %67 : vector<16x16xf32>
    %69 = arith.truncf %68 : vector<16x16xf32> to vector<16x16xbf16>
    %c0_24 = arith.constant 0 : index
    %c0_25 = arith.constant 0 : index
    %c0_26 = arith.constant 0 : index
    %70 = vector.load %arg10[%c0_24, %c0_25, %c0_26] : memref<1x16x16xbf16, #tpu.memory_space<vmem>>, vector<1x16x16xbf16>
    %71 = vector.shape_cast %70 : vector<1x16x16xbf16> to vector<16x16xbf16>
    %72 = vector.shape_cast %69 : vector<16x16xbf16> to vector<1x16x16xbf16>
    tpu.vector_store %arg10[%c0_24, %c0_25, %c0_26], %72 {strides = array<i32>} : memref<1x16x16xbf16, #tpu.memory_space<vmem>>, vector<1x16x16xbf16>,
    return
  }
  func.func @transform_0(%arg0: i32, %arg1: i32) -> (i32, i32, i32) {
    %c0_i32 = arith.constant 0 : i32
    %c0_i32_0 = arith.constant 0 : i32
    %c0_i32_1 = arith.constant 0 : i32
    return %arg0, %c0_i32, %c0_i32_0 : i32, i32, i32
  }
  func.func @transform_1(%arg0: i32, %arg1: i32) -> (i32, i32, i32) {
    %c0_i32 = arith.constant 0 : i32
    %c0_i32_0 = arith.constant 0 : i32
    return %arg0, %c0_i32, %arg1 : i32, i32, i32
  }
  func.func @transform_2(%arg0: i32, %arg1: i32) -> (i32, i32, i32) {
    %c0_i32 = arith.constant 0 : i32
    %c0_i32_0 = arith.constant 0 : i32
    return %arg0, %c0_i32, %arg1 : i32, i32, i32
  }
  func.func @transform_3(%arg0: i32, %arg1: i32) -> (i32, i32) {
    %c0_i32 = arith.constant 0 : i32
    %c0_i32_0 = arith.constant 0 : i32
    %c0_i32_1 = arith.constant 0 : i32
    return %c0_i32, %c0_i32_0 : i32, i32
  }
  func.func @transform_4(%arg0: i32, %arg1: i32) -> (i32, i32) {
    %c0_i32 = arith.constant 0 : i32
    %c0_i32_0 = arith.constant 0 : i32
    %c0_i32_1 = arith.constant 0 : i32
    return %c0_i32, %c0_i32_0 : i32, i32
  }
  func.func @transform_5(%arg0: i32, %arg1: i32) -> (i32, i32) {
    %c0_i32 = arith.constant 0 : i32
    %c0_i32_0 = arith.constant 0 : i32
    %c0_i32_1 = arith.constant 0 : i32
    return %c0_i32, %c0_i32_0 : i32, i32
  }
  func.func @transform_6(%arg0: i32, %arg1: i32) -> (i32, i32) {
    %c0_i32 = arith.constant 0 : i32
    %c0_i32_0 = arith.constant 0 : i32
    %c0_i32_1 = arith.constant 0 : i32
    return %c0_i32, %c0_i32_0 : i32, i32
  }
  func.func @transform_7(%arg0: i32, %arg1: i32) -> (i32, i32) {
    %c0_i32 = arith.constant 0 : i32
    %c0_i32_0 = arith.constant 0 : i32
    %c0_i32_1 = arith.constant 0 : i32
    return %c0_i32, %c0_i32_0 : i32, i32
  }
  func.func @transform_8(%arg0: i32, %arg1: i32) -> (i32, i32, i32) {
    %c0_i32 = arith.constant 0 : i32
    %c0_i32_0 = arith.constant 0 : i32
    return %arg0, %c0_i32, %arg1 : i32, i32, i32
  }
}

module attributes {stable_mosaic.version = 11 : i64} {
  func.func @_conv_stats_kernel(%arg0: i32, %arg1: i32, %arg2: i32, %arg3: memref<1x16x16xbf16, #tpu.memory_space<vmem>>, %arg4: memref<8x16xbf16, #tpu.memory_space<vmem>>, %arg5: memref<1x8x16xbf16, #tpu.memory_space<vmem>>, %arg6: memref<8x1xf32, #tpu.memory_space<vmem>>, %arg7: memref<8x1xf32, #tpu.memory_space<vmem>>) attributes {dimension_semantics = [#tpu.dimension_semantics<parallel>, #tpu.dimension_semantics<arbitrary>, #tpu.dimension_semantics<arbitrary>], iteration_bounds = array<i64: 1, 2, 1>, scalar_prefetch = 0 : i64, scratch_operands = 0 : i64, tpu.core_type = #tpu.core_type<tc>, window_params = [{transform_indices = @transform_0, window_bounds = array<i64: 1, 16, 16>}, {transform_indices = @transform_1, window_bounds = array<i64: 8, 16>}, {transform_indices = @transform_2, window_bounds = array<i64: 1, 8, 16>}, {transform_indices = @transform_3, window_bounds = array<i64: 8, 1>}, {transform_indices = @transform_4, window_bounds = array<i64: 8, 1>}]} {
    %c0_i32 = arith.constant 0 : i32
    %0 = arith.cmpi eq, %arg1, %c0_i32 : i32
    %c0_i32_0 = arith.constant 0 : i32
    %1 = arith.cmpi eq, %arg2, %c0_i32_0 : i32
    %2 = arith.andi %0, %1 : i1
    %3 = arith.extui %2 : i1 to i32
    %c0_i32_1 = arith.constant 0 : i32
    %4 = arith.cmpi ne, %3, %c0_i32_1 : i32
    scf.if %4 {
      %cst_19 = arith.constant 0.000000e+00 : f32
      %24 = vector.broadcast %cst_19 : f32 to vector<8x1xf32>
      %c0_20 = arith.constant 0 : index
      %c0_21 = arith.constant 0 : index
      %25 = vector.load %arg6[%c0_20, %c0_21] : memref<8x1xf32, #tpu.memory_space<vmem>>, vector<8x1xf32>
      tpu.vector_store %arg6[%c0_20, %c0_21], %24 {strides = array<i32>} : memref<8x1xf32, #tpu.memory_space<vmem>>, vector<8x1xf32>,
      %cst_22 = arith.constant 0.000000e+00 : f32
      %26 = vector.broadcast %cst_22 : f32 to vector<8x1xf32>
      %c0_23 = arith.constant 0 : index
      %c0_24 = arith.constant 0 : index
      %27 = vector.load %arg7[%c0_23, %c0_24] : memref<8x1xf32, #tpu.memory_space<vmem>>, vector<8x1xf32>
      tpu.vector_store %arg7[%c0_23, %c0_24], %26 {strides = array<i32>} : memref<8x1xf32, #tpu.memory_space<vmem>>, vector<8x1xf32>,
    } else {
    }
    %c0 = arith.constant 0 : index
    %c0_2 = arith.constant 0 : index
    %c0_3 = arith.constant 0 : index
    %5 = vector.load %arg3[%c0, %c0_2, %c0_3] : memref<1x16x16xbf16, #tpu.memory_space<vmem>>, vector<1x16x16xbf16>
    %6 = vector.shape_cast %5 : vector<1x16x16xbf16> to vector<16x16xbf16>
    %c0_4 = arith.constant 0 : index
    %c0_5 = arith.constant 0 : index
    %7 = vector.load %arg4[%c0_4, %c0_5] : memref<8x16xbf16, #tpu.memory_space<vmem>>, vector<8x16xbf16>
    %cst = arith.constant dense<0.000000e+00> : vector<8x16xf32>
    %8 = tpu.matmul %7, %6, %cst {dimension_numbers = #tpu.dot_dimension_numbers<[1], [0], [0], [1], [0, 0, 1, 1], [], []>} : vector<8x16xbf16>, vector<16x16xbf16>, vector<8x16xf32> -> vector<8x16xf32>
    %9 = arith.truncf %8 : vector<8x16xf32> to vector<8x16xbf16>
    %c0_6 = arith.constant 0 : index
    %c0_7 = arith.constant 0 : index
    %c0_8 = arith.constant 0 : index
    %10 = vector.load %arg5[%c0_6, %c0_7, %c0_8] : memref<1x8x16xbf16, #tpu.memory_space<vmem>>, vector<1x8x16xbf16>
    %11 = vector.shape_cast %10 : vector<1x8x16xbf16> to vector<8x16xbf16>
    %12 = vector.shape_cast %9 : vector<8x16xbf16> to vector<1x8x16xbf16>
    tpu.vector_store %arg5[%c0_6, %c0_7, %c0_8], %12 {strides = array<i32>} : memref<1x8x16xbf16, #tpu.memory_space<vmem>>, vector<1x8x16xbf16>,
    %c0_9 = arith.constant 0 : index
    %c0_10 = arith.constant 0 : index
    %13 = vector.load %arg6[%c0_9, %c0_10] : memref<8x1xf32, #tpu.memory_space<vmem>>, vector<8x1xf32>
    %cst_11 = arith.constant dense<0.000000e+00> : vector<8xf32>
    %14 = vector.multi_reduction <add>, %8, %cst_11 [1] : vector<8x16xf32> to vector<8xf32>
    %15 = vector.shape_cast %14 : vector<8xf32> to vector<8x1xf32>
    %16 = arith.addf %13, %15 : vector<8x1xf32>
    %c0_12 = arith.constant 0 : index
    %c0_13 = arith.constant 0 : index
    %17 = vector.load %arg6[%c0_12, %c0_13] : memref<8x1xf32, #tpu.memory_space<vmem>>, vector<8x1xf32>
    tpu.vector_store %arg6[%c0_12, %c0_13], %16 {strides = array<i32>} : memref<8x1xf32, #tpu.memory_space<vmem>>, vector<8x1xf32>,
    %c0_14 = arith.constant 0 : index
    %c0_15 = arith.constant 0 : index
    %18 = vector.load %arg7[%c0_14, %c0_15] : memref<8x1xf32, #tpu.memory_space<vmem>>, vector<8x1xf32>
    %19 = arith.mulf %8, %8 : vector<8x16xf32>
    %cst_16 = arith.constant dense<0.000000e+00> : vector<8xf32>
    %20 = vector.multi_reduction <add>, %19, %cst_16 [1] : vector<8x16xf32> to vector<8xf32>
    %21 = vector.shape_cast %20 : vector<8xf32> to vector<8x1xf32>
    %22 = arith.addf %18, %21 : vector<8x1xf32>
    %c0_17 = arith.constant 0 : index
    %c0_18 = arith.constant 0 : index
    %23 = vector.load %arg7[%c0_17, %c0_18] : memref<8x1xf32, #tpu.memory_space<vmem>>, vector<8x1xf32>
    tpu.vector_store %arg7[%c0_17, %c0_18], %22 {strides = array<i32>} : memref<8x1xf32, #tpu.memory_space<vmem>>, vector<8x1xf32>,
    return
  }
  func.func @transform_0(%arg0: i32, %arg1: i32, %arg2: i32) -> (i32, i32, i32) {
    %c0_i32 = arith.constant 0 : i32
    %c0_i32_0 = arith.constant 0 : i32
    return %arg1, %c0_i32, %arg2 : i32, i32, i32
  }
  func.func @transform_1(%arg0: i32, %arg1: i32, %arg2: i32) -> (i32, i32) {
    %c0_i32 = arith.constant 0 : i32
    %c0_i32_0 = arith.constant 0 : i32
    return %arg0, %c0_i32 : i32, i32
  }
  func.func @transform_2(%arg0: i32, %arg1: i32, %arg2: i32) -> (i32, i32, i32) {
    %c0_i32 = arith.constant 0 : i32
    return %arg1, %arg0, %arg2 : i32, i32, i32
  }
  func.func @transform_3(%arg0: i32, %arg1: i32, %arg2: i32) -> (i32, i32) {
    %c0_i32 = arith.constant 0 : i32
    %c0_i32_0 = arith.constant 0 : i32
    return %arg0, %c0_i32 : i32, i32
  }
  func.func @transform_4(%arg0: i32, %arg1: i32, %arg2: i32) -> (i32, i32) {
    %c0_i32 = arith.constant 0 : i32
    %c0_i32_0 = arith.constant 0 : i32
    return %arg0, %c0_i32 : i32, i32
  }
}

module attributes {stable_mosaic.version = 11 : i64} {
  func.func @_bn_apply_kernel(%arg0: i32, %arg1: i32, %arg2: i32, %arg3: memref<1x8x16xbf16, #tpu.memory_space<vmem>>, %arg4: memref<8x1xf32, #tpu.memory_space<vmem>>, %arg5: memref<8x1xf32, #tpu.memory_space<vmem>>, %arg6: memref<1x8x16xf32, #tpu.memory_space<vmem>>, %arg7: memref<1x8x16xf32, #tpu.memory_space<vmem>>) attributes {dimension_semantics = [#tpu.dimension_semantics<parallel>, #tpu.dimension_semantics<parallel>, #tpu.dimension_semantics<parallel>], iteration_bounds = array<i64: 1, 2, 1>, scalar_prefetch = 0 : i64, scratch_operands = 0 : i64, tpu.core_type = #tpu.core_type<tc>, window_params = [{transform_indices = @transform_0, window_bounds = array<i64: 1, 8, 16>}, {transform_indices = @transform_1, window_bounds = array<i64: 8, 1>}, {transform_indices = @transform_2, window_bounds = array<i64: 8, 1>}, {transform_indices = @transform_3, window_bounds = array<i64: 1, 8, 16>}, {transform_indices = @transform_4, window_bounds = array<i64: 1, 8, 16>}]} {
    %c0 = arith.constant 0 : index
    %c0_0 = arith.constant 0 : index
    %c0_1 = arith.constant 0 : index
    %0 = vector.load %arg3[%c0, %c0_0, %c0_1] : memref<1x8x16xbf16, #tpu.memory_space<vmem>>, vector<1x8x16xbf16>
    %1 = vector.shape_cast %0 : vector<1x8x16xbf16> to vector<8x16xbf16>
    %2 = arith.extf %1 : vector<8x16xbf16> to vector<8x16xf32>
    %c0_2 = arith.constant 0 : index
    %c0_3 = arith.constant 0 : index
    %3 = vector.load %arg4[%c0_2, %c0_3] : memref<8x1xf32, #tpu.memory_space<vmem>>, vector<8x1xf32>
    %4 = vector.broadcast %3 : vector<8x1xf32> to vector<8x16xf32>
    %5 = arith.mulf %2, %4 : vector<8x16xf32>
    %c0_4 = arith.constant 0 : index
    %c0_5 = arith.constant 0 : index
    %6 = vector.load %arg5[%c0_4, %c0_5] : memref<8x1xf32, #tpu.memory_space<vmem>>, vector<8x1xf32>
    %7 = vector.broadcast %6 : vector<8x1xf32> to vector<8x16xf32>
    %8 = arith.addf %5, %7 : vector<8x16xf32>
    %c0_6 = arith.constant 0 : index
    %c0_7 = arith.constant 0 : index
    %c0_8 = arith.constant 0 : index
    %9 = vector.load %arg6[%c0_6, %c0_7, %c0_8] : memref<1x8x16xf32, #tpu.memory_space<vmem>>, vector<1x8x16xf32>
    %10 = vector.shape_cast %9 : vector<1x8x16xf32> to vector<8x16xf32>
    %11 = arith.addf %8, %10 : vector<8x16xf32>
    %c0_9 = arith.constant 0 : index
    %c0_10 = arith.constant 0 : index
    %c0_11 = arith.constant 0 : index
    %12 = vector.load %arg7[%c0_9, %c0_10, %c0_11] : memref<1x8x16xf32, #tpu.memory_space<vmem>>, vector<1x8x16xf32>
    %13 = vector.shape_cast %12 : vector<1x8x16xf32> to vector<8x16xf32>
    %14 = vector.shape_cast %11 : vector<8x16xf32> to vector<1x8x16xf32>
    tpu.vector_store %arg7[%c0_9, %c0_10, %c0_11], %14 {strides = array<i32>} : memref<1x8x16xf32, #tpu.memory_space<vmem>>, vector<1x8x16xf32>,
    return
  }
  func.func @transform_0(%arg0: i32, %arg1: i32, %arg2: i32) -> (i32, i32, i32) {
    %c0_i32 = arith.constant 0 : i32
    return %arg1, %arg0, %arg2 : i32, i32, i32
  }
  func.func @transform_1(%arg0: i32, %arg1: i32, %arg2: i32) -> (i32, i32) {
    %c0_i32 = arith.constant 0 : i32
    %c0_i32_0 = arith.constant 0 : i32
    return %arg0, %c0_i32 : i32, i32
  }
  func.func @transform_2(%arg0: i32, %arg1: i32, %arg2: i32) -> (i32, i32) {
    %c0_i32 = arith.constant 0 : i32
    %c0_i32_0 = arith.constant 0 : i32
    return %arg0, %c0_i32 : i32, i32
  }
  func.func @transform_3(%arg0: i32, %arg1: i32, %arg2: i32) -> (i32, i32, i32) {
    %c0_i32 = arith.constant 0 : i32
    return %arg1, %arg0, %arg2 : i32, i32, i32
  }
  func.func @transform_4(%arg0: i32, %arg1: i32, %arg2: i32) -> (i32, i32, i32) {
    %c0_i32 = arith.constant 0 : i32
    return %arg1, %arg0, %arg2 : i32, i32, i32
  }
}

</mosaic_0001>

<bundles_post_ra>
// kernel: grapher_forward.5
= control target key start
LH: loop header
LB: loop body
LE: loop exit
PB: predicated region body
PF: predicated region fallthrough
CT: control target
= control target key end

     0   :  { %10 = vsyncpa [#allocation3], 0  ;;  %s1120_s0 = inlined_call_operand.hbm [shape: f32[2,8,16], index: 0, kind: input, shape index: {}]   ;;  %s1121_s1 = inlined_call_operand.hbm [shape: bf16[8,8], index: 1, kind: input, shape index: {}]   ;;  %s1122_s2 = inlined_call_operand.hbm [shape: bf16[2,8,16], index: 2, kind: output, shape index: {0}]   ;;  %s1123_s3 = inlined_call_operand.hbm [shape: f32[8,1], index: 3, kind: output, shape index: {1}]   ;;  %s1124_s4 = inlined_call_operand.hbm [shape: f32[8,1], index: 4, kind: output, shape index: {2}]  }
   0x1   :  { %12 = vsyncpa [#allocation3 + $0x1], 0 }
   0x2   :  { %13 = vsyncpa [#allocation6], 0 }
   0x3   :  { %14 = vsyncpa [#allocation4], 0 }
   0x4   :  { %16 = vsyncpa [#allocation4 + $0x1], 0 }
   0x5   :  { %17 = vsyncpa [#allocation9], 0  ;;  %s862_s15 = smov 0   ;;  %s864_s16 = smov 0  }
   0x6   :  { %s866_s17 = smov 0   ;;  %s868_s18 = smov 0  }
   0x7   :  { %s870_s19 = smov 0   ;;  %s872_s20 = smov 0  }
   0x8 LB: > { %s507_s21 = sadd.s32 4294967295, %s827_s20   ;;  %s508_s22 = sadd.s32 4294967294, %s827_s20   ;;  %s827_s20 = sphi %s872_s20, %s23_s20   ;;  %s823_s19 = sphi %s870_s19, %s1151_s19   ;;  %s819_s18 = sphi %s868_s18, %s1150_s18   ;;  %s815_s17 = sphi %s866_s17, %s1149_s17   ;;  %s811_s16 = sphi %s864_s16, %s1148_s16   ;;  %s807_s15 = sphi %s862_s15, %s1147_s15  }
   0x9   : > { %p64_p0 = scmp.ne.s32.totalorder %s811_s16, %s807_s15  ;;  %p896_p1 = scmp.eq.s32.totalorder %s507_s21, 0 }
   0xa   : > { %p900_p2 = scmp.eq.s32.totalorder %s507_s21, 1  ;;  %p124_p3 = scmp.eq.s32.totalorder %s508_s22, 1 }
   0xb   : > { %s1130_s23 = scalar_select %p896_p1, 1, 0 }
   0xc   : > { %s1131_s24 = scalar_select %p900_p2, 1, 0 }
   0xd   : > { %p906_p4 = por %p896_p1, %p64_p0  ;;  %p509_p5 = scmp.ge.s32.totalorder %s827_s20, 1 }
   0xe   : > { %p911_p6 = por %p124_p3, %p64_p0  ;;  %p183_p7 = scmp.lt.s32.totalorder %s827_s20, 3 }
   0xf   : > { %s1132_s25 = scalar_select %p906_p4, 1, 0 }
  0x10   : > { %s1133_s26 = scalar_select %p911_p6, 1, 0 }
  0x11   : > { %p916_p8 = pnand %p509_p5, %p183_p7  ;;  %s829_s28 = smov [#allocation5]  }
  0x12   : > { %s198_s29 = sshll.u32 %s829_s28, 4  ;;  %s38_s5 = sadd.s32 1, %s823_s19  ;;  %s199_s29 = int_to_ptr.vmem [resolvable:$true] %s198_s29 }
  0x13   : > { %s1134_s27 = scalar_select %p916_p8, 1, 0 }
  0x14   : > { %p553_p10 = pneg %p916_p8  ;;  %s51_s6 = sadd.s32 1, %s815_s17 }
  0x15   : > { %p931_p12 = scmp.ge.s32.totalorder %s38_s5, 2  ;;  %s627_s10 = scalar_lea.hbm %s1121_s1, 64 }
  0x16   : > { %p925_p11 = pnand %p553_p10, %p896_p1  ;;  %p628_p13 = scmp.ne.s32.totalorder %s1121_s1, %s627_s10 }
  0x17   : > { %s1136_s7 = scalar_select %p931_p12, 1, 0 }
  0x18   : > { %p629_p0 = pneg %p925_p11  ;;  %p634_p7 = scmp.lt.u32.totalorder %s627_s10, %s1121_s1 }
  0x1a   : > { %p630_p3 = pnand %p629_p0, %p628_p13 }
  0x1c   : > { %p631_p5 = pneg %p630_p3 }
  0x1e   : > { %p636_p10 = pnand %p634_p7, %p631_p5 }
  0x20   : > { %639 = shalt.err (!%p636_p10)
}
  0x21   : > { %s640_s21 = scalar_lea.vmem %s199_s29, 64  ;;  %p648_p4 = scmp.lt.s32.totalorder %s199_s29, %s199_s29 }
  0x22   : > { %p641_p9 = scmp.ne.s32.totalorder %s199_s29, %s640_s21  ;;  %p649_p8 = scmp.lt.s32.totalorder %s640_s21, %s640_s21 }
  0x24   : > { %p643_p6 = pnand %p641_p9, %p629_p0  ;;  %p650_p2 = por %p649_p8, %p648_p4 }
  0x26   : > { %p644_p1 = pneg %p643_p6 }
  0x28   : > { %p651_p12 = pnand %p650_p2, %p644_p1 }
  0x2a   : > { %654 = shalt.err (!%p651_p12)
}
  0x2b   : > { %556 = dma.hbm_to_vmem [thread:$0]  (!%p925_p11), %s1121_s1, 64, %s199_s29, [#allocation6]  }
  0x2c   : > { %p1137_p4 = scmp.ne.s32.totalorder %s1136_s7, 0  ;;  %p58_p1 = scmp.ne.s32.totalorder %s815_s17, %s811_s16 }
  0x2d   : > { %p59_p2 = scmp.eq.s32.totalorder %s827_s20, 0  ;;  %p566_p6 = scmp.lt.s32.totalorder %s827_s20, 2 }
  0x2e   : > { %s1153_s5 = smov (%p1137_p4, %s38_s5), 0  ;;  %p1138_p12 = scmp.ne.s32.totalorder %s1131_s24, 0 }
  0x2f   : > { %s46_s30 = ssub.s32 %s823_s19, %s1153_s5  ;;  %p60_p9 = por %p59_p2, %p58_p1 }
  0x30   : > { %p49_p8 = scmp.eq.s32.totalorder %s46_s30, 0  ;;  %p963_p13 = por %p1138_p12, %p58_p1 }
  0x31   : > { %s209_s9 = sand.u32 1, %s815_s17   ;;  %s513_s7 = sshll.u32 %s823_s19, 7 }
  0x32   : > { %s971_s10 = scalar_select %p49_p8, %s815_s17, %s51_s6  }
  0x33   : > { %s512_s29 = sshll.u32 %s209_s9, 3  ;;  %s977_s13 = scalar_lea.hbm %s1120_s0, %s513_s7 }
  0x34   : > { %s213_s14 = scalar_lea.vmem [#allocation2], %s512_s29  ;;  %p981_p11 = pnand %p566_p6, %p60_p9 }
  0x35   : > { %s221_s21 = sshll.u32 %s213_s14, 4  ;;  %s210_s6 = scalar_lea.sflag [#allocation3], %s209_s9  ;;  %s979_s21 = int_to_ptr.vmem [resolvable:$true] %s221_s21 }
  0x36   : > { %s655_s28 = scalar_lea.hbm %s977_s13, 128  ;;  %p657_p3 = pneg %p981_p11 }
  0x37   : > { %p656_p0 = scmp.ne.s32.totalorder %s977_s13, %s655_s28  ;;  %s660_s7 = scalar_lea.hbm %s1120_s0, 256 }
  0x38   : > { %p661_p10 = scmp.lt.u32.totalorder %s977_s13, %s1120_s0  ;;  %p662_p4 = scmp.lt.u32.totalorder %s660_s7, %s655_s28 }
  0x39   : > { %p658_p5 = pnand %p657_p3, %p656_p0  ;;  %p664_p2 = scmp.lt.u32.totalorder %s655_s28, %s977_s13 }
  0x3a   : > { %p663_p1 = por %p662_p4, %p661_p10 }
  0x3b   : > { %p659_p7 = pneg %p658_p5 }
  0x3c   : > { %p665_p6 = por %p664_p2, %p663_p1 }
  0x3e   : > { %p666_p8 = pnand %p665_p6, %p659_p7 }
  0x40   : > { %669 = shalt.err (!%p666_p8)
}
  0x41   : > { %s670_s9 = scalar_lea.vmem %s979_s21, 128  ;;  %s830_s14 = smov [#allocation2]  }
  0x42   : > { %p671_p9 = scmp.ne.s32.totalorder %s979_s21, %s670_s9  ;;  %s675_s30 = sshll.u32 %s830_s14, 4  ;;  %s676_s30 = int_to_ptr.vmem [resolvable:$false] %s675_s30 }
  0x43   : > { %s677_s29 = scalar_lea.vmem %s676_s30, 256  ;;  %p678_p5 = scmp.lt.s32.totalorder %s979_s21, %s676_s30 }
  0x44   : > { %p673_p12 = pnand %p671_p9, %p657_p3  ;;  %p679_p10 = scmp.lt.s32.totalorder %s677_s29, %s670_s9 }
  0x46   : > { %p674_p0 = pneg %p673_p12  ;;  %p680_p4 = por %p679_p10, %p678_p5 }
  0x48   : > { %p681_p1 = pnand %p680_p4, %p674_p0 }
  0x4a   : > { %684 = shalt.err (!%p681_p1)
}
  0x4b   : > { %560 = dma.hbm_to_vmem [thread:$0]  (!%p981_p11), %s977_s13, 128, %s979_s21, %s210_s6  }
  0x4c   : > { %p1141_p7 = scmp.ne.s32.totalorder %s1134_s27, 0 }
  0x4d   : > { %s1013_s28 = sand.u32 (!%p1141_p7), 1, %s811_s16   ;;  %p1142_p3 = scmp.ne.s32.totalorder (!%p1141_p7), %s1132_s25, 0 }
  0x4e   : > { %230 = sbr.rel (%p1141_p7) target bundleno = 499 (0x1f3), region = 28  ;;  %s515_s7 = sshll.u32 (!%p1141_p7), %s1013_s28, 3 }
  0x4f   : > { %s233_s11 = scalar_lea.sflag (!%p1141_p7), [#allocation3], %s1013_s28  ;;  %s236_s12 = scalar_lea.vmem (!%p1141_p7), [#allocation2], %s515_s7 }
  0x55   : > { %790 = dma.done.wait (%p1142_p3), %s233_s11, 128  }
  0x56   : > { %792 = vsyncadd (%p1142_p3), %s233_s11, 4294967168  ;;  %p1143_p2 = scmp.ne.s32.totalorder %s1130_s23, 0 }
  0x58   : > { %794 = dma.done.wait (%p1143_p2), [#allocation6], 64  }
  0x59   : > { %796 = vsyncadd (%p1143_p2), [#allocation6], 4294967232  ;;  %s517_s27 = sshll.u32 %s1013_s28, 2  ;;  %p266_p11 = scmp.eq.s32.totalorder %s819_s18, 0 }
  0x5a   : > { %s1027_s13 = scalar_lea.vmem [#allocation7], %s517_s27  ;;  %vm272_vm0 = vcmask (%p266_p11), 7168   ;;  %v831_v0 = vmov (%p266_p11), 0.0  }
  0x5b   : > { %271 = sbr.rel (!%p266_p11) target bundleno = 98 (0x62), region = 40  ;;  %273 = vst.msk [vmem:[#allocation8] sm:$0xff] (%p266_p11), %vm272_vm0, %v831_v0  ;;  %274 = vst.msk [vmem:[#allocation10] sm:$0xff] (%p266_p11), %vm272_vm0, %v831_v0 }
  0x62 PF: > { %v275_v1 = vld [vmem:[%s236_s12] sm:$0xff]  ;;  %vm282_vm1 = vcmask 1043456   ;;  %v832_v2 = vmov 0.0   ;;  %vm833_vm2 = vmmov 0   ;;  %v277_v5 = vld [vmem:[#allocation5] sm:$0xf] }
  0x63   : > { %531 = vmatprep.subr.bf16.mxu0 %v832_v2  ;;  %v276_v3 = vpack.c.bf16 %v275_v1, %v275_v1  ;;  %533 = vmatprep.mubr.msk.bf16.mxu0 %vm833_vm2, %v832_v2  ;;  %vm278_vm3 = vcmask 64512   ;;  %vm330_vm4 = vcmask 130048   ;;  %vm327_vm5 = vcmask 125952   ;;  %s521_s23 = sshll.u32 %s819_s18, 6  ;;  %s360_s6 = sshll.u32 %s1027_s13, 4  ;;  %s361_s6 = int_to_ptr.vmem [resolvable:$true] %s360_s6 }
  0x64   : > { %s1034_s22 = scalar_lea.hbm %s1122_s2, %s521_s23  ;;  %s345_s9 = scalar_lea.sflag [#allocation4], %s1013_s28 }
  0x65   : > { %v284_v4 = vsel %vm282_vm1, %v276_v3, 0  ;;  %s685_s14 = scalar_lea.vmem %s361_s6, 64  ;;  %s834_s30 = smov [#allocation7]  }
  0x66   : > { %532 = vmatpush3.bf16.msra.mxu0 %v284_v4  ;;  %p686_p6 = scmp.ne.s32.totalorder %s361_s6, %s685_s14  ;;  %s689_s29 = sshll.u32 %s834_s30, 4  ;;  %s690_s29 = int_to_ptr.vmem [resolvable:$false] %s689_s29 }
  0x67   : > { %s691_s7 = scalar_lea.vmem %s690_s29, 128  ;;  %p692_p12 = scmp.lt.s32.totalorder %s361_s6, %s690_s29 }
  0x68   : > { %p687_p8 = pnand %p686_p6, %p963_p13  ;;  %p693_p0 = scmp.lt.s32.totalorder %s691_s7, %s685_s14 }
  0x69   : > { %534 = vmatmul.mubr.msk.bf16.vlgmr.msra.gmra.mrb[0].mxu0 %vm278_vm3, %v277_v5 }
  0x6a   : > { %p688_p9 = pneg %p687_p8  ;;  %p694_p5 = por %p693_p0, %p692_p12 }
  0x6c   : > { %p695_p10 = pnand %p694_p5, %p688_p9 }
 0x13c   : > { %v320_v6 = vpop.f32.mrb[0].mxu0 }
 0x13d   : > { %v326_v7 = vpack.c.bf16 %v320_v6, %v320_v6  ;;  %v535_v8 = vpop.f32.mrb[1].mxu0  ;;  %v331_v9 = vsel %vm330_vm4, %v320_v6, 0.0  ;;  %v338_v10 = vmul.f32 %v320_v6, %v320_v6 }
 0x13e   : > { %332 = vadd.xlane.f32.xlu0 %v331_v9  ;;  %v323_v11 = vpop.f32.mrb[2].mxu0 }
 0x13f   : > { %v536_v12 = vpop.f32.mrb[3].mxu0  ;;  %328 = vst.msk [vmem:[%s1027_s13] sm:$0xf] %vm327_vm5, %v326_v7  ;;  %v339_v13 = vsel %vm330_vm4, %v338_v10, 0.0 }
 0x142   : > { %340 = vadd.xlane.f32.xlu0 %v339_v13 }
 0x143   : > { %698 = shalt.err (!%p695_p10)
}
 0x144   : > { %s699_s18 = scalar_lea.hbm %s1034_s22, 64  ;;  %s703_s12 = scalar_lea.hbm %s1122_s2, 128 }
 0x145   : > { %p700_p4 = scmp.ne.s32.totalorder %s1034_s22, %s699_s18  ;;  %p704_p3 = scmp.lt.u32.totalorder %s1034_s22, %s1122_s2 }
 0x146   : > { %p705_p2 = scmp.lt.u32.totalorder %s703_s12, %s699_s18  ;;  %p707_p6 = scmp.lt.u32.totalorder %s699_s18, %s1034_s22 }
 0x147   : > { %p701_p1 = pnand %p700_p4, %p963_p13 }
 0x148   : > { %p706_p11 = por %p705_p2, %p704_p3 }
 0x149   : > { %p702_p7 = pneg %p701_p1 }
 0x14a   : > { %p708_p8 = por %p707_p6, %p706_p11 }
 0x14c   : > { %p709_p9 = pnand %p708_p8, %p702_p7 }
 0x14e   : > { %712 = shalt.err (!%p709_p9)
}
 0x14f   : > { %543 = dma.vmem_to_hbm [thread:$0]  (%p963_p13), %s361_s6, 64, %s1034_s22, %s345_s9   ;;  %v329_v14 = vld [vmem:[#allocation8] sm:$0xff]  ;;  %vm335_vm6 = vcmask 7168   ;;  %v337_v17 = vld [vmem:[#allocation10] sm:$0xff] }
 0x150   : > { %s835_s23 = smov [#allocation8]   ;;  %s836_s21 = smov [#allocation10]  }
 0x151   : > { %s373_s25 = sshll.u32 %s835_s23, 4  ;;  %s386_s14 = sshll.u32 %s836_s21, 4  ;;  %s374_s25 = int_to_ptr.vmem [resolvable:$true] %s373_s25  ;;  %s387_s14 = int_to_ptr.vmem [resolvable:$true] %s386_s14 }
 0x152   : > { %s713_s30 = scalar_lea.vmem %s374_s25, 128  ;;  %p1144_p0 = scmp.ne.s32.totalorder %s1131_s24, 0 }
 0x153   : > { %p714_p12 = scmp.ne.s32.totalorder %s374_s25, %s713_s30  ;;  %p720_p4 = scmp.lt.s32.totalorder %s374_s25, %s374_s25 }
 0x154   : > { %p721_p13 = scmp.lt.s32.totalorder %s713_s30, %s713_s30 }
 0x155   : > { %p715_p5 = pnand %p714_p12, %p1144_p0 }
 0x156   : > { %p722_p1 = por %p721_p13, %p720_p4 }
 0x157   : > { %p716_p10 = pneg %p715_p5 }
 0x159   : > { %p723_p7 = pnand %p722_p1, %p716_p10 }
 0x1cb   : > { %v333_v15 = vpop.xlane.xlu0 %332 }
 0x1cc   : > { %v334_v16 = vadd.f32 %v333_v15, %v329_v14 }
 0x1ce   : > { %336 = vst.msk [vmem:[#allocation8] sm:$0xff] %vm335_vm6, %v334_v16 }
 0x1cf   : > { %v341_v18 = vpop.xlane.xlu0 %340 }
 0x1d0   : > { %726 = shalt.err (!%p723_p7)
}
 0x1d1   : > { %s727_s6 = scalar_lea.hbm %s1123_s3, 128 }
 0x1d2   : > { %p728_p3 = scmp.ne.s32.totalorder %s1123_s3, %s727_s6  ;;  %p733_p6 = scmp.lt.u32.totalorder %s727_s6, %s1123_s3 }
 0x1d4   : > { %p729_p2 = pnand %p728_p3, %p1144_p0 }
 0x1d6   : > { %p730_p11 = pneg %p729_p2 }
 0x1d8   : > { %p735_p8 = pnand %p733_p6, %p730_p11 }
 0x1da   : > { %738 = shalt.err (!%p735_p8)
}
 0x1db   : > { %545 = dma.vmem_to_hbm [thread:$0]  (%p1144_p0), %s374_s25, 128, %s1123_s3, [#allocation9]   ;;  %v342_v19 = vadd.f32 %v341_v18, %v337_v17 }
 0x1dc   : > { %s739_s12 = scalar_lea.vmem %s387_s14, 128  ;;  %p746_p10 = scmp.lt.s32.totalorder %s387_s14, %s387_s14 }
 0x1dd   : > { %343 = vst.msk [vmem:[#allocation10] sm:$0xff] %vm335_vm6, %v342_v19  ;;  %p740_p9 = scmp.ne.s32.totalorder %s387_s14, %s739_s12  ;;  %p747_p4 = scmp.lt.s32.totalorder %s739_s12, %s739_s12 }
 0x1df   : > { %p741_p12 = pnand %p740_p9, %p1144_p0  ;;  %p748_p13 = por %p747_p4, %p746_p10 }
 0x1e1   : > { %p742_p5 = pneg %p741_p12 }
 0x1e3   : > { %p749_p1 = pnand %p748_p13, %p742_p5 }
 0x1e5   : > { %752 = shalt.err (!%p749_p1)
}
 0x1e6   : > { %s753_s23 = scalar_lea.hbm %s1124_s4, 128 }
 0x1e7   : > { %p754_p7 = scmp.ne.s32.totalorder %s1124_s4, %s753_s23  ;;  %p759_p11 = scmp.lt.u32.totalorder %s753_s23, %s1124_s4 }
 0x1e9   : > { %p755_p3 = pnand %p754_p7, %p1144_p0 }
 0x1eb   : > { %p756_p2 = pneg %p755_p3 }
 0x1ed   : > { %p761_p6 = pnand %p759_p11, %p756_p2 }
 0x1ef   : > { %764 = shalt.err (!%p761_p6)
}
 0x1f0   : > { %547 = dma.vmem_to_hbm [thread:$0]  (%p1144_p0), %s387_s14, 128, %s1124_s4, [#allocation9]  }
 0x1f1   : > { %798 = dma.done.wait (%p1144_p0), [#allocation9], 256  }
 0x1f2   : > { %800 = vsyncadd (%p1144_p0), [#allocation9], 4294967040 }
 0x1f3 PF: > { %s406_s9 = sand.u32 1, %s807_s15   ;;  %p1145_p8 = scmp.ne.s32.totalorder %s1133_s26, 0 }
 0x1f4   : > { %p1146_p9 = scmp.ge.s32.totalorder %s827_s20, 2  ;;  %s407_s29 = scalar_lea.sflag [#allocation4], %s406_s9 }
 0x1f6   : > { %p562_p12 = pnand %p1146_p9, %p1145_p8 }
 0x1f8   : > { %802 = dma.done.wait (!%p562_p12), %s407_s29, 64  }
 0x1f9   : > { %804 = vsyncadd (!%p562_p12), %s407_s29, 4294967232  ;;  %s23_s20 = sadd.s32 1, %s827_s20   ;;  %s1147_s15 = smov %s811_s16 }
 0x1fa   : > { %p20_p5 = scmp.ge.s32.totalorder %s23_s20, 4   ;;  %s1148_s16 = smov %s815_s17 }
 0x1fb   : > { %s1149_s17 = smov %s971_s10  ;;  %s1150_s18 = smov %s823_s19 }
 0x1fc   : > { %s1151_s19 = smov %s1153_s5  ;;  %22 = sbr.rel (!%p20_p5) target bundleno = 8 (0x8), region = 100 }
 0x203   :  { %412 = vsyncpa [#allocation3], 1 }
 0x204   :  { %414 = vsyncpa [#allocation3 + $0x1], 1 }
 0x205   :  { %415 = vsyncpa [#allocation6], 1 }
 0x206   :  { %416 = vsyncpa [#allocation4], 1 }
 0x207   :  { %418 = vsyncpa [#allocation4 + $0x1], 1 }
 0x208   :  { %419 = vsyncpa [#allocation9], 1 }

// kernel: grapher_forward.6
= control target key start
LH: loop header
LB: loop body
LE: loop exit
PB: predicated region body
PF: predicated region fallthrough
CT: control target
= control target key end

     0   :  { %s1385_s0 = inlined_call_operand.hbm [shape: bf16[2,8,16], index: 0, kind: input, shape index: {}, may-alias: {0,1}]   ;;  %s1386_s1 = inlined_call_operand.hbm [shape: bf16[2,8,16], index: 1, kind: input, shape index: {}, may-alias: {0,1}]   ;;  %s1387_s2 = inlined_call_operand.hbm [shape: f32[8,1], index: 2, kind: input, shape index: {}]   ;;  %s1388_s3 = inlined_call_operand.hbm [shape: f32[8,1], index: 3, kind: input, shape index: {}]   ;;  %s1389_s4 = inlined_call_operand.hbm [shape: s32[2,4,16], index: 4, kind: output, shape index: {}]  }
   0x1   :  { %1395 = sst [smem:[#allocation18_spill]] %s1387_s2 }
   0x2   :  { %1396 = sst [smem:[#allocation19_spill]] %s1388_s3 }
   0x3   :  { %9 = vsyncpa [#allocation4], 0 }
   0x4   :  { %11 = vsyncpa [#allocation4 + $0x1], 0 }
   0x5   :  { %12 = vsyncpa [#allocation7], 0 }
   0x6   :  { %14 = vsyncpa [#allocation7 + $0x1], 0 }
   0x7   :  { %15 = vsyncpa [#allocation10], 0 }
   0x8   :  { %16 = vsyncpa [#allocation5], 0 }
   0x9   :  { %18 = vsyncpa [#allocation5 + $0x1], 0  ;;  %s1055_s15 = smov 0   ;;  %s1057_s16 = smov 0  }
   0xa   :  { %s1059_s17 = smov 0   ;;  %s1061_s18 = smov 0  }
   0xb   :  { %s1063_s19 = smov 0   ;;  %s1065_s20 = smov 0  }
   0xc LB: > { %s1086_s21 = sadd.s32 4294967295, %s1020_s20   ;;  %s685_s22 = sadd.s32 4294967294, %s1020_s20   ;;  %s1020_s20 = sphi %s1065_s20, %s24_s20   ;;  %s1016_s19 = sphi %s1063_s19, %s1421_s19   ;;  %s1012_s18 = sphi %s1061_s18, %s1420_s18   ;;  %s1008_s17 = sphi %s1059_s17, %s1419_s17   ;;  %s1004_s16 = sphi %s1057_s16, %s1418_s16   ;;  %s1000_s15 = sphi %s1055_s15, %s1417_s15  }
   0xd   : > { %p56_p0 = scmp.ne.s32.totalorder %s1004_s16, %s1000_s15  ;;  %p1390_p1 = scmp.eq.s32.totalorder %s1086_s21, 0 }
   0xe   : > { %p158_p3 = scmp.eq.s32.totalorder %s685_s22, 1  ;;  %p686_p5 = scmp.ge.s32.totalorder %s1020_s20, 1 }
   0xf   : > { %p1095_p4 = por %p1390_p1, %p56_p0  ;;  %p165_p7 = scmp.lt.s32.totalorder %s1020_s20, 3 }
  0x10   : > { %p1100_p6 = por %p158_p3, %p56_p0  ;;  %s1022_s26 = smov [#allocation8]  }
  0x11   : > { %s1397_s23 = scalar_select %p1095_p4, 1, 0 }
  0x12   : > { %s1398_s24 = scalar_select %p1100_p6, 1, 0 }
  0x13   : > { %p1105_p8 = pnand %p686_p5, %p165_p7  ;;  %s178_s27 = sshll.u32 %s1022_s26, 4  ;;  %s179_s27 = int_to_ptr.vmem [resolvable:$true] %s178_s27 }
  0x14   : > { %s1023_s28 = smov [#allocation9]   ;;  %s1401_s2 = sld [smem:[#allocation18_spill]] }
  0x15   : > { %s1399_s25 = scalar_select %p1105_p8, 1, 0 }
  0x16   : > { %p727_p10 = pneg %p1105_p8  ;;  %s189_s29 = sshll.u32 %s1023_s28, 4  ;;  %s1118_s29 = int_to_ptr.vmem [resolvable:$true] %s189_s29 }
  0x18   : > { %p1114_p11 = pnand %p727_p10, %p1390_p1 }
  0x1a   : > { %s810_s7 = scalar_lea.hbm %s1401_s2, 128  ;;  %p812_p13 = pneg %p1114_p11 }
  0x1b   : > { %p811_p12 = scmp.ne.s32.totalorder %s1401_s2, %s810_s7  ;;  %p817_p5 = scmp.lt.u32.totalorder %s810_s7, %s1401_s2 }
  0x1d   : > { %p813_p0 = pnand %p812_p13, %p811_p12 }
  0x1f   : > { %p814_p3 = pneg %p813_p0 }
  0x21   : > { %p819_p7 = pnand %p817_p5, %p814_p3 }
  0x23   : > { %822 = shalt.err (!%p819_p7)
}
  0x24   : > { %s823_s12 = scalar_lea.vmem %s179_s27, 128  ;;  %p831_p2 = scmp.lt.s32.totalorder %s179_s27, %s179_s27 }
  0x25   : > { %p824_p10 = scmp.ne.s32.totalorder %s179_s27, %s823_s12  ;;  %p832_p6 = scmp.lt.s32.totalorder %s823_s12, %s823_s12 }
  0x27   : > { %p826_p9 = pnand %p824_p10, %p812_p13  ;;  %p833_p4 = por %p832_p6, %p831_p2 }
  0x29   : > { %p827_p1 = pneg %p826_p9 }
  0x2b   : > { %p834_p8 = pnand %p833_p4, %p827_p1 }
  0x2d   : > { %837 = shalt.err (!%p834_p8)
}
  0x2e   : > { %730 = dma.hbm_to_vmem [thread:$0]  (!%p1114_p11), %s1401_s2, 128, %s179_s27, [#allocation7]  }
  0x2f   : > { %s1402_s3 = sld [smem:[#allocation19_spill]] }
  0x35   : > { %s838_s28 = scalar_lea.hbm %s1402_s3, 128 }
  0x36   : > { %p839_p9 = scmp.ne.s32.totalorder %s1402_s3, %s838_s28  ;;  %p845_p4 = scmp.lt.u32.totalorder %s838_s28, %s1402_s3 }
  0x38   : > { %p841_p2 = pnand %p839_p9, %p812_p13 }
  0x3a   : > { %p842_p1 = pneg %p841_p2 }
  0x3c   : > { %p847_p6 = pnand %p845_p4, %p842_p1 }
  0x3e   : > { %850 = shalt.err (!%p847_p6)
}
  0x3f   : > { %s851_s27 = scalar_lea.vmem %s1118_s29, 128  ;;  %p859_p3 = scmp.lt.s32.totalorder %s1118_s29, %s1118_s29 }
  0x40   : > { %p852_p8 = scmp.ne.s32.totalorder %s1118_s29, %s851_s27  ;;  %p860_p5 = scmp.lt.s32.totalorder %s851_s27, %s851_s27 }
  0x42   : > { %p854_p12 = pnand %p852_p8, %p812_p13  ;;  %p861_p7 = por %p860_p5, %p859_p3 }
  0x44   : > { %p855_p0 = pneg %p854_p12 }
  0x46   : > { %p862_p10 = pnand %p861_p7, %p855_p0 }
  0x48   : > { %865 = shalt.err (!%p862_p10)
}
  0x49   : > { %733 = dma.hbm_to_vmem [thread:$0]  (!%p1114_p11), %s1402_s3, 128, %s1118_s29, [#allocation10]  }
  0x4a   : > { %s36_s11 = sadd.s32 1, %s1016_s19  ;;  %s43_s12 = sadd.s32 1, %s1008_s17 }
  0x4b   : > { %p38_p13 = scmp.ge.s32.totalorder %s36_s11, 2  ;;  %p50_p9 = scmp.ne.s32.totalorder %s1008_s17, %s1004_s16 }
  0x4c   : > { %p51_p2 = scmp.eq.s32.totalorder %s1020_s20, 0  ;;  %p747_p1 = scmp.lt.s32.totalorder %s1020_s20, 2 }
  0x4d   : > { %s1423_s11 = smov (%p38_p13, %s36_s11), 0  ;;  %p1404_p6 = scmp.eq.s32.totalorder %s1086_s21, 1 }
  0x4e   : > { %1403 = sst [smem:[#allocation17_spill]] %s1423_s11  ;;  %p52_p4 = por %p51_p2, %p50_p9 }
  0x4f   : > { %p1177_p8 = por %p1404_p6, %p50_p9  ;;  %s40_s13 = ssub.s32 %s1016_s19, %s1423_s11 }
  0x50   : > { %s200_s14 = sand.u32 1, %s1008_s17   ;;  %p41_p12 = scmp.eq.s32.totalorder %s40_s13, 0 }
  0x51   : > { %s1405_s30 = scalar_select %p1177_p8, 1, 0 }
  0x52   : > { %s1184_s29 = sshll.u32 %s200_s14, 2  ;;  %s691_s22 = sshll.u32 %s1016_s19, 6 }
  0x53   : > { %s1188_s26 = scalar_select %p41_p12, %s1008_s17, %s43_s12  }
  0x54   : > { %s1193_s6 = scalar_lea.hbm %s1385_s0, %s691_s22  ;;  %s204_s7 = scalar_lea.vmem [#allocation3], %s1184_s29 }
  0x55   : > { %s211_s8 = sshll.u32 %s204_s7, 4  ;;  %p1198_p11 = pnand %p747_p1, %p52_p4  ;;  %s1202_s8 = int_to_ptr.vmem [resolvable:$true] %s211_s8 }
  0x56   : > { %s1207_s12 = scalar_lea.hbm %s1386_s1, %s691_s22  ;;  %s201_s13 = scalar_lea.sflag [#allocation4], %s200_s14 }
  0x57   : > { %s866_s28 = scalar_lea.hbm %s1193_s6, 64  ;;  %p868_p3 = pneg %p1198_p11 }
  0x58   : > { %p867_p0 = scmp.ne.s32.totalorder %s1193_s6, %s866_s28  ;;  %s871_s2 = scalar_lea.hbm %s1385_s0, 128 }
  0x59   : > { %p872_p10 = scmp.lt.u32.totalorder %s1193_s6, %s1385_s0  ;;  %p873_p13 = scmp.lt.u32.totalorder %s871_s2, %s866_s28 }
  0x5a   : > { %p869_p5 = pnand %p868_p3, %p867_p0  ;;  %p875_p2 = scmp.lt.u32.totalorder %s866_s28, %s1193_s6 }
  0x5b   : > { %p874_p9 = por %p873_p13, %p872_p10 }
  0x5c   : > { %p870_p7 = pneg %p869_p5 }
  0x5d   : > { %p876_p1 = por %p875_p2, %p874_p9 }
  0x5f   : > { %p877_p4 = pnand %p876_p1, %p870_p7 }
  0x61   : > { %880 = shalt.err (!%p877_p4)
}
  0x62   : > { %s881_s14 = scalar_lea.vmem %s1202_s8, 64  ;;  %s1024_s22 = smov [#allocation3]  }
  0x63   : > { %p882_p6 = scmp.ne.s32.totalorder %s1202_s8, %s881_s14  ;;  %s886_s9 = sshll.u32 %s1024_s22, 4  ;;  %s887_s9 = int_to_ptr.vmem [resolvable:$false] %s886_s9 }
  0x64   : > { %s888_s3 = scalar_lea.vmem %s887_s9, 128  ;;  %p889_p5 = scmp.lt.s32.totalorder %s1202_s8, %s887_s9 }
  0x65   : > { %p884_p12 = pnand %p882_p6, %p868_p3  ;;  %p890_p10 = scmp.lt.s32.totalorder %s888_s3, %s881_s14 }
  0x67   : > { %p885_p0 = pneg %p884_p12  ;;  %p891_p13 = por %p890_p10, %p889_p5 }
  0x69   : > { %p892_p9 = pnand %p891_p13, %p885_p0 }
  0x6b   : > { %895 = shalt.err (!%p892_p9)
}
  0x6c   : > { %737 = dma.hbm_to_vmem [thread:$0]  (!%p1198_p11), %s1193_s6, 64, %s1202_s8, %s201_s13  }
  0x6d   : > { %s218_s2 = sand.u32 1, %s1020_s20   ;;  %s222_s11 = scalar_lea.vmem [#allocation6], %s1184_s29 }
  0x6e   : > { %s230_s10 = sshll.u32 %s222_s11, 4  ;;  %s219_s28 = scalar_lea.sflag [#allocation7], %s218_s2  ;;  %s231_s10 = int_to_ptr.vmem [resolvable:$true] %s230_s10 }
  0x6f   : > { %s896_s5 = scalar_lea.hbm %s1207_s12, 64  ;;  %s901_s22 = scalar_lea.hbm %s1386_s1, 128 }
  0x70   : > { %p897_p7 = scmp.ne.s32.totalorder %s1207_s12, %s896_s5  ;;  %p902_p4 = scmp.lt.u32.totalorder %s1207_s12, %s1386_s1 }
  0x71   : > { %p903_p6 = scmp.lt.u32.totalorder %s901_s22, %s896_s5  ;;  %p905_p0 = scmp.lt.u32.totalorder %s896_s5, %s1207_s12 }
  0x72   : > { %p899_p2 = pnand %p897_p7, %p868_p3 }
  0x73   : > { %p904_p12 = por %p903_p6, %p902_p4 }
  0x74   : > { %p900_p1 = pneg %p899_p2 }
  0x75   : > { %p906_p5 = por %p905_p0, %p904_p12 }
  0x77   : > { %p907_p10 = pnand %p906_p5, %p900_p1 }
  0x79   : > { %910 = shalt.err (!%p907_p10)
}
  0x7a   : > { %s911_s29 = scalar_lea.vmem %s231_s10, 64  ;;  %s1025_s6 = smov [#allocation6]  }
  0x7b   : > { %p912_p13 = scmp.ne.s32.totalorder %s231_s10, %s911_s29  ;;  %s916_s8 = sshll.u32 %s1025_s6, 4  ;;  %s917_s8 = int_to_ptr.vmem [resolvable:$false] %s916_s8 }
  0x7c   : > { %s918_s13 = scalar_lea.vmem %s917_s8, 128  ;;  %p919_p2 = scmp.lt.s32.totalorder %s231_s10, %s917_s8 }
  0x7d   : > { %p914_p9 = pnand %p912_p13, %p868_p3  ;;  %p920_p8 = scmp.lt.s32.totalorder %s918_s13, %s911_s29 }
  0x7f   : > { %p915_p7 = pneg %p914_p9  ;;  %p921_p4 = por %p920_p8, %p919_p2 }
  0x81   : > { %p922_p6 = pnand %p921_p4, %p915_p7 }
  0x83   : > { %925 = shalt.err (!%p922_p6)
}
  0x84   : > { %740 = dma.hbm_to_vmem [thread:$0]  (!%p1198_p11), %s1207_s12, 64, %s231_s10, %s219_s28  }
  0x85   : > { %p1407_p1 = scmp.ne.s32.totalorder %s1399_s25, 0 }
  0x86   : > { %s1258_s2 = sand.u32 (!%p1407_p1), 1, %s1004_s16   ;;  %p1408_p8 = scmp.ne.s32.totalorder (!%p1407_p1), %s1397_s23, 0 }
  0x87   : > { %239 = sbr.rel (%p1407_p1) target bundleno = 794 (0x31a), region = 36  ;;  %s1261_s11 = sshll.u32 (!%p1407_p1), %s1258_s2, 2 }
  0x88   : > { %s242_s5 = scalar_lea.sflag (!%p1407_p1), [#allocation4], %s1258_s2  ;;  %s245_s7 = scalar_lea.vmem (!%p1407_p1), [#allocation3], %s1261_s11 }
  0x8e   : > { %979 = dma.done.wait (%p1408_p8), %s242_s5, 64  }
  0x8f   : > { %981 = vsyncadd (%p1408_p8), %s242_s5, 4294967232  ;;  %s250_s25 = sand.u32 1, %s1086_s21   ;;  %s254_s12 = scalar_lea.vmem [#allocation6], %s1261_s11 }
  0x90   : > { %s251_s27 = scalar_lea.sflag [#allocation7], %s250_s25 }
  0x91   : > { %983 = dma.done.wait (%p1408_p8), %s251_s27, 64  }
  0x92   : > { %985 = vsyncadd (%p1408_p8), %s251_s27, 4294967232  ;;  %p1409_p11 = scmp.eq.s32.totalorder %s1086_s21, 0 }
  0x94   : > { %987 = dma.done.wait (%p1409_p11), [#allocation7], 128   ;;  %p1410_p3 = pmov %p1409_p11 }
  0x96   : > { %989 = vsyncadd (%p1410_p3), [#allocation7], 4294967168  ;;  %p1411_p12 = pmov %p1410_p3 }
  0x97   : > { %p1412_p0 = pmov %p1410_p3 }
  0x98   : > { %991 = dma.done.wait (%p1411_p12), [#allocation10], 128  }
  0x99   : > { %993 = vsyncadd (%p1412_p0), [#allocation10], 4294967168  ;;  %v1026_v0 = vmov 0   ;;  %v299_v1 = vld [vmem:[#allocation8] sm:$0xff]  ;;  %v306_v2 = vld [vmem:[#allocation9] sm:$0xff]  ;;  %v1027_v3 = vmov 0.0   ;;  %v423_v51 = vlaneseq }
  0x9a   : > { %804 = vset.pattern.permute.xlu0 %v1026_v0  ;;  %805 = vset.pattern.permute.xlu1 %v1026_v0  ;;  %vm1028_vm0 = vmmov 0   ;;  %v328_v4 = vld [vmem:[%s254_s12] sm:$0xf]  ;;  %v297_v5 = vld [vmem:[%s245_s7] sm:$0xf]  ;;  %vm314_vm1 = vcmask 130048  }
  0x9b   : > { %302 = vperm.xlu0 %804, %v299_v1   ;;  %333 = vperm.xlu1 %805, %v299_v1   ;;  %v329_v6 = vunpack.c.l.bf16 %v328_v4  ;;  %v298_v7 = vunpack.c.l.bf16 %v297_v5  ;;  %vm326_vm2 = vcmask 125952   ;;  %vm378_vm3 = vcmask 1043456   ;;  %s1297_s21 = scalar_lea.vmem [#allocation11], %s1261_s11  ;;  %s702_s23 = sshll.u32 %s1012_s18, 6 }
  0x9c   : > { %707 = vmatprep.subr.bf16.mxu0 %v1027_v3  ;;  %709 = vmatprep.mubr.msk.bf16.mxu0 %vm1028_vm0, %v1027_v3  ;;  %vm374_vm4 = vcmask 64512   ;;  %v1287_v54 = vshrl.u32 %v423_v51, 7  ;;  %vm452_vm10 = vcmask 122880   ;;  %s562_s10 = sshll.u32 %s1297_s21, 4  ;;  %s1334_s22 = scalar_lea.hbm %s1389_s4, %s702_s23  ;;  %s1336_s10 = int_to_ptr.vmem [resolvable:$true] %s562_s10 }
  0x9d   : > { %s548_s9 = scalar_lea.sflag [#allocation5], %s1258_s2  ;;  %s926_s3 = scalar_lea.vmem %s1336_s10, 64 }
  0x9e   : > { %v1290_v57 = vadd.s32 8, %v1287_v54  ;;  %p927_p5 = scmp.ne.s32.totalorder %s1336_s10, %s926_s3  ;;  %p1413_p10 = scmp.ne.s32.totalorder %s1405_s30, 0 }
  0x9f   : > { %309 = vperm.xlu0 %804, %v306_v2   ;;  %340 = vperm.xlu1 %805, %v306_v2   ;;  %s1029_s18 = smov [#allocation11]  }
  0xa0   : > { %p928_p13 = pnand %p927_p5, %p1413_p10  ;;  %s930_s29 = sshll.u32 %s1029_s18, 4  ;;  %s931_s29 = int_to_ptr.vmem [resolvable:$false] %s930_s29 }
  0xa1   : > { %s932_s6 = scalar_lea.vmem %s931_s29, 128  ;;  %p933_p7 = scmp.lt.s32.totalorder %s1336_s10, %s931_s29 }
  0xa2   : > { %p929_p9 = pneg %p928_p13  ;;  %p934_p2 = scmp.lt.s32.totalorder %s932_s6, %s926_s3 }
  0xa4   : > { %p935_p4 = por %p934_p2, %p933_p7 }
  0xa6   : > { %p936_p6 = pnand %p935_p4, %p929_p9 }
 0x11a   : > { %v303_v8 = vpop.permute.xlu0 %302  ;;  %v334_v9 = vpop.permute.xlu1 %333 }
 0x11b   : > { %v336_v10 = vmul.f32 %v334_v9, %v329_v6  ;;  %v305_v11 = vmul.f32 %v303_v8, %v298_v7 }
 0x11e   : > { %v310_v12 = vpop.permute.xlu0 %309  ;;  %v341_v13 = vpop.permute.xlu1 %340 }
 0x11f   : > { %v312_v14 = vadd.f32 %v310_v12, %v305_v11  ;;  %v343_v15 = vadd.f32 %v341_v13, %v336_v10 }
 0x121   : > { %v313_v16 = vmul.f32 %v312_v14, %v312_v14  ;;  %v344_v17 = vmul.f32 %v343_v15, %v343_v15 }
 0x123   : > { %v315_v18 = vsel %vm314_vm1, %v313_v16, 0.0  ;;  %v346_v19 = vsel %vm314_vm1, %v344_v17, 0.0 }
 0x124   : > { %v316_v20 = vrot.slane %v315_v18, 4  ;;  %v347_v21 = vrot.slane %v346_v19, 4 }
 0x126   : > { %v317_v22 = vadd.f32 %v316_v20, %v315_v18  ;;  %v348_v23 = vadd.f32 %v347_v21, %v346_v19 }
 0x128   : > { %v318_v24 = vrot.slane %v317_v22, 2  ;;  %v349_v25 = vrot.slane %v348_v23, 2 }
 0x12a   : > { %v319_v26 = vadd.f32 %v318_v24, %v317_v22  ;;  %v350_v27 = vadd.f32 %v349_v25, %v348_v23 }
 0x12c   : > { %v320_v28 = vrot.slane %v319_v26, 1  ;;  %v351_v29 = vrot.slane %v350_v27, 1 }
 0x12e   : > { %v321_v30 = vadd.f32 %v320_v28, %v319_v26  ;;  %v352_v31 = vadd.f32 %v351_v29, %v350_v27 }
 0x130   : > { %v322_v32 = vmax.f32 %v321_v30, 1e-24  ;;  %v353_v33 = vmax.f32 %v352_v31, 1e-24 }
 0x132   : > { %806 = vrsqrt.f32 %v322_v32 }
 0x133   : > { %808 = vrsqrt.f32 %v353_v33 }
 0x13c   : > { %v807_v34 = vpop.eup %806 }
 0x13d   : > { %v809_v35 = vpop.eup %808  ;;  %v324_v36 = vmul.f32 %v807_v34, %v312_v14 }
 0x13e   : > { %v355_v37 = vmul.f32 %v809_v35, %v343_v15 }
 0x13f   : > { %v325_v38 = vpack.c.bf16 %v324_v36, %v324_v36 }
 0x140   : > { %v357_v39 = vpack.c.bf16 %v355_v37, %v355_v37 }
 0x141   : > { %327 = vst.msk [vmem:[#allocation2] sm:$0xf] %vm326_vm2, %v325_v38 }
 0x142   : > { %v380_v40 = vsel %vm378_vm3, %v357_v39, 0 }
 0x143   : > { %708 = vmatpush3.bf16.msra.mxu0 %v380_v40 }
 0x148   : > { %v356_v41 = vld [vmem:[#allocation2] sm:$0xf] }
 0x149   : > { %358 = vxpose.xlu0.c.b16.start.end [1/1] (short) (narrow) %v356_v41, 16 }
 0x1af   : > { %v366_v42 = vpop.trf.xlu0 }
 0x1b0   : > { %710 = vmatmul.mubr.msk.bf16.vlgmr.msra.gmra.mrb[0].mxu0 %vm374_vm4, %v366_v42 }
 0x283   : > { %v416_v43 = vpop.f32.mrb[0].mxu0 }
 0x284   : > { %v711_v44 = vpop.f32.mrb[1].mxu0  ;;  %v426_v46 = vsel %vm314_vm1, %v416_v43, -inf }
 0x285   : > { %v419_v45 = vpop.f32.mrb[2].mxu0 }
 0x286   : > { %v427_v47 = vsel %vm314_vm1, %v419_v45, -inf  ;;  %v712_v48 = vpop.f32.mrb[3].mxu0 }
 0x287   : > { %v428_v49 = vmax.f32 %v426_v46, %v427_v47 }
 0x289   : > { %v429_v50 = vrot.slane %v428_v49, 4 }
 0x28b   : > { %v430_v52 = vmax.f32 %v428_v49, %v429_v50 }
 0x28d   : > { %v431_v53 = vrot.slane %v430_v52, 2 }
 0x28f   : > { %v432_v55 = vmax.f32 %v430_v52, %v431_v53 }
 0x291   : > { %v433_v56 = vrot.slane %v432_v55, 1 }
 0x293   : > { %v434_v58 = vmax.f32 %v432_v55, %v433_v56 }
 0x295   : > { %vm435_vm5 = vcmp.ge.f32.partialorder %v416_v43, %v434_v58  ;;  %vm436_vm6 = vcmp.ge.f32.partialorder %v419_v45, %v434_v58 }
 0x296   : > { %v437_v59 = vsel %vm435_vm5, %v1287_v54, 16  ;;  %v438_v60 = vsel %vm436_vm6, %v1290_v57, 16 }
 0x297   : > { %v439_v61 = vsel %vm314_vm1, %v437_v59, 2147483647  ;;  %v440_v62 = vsel %vm314_vm1, %v438_v60, 2147483647 }
 0x298   : > { %vm441_vm7 = vcmp.lt.s32.totalorder %v439_v61, %v440_v62 }
 0x299   : > { %v442_v63 = vsel %vm441_vm7, %v439_v61, %v440_v62 }
 0x29a   : > { %v443_v0 = vrot.slane %v442_v63, 4 }
 0x29c   : > { %vm444_vm8 = vcmp.lt.s32.totalorder %v442_v63, %v443_v0 }
 0x29d   : > { %v445_v1 = vsel %vm444_vm8, %v442_v63, %v443_v0 }
 0x29e   : > { %v446_v2 = vrot.slane %v445_v1, 2 }
 0x2a0   : > { %vm447_vm9 = vcmp.lt.s32.totalorder %v445_v1, %v446_v2 }
 0x2a1   : > { %v448_v3 = vsel %vm447_vm9, %v445_v1, %v446_v2 }
 0x2a2   : > { %v449_v4 = vrot.slane %v448_v3, 1 }
 0x2a4   : > { %vm450_vm11 = vcmp.lt.s32.totalorder %v448_v3, %v449_v4 }
 0x2a5   : > { %v451_v5 = vsel %vm450_vm11, %v448_v3, %v449_v4 }
 0x2a6   : > { %453 = vst.msk [vmem:[%s1297_s21] sm:$0x1] %vm452_vm10, %v451_v5  ;;  %vm454_vm12 = vcmp.eq.s32.totalorder %v1287_v54, %v451_v5  ;;  %vm455_vm13 = vcmp.eq.s32.totalorder %v1290_v57, %v451_v5 }
 0x2a7   : > { %v456_v6 = vsel %vm454_vm12, -inf, %v416_v43  ;;  %v457_v7 = vsel %vm455_vm13, -inf, %v419_v45 }
 0x2a8   : > { %v458_v8 = vsel %vm314_vm1, %v456_v6, -inf  ;;  %v459_v9 = vsel %vm314_vm1, %v457_v7, -inf }
 0x2a9   : > { %v460_v10 = vmax.f32 %v458_v8, %v459_v9 }
 0x2ab   : > { %v461_v11 = vrot.slane %v460_v10, 4 }
 0x2ad   : > { %v462_v12 = vmax.f32 %v460_v10, %v461_v11 }
 0x2af   : > { %v463_v13 = vrot.slane %v462_v12, 2 }
 0x2b1   : > { %v464_v14 = vmax.f32 %v462_v12, %v463_v13 }
 0x2b3   : > { %v465_v15 = vrot.slane %v464_v14, 1 }
 0x2b5   : > { %v466_v16 = vmax.f32 %v464_v14, %v465_v15 }
 0x2b7   : > { %vm467_vm14 = vcmp.ge.f32.partialorder %v456_v6, %v466_v16  ;;  %vm468_vm15 = vcmp.ge.f32.partialorder %v457_v7, %v466_v16 }
 0x2b8   : > { %v469_v17 = vsel %vm467_vm14, %v1287_v54, 16  ;;  %v470_v18 = vsel %vm468_vm15, %v1290_v57, 16 }
 0x2b9   : > { %v471_v19 = vsel %vm314_vm1, %v469_v17, 2147483647  ;;  %v472_v20 = vsel %vm314_vm1, %v470_v18, 2147483647 }
 0x2ba   : > { %vm473_vm0 = vcmp.lt.s32.totalorder %v471_v19, %v472_v20 }
 0x2bb   : > { %v474_v21 = vsel %vm473_vm0, %v471_v19, %v472_v20 }
 0x2bc   : > { %v475_v22 = vrot.slane %v474_v21, 4 }
 0x2be   : > { %vm476_vm2 = vcmp.lt.s32.totalorder %v474_v21, %v475_v22 }
 0x2bf   : > { %v477_v23 = vsel %vm476_vm2, %v474_v21, %v475_v22 }
 0x2c0   : > { %v478_v24 = vrot.slane %v477_v23, 2 }
 0x2c2   : > { %vm479_vm3 = vcmp.lt.s32.totalorder %v477_v23, %v478_v24 }
 0x2c3   : > { %v480_v25 = vsel %vm479_vm3, %v477_v23, %v478_v24 }
 0x2c4   : > { %v481_v26 = vrot.slane %v480_v25, 1 }
 0x2c6   : > { %vm482_vm4 = vcmp.lt.s32.totalorder %v480_v25, %v481_v26 }
 0x2c7   : > { %v483_v27 = vsel %vm482_vm4, %v480_v25, %v481_v26 }
 0x2c8   : > { %484 = vst.msk [vmem:[%s1297_s21 + $0x1] sm:$0x1] %vm452_vm10, %v483_v27  ;;  %vm485_vm5 = vcmp.eq.s32.totalorder %v1287_v54, %v483_v27  ;;  %vm486_vm6 = vcmp.eq.s32.totalorder %v1290_v57, %v483_v27 }
 0x2c9   : > { %v487_v28 = vsel %vm485_vm5, -inf, %v456_v6  ;;  %v488_v29 = vsel %vm486_vm6, -inf, %v457_v7 }
 0x2ca   : > { %v489_v30 = vsel %vm314_vm1, %v487_v28, -inf  ;;  %v490_v31 = vsel %vm314_vm1, %v488_v29, -inf }
 0x2cb   : > { %v491_v32 = vmax.f32 %v489_v30, %v490_v31 }
 0x2cd   : > { %v492_v33 = vrot.slane %v491_v32, 4 }
 0x2cf   : > { %v493_v34 = vmax.f32 %v491_v32, %v492_v33 }
 0x2d1   : > { %v494_v35 = vrot.slane %v493_v34, 2 }
 0x2d3   : > { %v495_v36 = vmax.f32 %v493_v34, %v494_v35 }
 0x2d5   : > { %v496_v37 = vrot.slane %v495_v36, 1 }
 0x2d7   : > { %v497_v38 = vmax.f32 %v495_v36, %v496_v37 }
 0x2d9   : > { %vm498_vm7 = vcmp.ge.f32.partialorder %v487_v28, %v497_v38  ;;  %vm499_vm8 = vcmp.ge.f32.partialorder %v488_v29, %v497_v38 }
 0x2da   : > { %v500_v39 = vsel %vm498_vm7, %v1287_v54, 16  ;;  %v501_v40 = vsel %vm499_vm8, %v1290_v57, 16 }
 0x2db   : > { %v502_v41 = vsel %vm314_vm1, %v500_v39, 2147483647  ;;  %v503_v42 = vsel %vm314_vm1, %v501_v40, 2147483647 }
 0x2dc   : > { %vm504_vm9 = vcmp.lt.s32.totalorder %v502_v41, %v503_v42 }
 0x2dd   : > { %v505_v43 = vsel %vm504_vm9, %v502_v41, %v503_v42 }
 0x2de   : > { %v506_v44 = vrot.slane %v505_v43, 4 }
 0x2e0   : > { %vm507_vm11 = vcmp.lt.s32.totalorder %v505_v43, %v506_v44 }
 0x2e1   : > { %v508_v45 = vsel %vm507_vm11, %v505_v43, %v506_v44 }
 0x2e2   : > { %v509_v46 = vrot.slane %v508_v45, 2 }
 0x2e4   : > { %vm510_vm12 = vcmp.lt.s32.totalorder %v508_v45, %v509_v46 }
 0x2e5   : > { %v511_v47 = vsel %vm510_vm12, %v508_v45, %v509_v46 }
 0x2e6   : > { %v512_v48 = vrot.slane %v511_v47, 1 }
 0x2e8   : > { %vm513_vm13 = vcmp.lt.s32.totalorder %v511_v47, %v512_v48 }
 0x2e9   : > { %v514_v49 = vsel %vm513_vm13, %v511_v47, %v512_v48 }
 0x2ea   : > { %515 = vst.msk [vmem:[%s1297_s21 + $0x2] sm:$0x1] %vm452_vm10, %v514_v49  ;;  %vm516_vm14 = vcmp.eq.s32.totalorder %v1287_v54, %v514_v49  ;;  %vm517_vm15 = vcmp.eq.s32.totalorder %v1290_v57, %v514_v49 }
 0x2eb   : > { %v518_v50 = vsel %vm516_vm14, -inf, %v487_v28  ;;  %v519_v51 = vsel %vm517_vm15, -inf, %v488_v29 }
 0x2ec   : > { %v520_v52 = vsel %vm314_vm1, %v518_v50, -inf  ;;  %v521_v53 = vsel %vm314_vm1, %v519_v51, -inf }
 0x2ed   : > { %v522_v55 = vmax.f32 %v520_v52, %v521_v53 }
 0x2ef   : > { %v523_v56 = vrot.slane %v522_v55, 4 }
 0x2f1   : > { %v524_v58 = vmax.f32 %v522_v55, %v523_v56 }
 0x2f3   : > { %v525_v59 = vrot.slane %v524_v58, 2 }
 0x2f5   : > { %v526_v60 = vmax.f32 %v524_v58, %v525_v59 }
 0x2f7   : > { %v527_v61 = vrot.slane %v526_v60, 1 }
 0x2f9   : > { %v528_v62 = vmax.f32 %v526_v60, %v527_v61 }
 0x2fb   : > { %vm529_vm0 = vcmp.ge.f32.partialorder %v518_v50, %v528_v62  ;;  %vm530_vm2 = vcmp.ge.f32.partialorder %v519_v51, %v528_v62 }
 0x2fc   : > { %v531_v63 = vsel %vm529_vm0, %v1287_v54, 16  ;;  %v532_v0 = vsel %vm530_vm2, %v1290_v57, 16 }
 0x2fd   : > { %v533_v1 = vsel %vm314_vm1, %v531_v63, 2147483647  ;;  %v534_v2 = vsel %vm314_vm1, %v532_v0, 2147483647 }
 0x2fe   : > { %vm535_vm3 = vcmp.lt.s32.totalorder %v533_v1, %v534_v2 }
 0x2ff   : > { %v536_v3 = vsel %vm535_vm3, %v533_v1, %v534_v2 }
 0x300   : > { %v537_v4 = vrot.slane %v536_v3, 4 }
 0x302   : > { %vm538_vm4 = vcmp.lt.s32.totalorder %v536_v3, %v537_v4 }
 0x303   : > { %v539_v5 = vsel %vm538_vm4, %v536_v3, %v537_v4 }
 0x304   : > { %v540_v6 = vrot.slane %v539_v5, 2 }
 0x306   : > { %vm541_vm5 = vcmp.lt.s32.totalorder %v539_v5, %v540_v6 }
 0x307   : > { %v542_v7 = vsel %vm541_vm5, %v539_v5, %v540_v6 }
 0x308   : > { %v543_v54 = vrot.slane %v542_v7, 1 }
 0x30a   : > { %vm544_vm6 = vcmp.lt.s32.totalorder %v542_v7, %v543_v54 }
 0x30b   : > { %v545_v57 = vsel %vm544_vm6, %v542_v7, %v543_v54 }
 0x30c   : > { %546 = vst.msk [vmem:[%s1297_s21 + $0x3] sm:$0x1] %vm452_vm10, %v545_v57 }
 0x30d   : > { %939 = shalt.err (!%p936_p6)
}
 0x30e   : > { %s940_s8 = scalar_lea.hbm %s1334_s22, 64  ;;  %s944_s11 = scalar_lea.hbm %s1389_s4, 128 }
 0x30f   : > { %p941_p1 = scmp.ne.s32.totalorder %s1334_s22, %s940_s8  ;;  %p945_p3 = scmp.lt.u32.totalorder %s1334_s22, %s1389_s4 }
 0x310   : > { %p946_p12 = scmp.lt.u32.totalorder %s944_s11, %s940_s8  ;;  %p948_p5 = scmp.lt.u32.totalorder %s940_s8, %s1334_s22 }
 0x311   : > { %p942_p8 = pnand %p941_p1, %p1413_p10 }
 0x312   : > { %p947_p0 = por %p946_p12, %p945_p3 }
 0x313   : > { %p943_p11 = pneg %p942_p8 }
 0x314   : > { %p949_p13 = por %p948_p5, %p947_p0 }
 0x316   : > { %p950_p9 = pnand %p949_p13, %p943_p11 }
 0x318   : > { %953 = shalt.err (!%p950_p9)
}
 0x319   : > { %725 = dma.vmem_to_hbm [thread:$0]  (%p1413_p10), %s1336_s10, 64, %s1334_s22, %s548_s9  }
 0x31a PF: > { %s574_s25 = sand.u32 1, %s1000_s15   ;;  %p1414_p7 = scmp.ne.s32.totalorder %s1398_s24, 0 }
 0x31b   : > { %p1415_p2 = scmp.ge.s32.totalorder %s1020_s20, 2  ;;  %s575_s27 = scalar_lea.sflag [#allocation5], %s574_s25 }
 0x31d   : > { %p742_p4 = pnand %p1415_p2, %p1414_p7 }
 0x31f   : > { %995 = dma.done.wait (!%p742_p4), %s575_s27, 64  }
 0x320   : > { %997 = vsyncadd (!%p742_p4), %s575_s27, 4294967232  ;;  %s24_s20 = sadd.s32 1, %s1020_s20   ;;  %s1416_s30 = sld [smem:[#allocation17_spill]] }
 0x321   : > { %p21_p6 = scmp.ge.s32.totalorder %s24_s20, 4   ;;  %s1417_s15 = smov %s1004_s16 }
 0x322   : > { %s1418_s16 = smov %s1008_s17  ;;  %s1419_s17 = smov %s1188_s26 }
 0x323   : > { %s1420_s18 = smov %s1016_s19  ;;  %23 = sbr.rel (!%p21_p6) target bundleno = 12 (0xc), region = 106 }
 0x326   : > { %s1421_s19 = smov %s1416_s30 }
 0x32a   :  { %580 = vsyncpa [#allocation4], 1 }
 0x32b   :  { %582 = vsyncpa [#allocation4 + $0x1], 1 }
 0x32c   :  { %583 = vsyncpa [#allocation7], 1 }
 0x32d   :  { %585 = vsyncpa [#allocation7 + $0x1], 1 }
 0x32e   :  { %586 = vsyncpa [#allocation10], 1 }
 0x32f   :  { %587 = vsyncpa [#allocation5], 1 }
 0x330   :  { %589 = vsyncpa [#allocation5 + $0x1], 1 }

// kernel: grapher_forward.8
= control target key start
LH: loop header
LB: loop body
LE: loop exit
PB: predicated region body
PF: predicated region fallthrough
CT: control target
= control target key end

     0   :  { %10 = vsyncpa [#allocation3], 0  ;;  %s1142_s0 = inlined_call_operand.hbm [shape: bf16[2,16,16], index: 0, kind: input, shape index: {}]   ;;  %s1143_s1 = inlined_call_operand.hbm [shape: bf16[8,16], index: 1, kind: input, shape index: {}]   ;;  %s1144_s2 = inlined_call_operand.hbm [shape: bf16[2,8,16], index: 2, kind: output, shape index: {0}]   ;;  %s1145_s3 = inlined_call_operand.hbm [shape: f32[8,1], index: 3, kind: output, shape index: {1}]   ;;  %s1146_s4 = inlined_call_operand.hbm [shape: f32[8,1], index: 4, kind: output, shape index: {2}]  }
   0x1   :  { %12 = vsyncpa [#allocation3 + $0x1], 0 }
   0x2   :  { %13 = vsyncpa [#allocation6], 0 }
   0x3   :  { %14 = vsyncpa [#allocation4], 0 }
   0x4   :  { %16 = vsyncpa [#allocation4 + $0x1], 0 }
   0x5   :  { %17 = vsyncpa [#allocation9], 0  ;;  %s875_s15 = smov 0   ;;  %s877_s16 = smov 0  }
   0x6   :  { %s879_s17 = smov 0   ;;  %s881_s18 = smov 0  }
   0x7   :  { %s883_s19 = smov 0   ;;  %s885_s20 = smov 0  }
   0x8 LB: > { %s512_s21 = sadd.s32 4294967295, %s838_s20   ;;  %s513_s22 = sadd.s32 4294967294, %s838_s20   ;;  %s838_s20 = sphi %s885_s20, %s23_s20   ;;  %s834_s19 = sphi %s883_s19, %s1179_s19   ;;  %s830_s18 = sphi %s881_s18, %s1178_s18   ;;  %s826_s17 = sphi %s879_s17, %s1177_s17   ;;  %s822_s16 = sphi %s877_s16, %s1176_s16   ;;  %s818_s15 = sphi %s875_s15, %s1175_s15  }
   0x9   : > { %p58_p0 = scmp.ne.s32.totalorder %s826_s17, %s822_s16  ;;  %p59_p1 = scmp.eq.s32.totalorder %s838_s20, 0 }
   0xa   : > { %p64_p2 = scmp.ne.s32.totalorder %s822_s16, %s818_s15  ;;  %p913_p3 = scmp.eq.s32.totalorder %s512_s21, 0 }
   0xb   : > { %p917_p4 = scmp.eq.s32.totalorder %s512_s21, 1  ;;  %p921_p5 = por %p59_p1, %p58_p0 }
   0xc   : > { %s1155_s24 = scalar_select %p913_p3, 1, 0 }
   0xd   : > { %s1156_s25 = scalar_select %p917_p4, 1, 0 }
   0xe   : > { %p124_p6 = scmp.eq.s32.totalorder %s513_s22, 1  ;;  %p927_p7 = por %p913_p3, %p64_p2 }
   0xf   : > { %p933_p8 = por %p917_p4, %p58_p0  ;;  %p514_p10 = scmp.ge.s32.totalorder %s838_s20, 1 }
  0x10   : > { %s1158_s27 = scalar_select %p927_p7, 1, 0 }
  0x11   : > { %s1159_s28 = scalar_select %p933_p8, 1, 0 }
  0x12   : > { %p937_p9 = por %p124_p6, %p64_p2  ;;  %p183_p11 = scmp.lt.s32.totalorder %s838_s20, 3 }
  0x13   : > { %s840_s5 = smov [#allocation5]   ;;  %p574_p1 = scmp.lt.s32.totalorder %s838_s20, 2 }
  0x14   : > { %s1160_s29 = scalar_select %p937_p9, 1, 0 }
  0x15   : > { %p944_p13 = pnand %p514_p10, %p183_p11  ;;  %s198_s6 = sshll.u32 %s840_s5, 4  ;;  %s199_s6 = int_to_ptr.vmem [resolvable:$true] %s198_s6 }
  0x16   : > { %p953_p4 = pnand %p574_p1, %p921_p5  ;;  %s38_s9 = sadd.s32 1, %s834_s19 }
  0x17   : > { %s1161_s30 = scalar_select %p944_p13, 1, 0 }
  0x18   : > { %p561_p0 = pneg %p944_p13  ;;  %p964_p6 = scmp.ge.s32.totalorder %s38_s9, 2 }
  0x19   : > { %s1162_s7 = scalar_select %p953_p4, 1, 0 }
  0x1a   : > { %p959_p2 = pnand %p561_p0, %p913_p3  ;;  %s209_s11 = sand.u32 1, %s826_s17  }
  0x1b   : > { %s1164_s10 = scalar_select %p964_p6, 1, 0 }
  0x1c   : > { %s638_s14 = scalar_lea.hbm %s1143_s1, 64  ;;  %p640_p10 = pneg %p959_p2 }
  0x1d   : > { %p639_p5 = scmp.ne.s32.totalorder %s1143_s1, %s638_s14  ;;  %p645_p0 = scmp.lt.u32.totalorder %s638_s14, %s1143_s1 }
  0x1f   : > { %p641_p11 = pnand %p640_p10, %p639_p5 }
  0x21   : > { %p642_p1 = pneg %p641_p11 }
  0x23   : > { %p647_p12 = pnand %p645_p0, %p642_p1 }
  0x25   : > { %650 = shalt.err (!%p647_p12)
}
  0x26   : > { %s651_s23 = scalar_lea.vmem %s199_s6, 64  ;;  %p659_p7 = scmp.lt.s32.totalorder %s199_s6, %s199_s6 }
  0x27   : > { %p652_p9 = scmp.ne.s32.totalorder %s199_s6, %s651_s23  ;;  %p660_p13 = scmp.lt.s32.totalorder %s651_s23, %s651_s23 }
  0x29   : > { %p654_p8 = pnand %p652_p9, %p640_p10  ;;  %p661_p4 = por %p660_p13, %p659_p7 }
  0x2b   : > { %p655_p3 = pneg %p654_p8 }
  0x2d   : > { %p662_p6 = pnand %p661_p4, %p655_p3 }
  0x2f   : > { %665 = shalt.err (!%p662_p6)
}
  0x30   : > { %564 = dma.hbm_to_vmem [thread:$0]  (!%p959_p2), %s1143_s1, 64, %s199_s6, [#allocation6]  }
  0x31   : > { %p1165_p9 = scmp.ne.s32.totalorder %s1164_s10, 0  ;;  %s517_s23 = sshll.u32 %s209_s11, 3 }
  0x32   : > { %s535_s21 = sshll.u32 %s834_s19, 7  ;;  %s213_s5 = scalar_lea.vmem [#allocation2], %s517_s23 }
  0x33   : > { %s1181_s9 = smov (%p1165_p9, %s38_s9), 0  ;;  %s995_s26 = scalar_lea.hbm %s1142_s0, %s535_s21 }
  0x34   : > { %s46_s14 = ssub.s32 %s834_s19, %s1181_s9  ;;  %s221_s12 = sshll.u32 %s213_s5, 4  ;;  %s1002_s12 = int_to_ptr.vmem [resolvable:$true] %s221_s12 }
  0x35   : > { %p49_p3 = scmp.eq.s32.totalorder %s46_s14, 0  ;;  %s1166_s6 = sadd.s32 1, %s826_s17 }
  0x36   : > { %s1004_s13 = scalar_lea.sflag [#allocation3], %s209_s11  ;;  %s666_s14 = scalar_lea.hbm %s995_s26, 128 }
  0x37   : > { %s1000_s10 = scalar_select %p49_p3, %s826_s17, %s1166_s6  }
  0x38   : > { %p667_p4 = scmp.ne.s32.totalorder %s995_s26, %s666_s14  ;;  %p1167_p7 = scmp.ne.s32.totalorder %s1162_s7, 0 }
  0x39   : > { %s671_s23 = scalar_lea.hbm %s1142_s0, 256  ;;  %p672_p2 = scmp.lt.u32.totalorder %s995_s26, %s1142_s0 }
  0x3a   : > { %p668_p8 = pneg %p1167_p7  ;;  %p673_p6 = scmp.lt.u32.totalorder %s671_s23, %s666_s14 }
  0x3b   : > { %p675_p10 = scmp.lt.u32.totalorder %s666_s14, %s995_s26 }
  0x3c   : > { %p669_p12 = pnand %p668_p8, %p667_p4  ;;  %p674_p5 = por %p673_p6, %p672_p2 }
  0x3e   : > { %p670_p13 = pneg %p669_p12  ;;  %p676_p11 = por %p675_p10, %p674_p5 }
  0x40   : > { %p677_p1 = pnand %p676_p11, %p670_p13 }
  0x42   : > { %680 = shalt.err (!%p677_p1)
}
  0x43   : > { %s681_s11 = scalar_lea.vmem %s1002_s12, 128  ;;  %s841_s6 = smov [#allocation2]  }
  0x44   : > { %p682_p0 = scmp.ne.s32.totalorder %s1002_s12, %s681_s11  ;;  %s686_s21 = sshll.u32 %s841_s6, 4  ;;  %s687_s21 = int_to_ptr.vmem [resolvable:$false] %s686_s21 }
  0x45   : > { %s688_s8 = scalar_lea.vmem %s687_s21, 256  ;;  %p689_p4 = scmp.lt.s32.totalorder %s1002_s12, %s687_s21 }
  0x46   : > { %p684_p9 = pnand %p682_p0, %p668_p8  ;;  %p690_p12 = scmp.lt.s32.totalorder %s688_s8, %s681_s11 }
  0x48   : > { %p685_p3 = pneg %p684_p9  ;;  %p691_p2 = por %p690_p12, %p689_p4 }
  0x4a   : > { %p692_p6 = pnand %p691_p2, %p685_p3 }
  0x4c   : > { %695 = shalt.err (!%p692_p6)
}
  0x4d   : > { %s842_s14 = smov 64   ;;  %s843_s23 = smov 4  }
  0x4e   : > { %568 = dma.hbm_to_vmem [thread:$0]  (!%p1167_p7), %s995_s26, 128, %s1002_s12, %s1004_s13, %s842_s14, %s842_s14, %s843_s23  }
  0x4f   : > { %p1168_p8 = scmp.ne.s32.totalorder %s1161_s30, 0 }
  0x50   : > { %s1035_s22 = sand.u32 (!%p1168_p8), 1, %s822_s16   ;;  %p1169_p13 = scmp.ne.s32.totalorder (!%p1168_p8), %s1158_s27, 0 }
  0x51   : > { %233 = sbr.rel (%p1168_p8) target bundleno = 500 (0x1f4), region = 28  ;;  %s521_s5 = sshll.u32 (!%p1168_p8), %s1035_s22, 3 }
  0x52   : > { %s236_s11 = scalar_lea.sflag (!%p1168_p8), [#allocation3], %s1035_s22  ;;  %s239_s6 = scalar_lea.vmem (!%p1168_p8), [#allocation2], %s521_s5 }
  0x58   : > { %801 = dma.done.wait (%p1169_p13), %s236_s11, 128  }
  0x59   : > { %803 = vsyncadd (%p1169_p13), %s236_s11, 4294967168  ;;  %p1170_p5 = scmp.ne.s32.totalorder %s1155_s24, 0 }
  0x5b   : > { %805 = dma.done.wait (%p1170_p5), [#allocation6], 64  }
  0x5c   : > { %807 = vsyncadd (%p1170_p5), [#allocation6], 4294967232  ;;  %s523_s30 = sshll.u32 %s1035_s22, 2  ;;  %p269_p7 = scmp.eq.s32.totalorder %s830_s18, 0 }
  0x5d   : > { %s1049_s7 = scalar_lea.vmem [#allocation7], %s523_s30  ;;  %vm275_vm0 = vcmask (%p269_p7), 7168   ;;  %v844_v0 = vmov (%p269_p7), 0.0  }
  0x5e   : > { %274 = sbr.rel (!%p269_p7) target bundleno = 101 (0x65), region = 40  ;;  %276 = vst.msk [vmem:[#allocation8] sm:$0xff] (%p269_p7), %vm275_vm0, %v844_v0  ;;  %277 = vst.msk [vmem:[#allocation10] sm:$0xff] (%p269_p7), %vm275_vm0, %v844_v0 }
  0x65 PF: > { %v637_v1 = vld [vmem:[%s239_s6] sm:$0xff]   ;;  %v845_v2 = vmov 0.0   ;;  %vm846_vm1 = vmmov 0   ;;  %v280_v3 = vld [vmem:[#allocation5] sm:$0xf]  ;;  %vm287_vm2 = vcmask 130048  }
  0x66   : > { %539 = vmatprep.subr.bf16.mxu0 %v845_v2  ;;  %541 = vmatprep.mubr.msk.bf16.mxu0 %vm846_vm1, %v845_v2  ;;  %vm332_vm3 = vcmask 125952   ;;  %s528_s24 = sshll.u32 %s830_s18, 6  ;;  %s364_s13 = sshll.u32 %s1049_s7, 4  ;;  %s365_s13 = int_to_ptr.vmem [resolvable:$true] %s364_s13 }
  0x67   : > { %540 = vmatpush3.bf16.msra.mxu0 %v637_v1  ;;  %s1056_s12 = scalar_lea.hbm %s1144_s2, %s528_s24  ;;  %s349_s21 = scalar_lea.sflag [#allocation4], %s1035_s22 }
  0x68   : > { %s696_s8 = scalar_lea.vmem %s365_s13, 64  ;;  %p1171_p11 = scmp.ne.s32.totalorder %s1159_s28, 0 }
  0x69   : > { %p697_p10 = scmp.ne.s32.totalorder %s365_s13, %s696_s8  ;;  %s847_s14 = smov [#allocation7]  }
  0x6a   : > { %542 = vmatmul.mubr.msk.bf16.vlgmr.msra.gmra.mrb[0].mxu0 %vm287_vm2, %v280_v3  ;;  %s700_s23 = sshll.u32 %s847_s14, 4  ;;  %s701_s23 = int_to_ptr.vmem [resolvable:$false] %s700_s23 }
  0x6b   : > { %p698_p1 = pnand %p697_p10, %p1171_p11  ;;  %s702_s5 = scalar_lea.vmem %s701_s23, 128 }
  0x6c   : > { %p703_p9 = scmp.lt.s32.totalorder %s365_s13, %s701_s23  ;;  %p704_p3 = scmp.lt.s32.totalorder %s702_s5, %s696_s8 }
  0x6d   : > { %p699_p0 = pneg %p698_p1 }
  0x6e   : > { %p705_p4 = por %p704_p3, %p703_p9 }
  0x70   : > { %p706_p12 = pnand %p705_p4, %p699_p0 }
 0x13d   : > { %v325_v4 = vpop.f32.mrb[0].mxu0 }
 0x13e   : > { %v331_v5 = vpack.c.bf16 %v325_v4, %v325_v4  ;;  %v543_v6 = vpop.f32.mrb[1].mxu0  ;;  %v335_v7 = vsel %vm287_vm2, %v325_v4, 0.0  ;;  %v342_v8 = vmul.f32 %v325_v4, %v325_v4 }
 0x13f   : > { %336 = vadd.xlane.f32.xlu0 %v335_v7  ;;  %v328_v9 = vpop.f32.mrb[2].mxu0 }
 0x140   : > { %v544_v10 = vpop.f32.mrb[3].mxu0  ;;  %333 = vst.msk [vmem:[%s1049_s7] sm:$0xf] %vm332_vm3, %v331_v5  ;;  %v343_v11 = vsel %vm287_vm2, %v342_v8, 0.0 }
 0x143   : > { %344 = vadd.xlane.f32.xlu0 %v343_v11 }
 0x144   : > { %709 = shalt.err (!%p706_p12)
}
 0x145   : > { %s710_s18 = scalar_lea.hbm %s1056_s12, 64  ;;  %s714_s6 = scalar_lea.hbm %s1144_s2, 128 }
 0x146   : > { %p711_p2 = scmp.ne.s32.totalorder %s1056_s12, %s710_s18  ;;  %p715_p13 = scmp.lt.u32.totalorder %s1056_s12, %s1144_s2 }
 0x147   : > { %p716_p5 = scmp.lt.u32.totalorder %s714_s6, %s710_s18  ;;  %p718_p10 = scmp.lt.u32.totalorder %s710_s18, %s1056_s12 }
 0x148   : > { %p712_p6 = pnand %p711_p2, %p1171_p11 }
 0x149   : > { %p717_p7 = por %p716_p5, %p715_p13 }
 0x14a   : > { %p713_p8 = pneg %p712_p6 }
 0x14b   : > { %p719_p1 = por %p718_p10, %p717_p7 }
 0x14d   : > { %p720_p0 = pnand %p719_p1, %p713_p8 }
 0x14f   : > { %723 = shalt.err (!%p720_p0)
}
 0x150   : > { %551 = dma.vmem_to_hbm [thread:$0]  (%p1171_p11), %s365_s13, 64, %s1056_s12, %s349_s21   ;;  %v334_v12 = vld [vmem:[#allocation8] sm:$0xff]  ;;  %vm339_vm4 = vcmask 7168   ;;  %v341_v15 = vld [vmem:[#allocation10] sm:$0xff] }
 0x151   : > { %s848_s24 = smov [#allocation8]   ;;  %s849_s26 = smov [#allocation10]  }
 0x152   : > { %s377_s27 = sshll.u32 %s848_s24, 4  ;;  %s390_s8 = sshll.u32 %s849_s26, 4  ;;  %s378_s27 = int_to_ptr.vmem [resolvable:$true] %s377_s27  ;;  %s391_s8 = int_to_ptr.vmem [resolvable:$true] %s390_s8 }
 0x153   : > { %s724_s14 = scalar_lea.vmem %s378_s27, 128  ;;  %p1172_p3 = scmp.ne.s32.totalorder %s1156_s25, 0 }
 0x154   : > { %p725_p9 = scmp.ne.s32.totalorder %s378_s27, %s724_s14  ;;  %p731_p2 = scmp.lt.s32.totalorder %s378_s27, %s378_s27 }
 0x155   : > { %p732_p11 = scmp.lt.s32.totalorder %s724_s14, %s724_s14 }
 0x156   : > { %p726_p4 = pnand %p725_p9, %p1172_p3 }
 0x157   : > { %p733_p6 = por %p732_p11, %p731_p2 }
 0x158   : > { %p727_p12 = pneg %p726_p4 }
 0x15a   : > { %p734_p8 = pnand %p733_p6, %p727_p12 }
 0x1cc   : > { %v337_v13 = vpop.xlane.xlu0 %336 }
 0x1cd   : > { %v338_v14 = vadd.f32 %v337_v13, %v334_v12 }
 0x1cf   : > { %340 = vst.msk [vmem:[#allocation8] sm:$0xff] %vm339_vm4, %v338_v14 }
 0x1d0   : > { %v345_v16 = vpop.xlane.xlu0 %344 }
 0x1d1   : > { %737 = shalt.err (!%p734_p8)
}
 0x1d2   : > { %s738_s13 = scalar_lea.hbm %s1145_s3, 128 }
 0x1d3   : > { %p739_p13 = scmp.ne.s32.totalorder %s1145_s3, %s738_s13  ;;  %p744_p10 = scmp.lt.u32.totalorder %s738_s13, %s1145_s3 }
 0x1d5   : > { %p740_p5 = pnand %p739_p13, %p1172_p3 }
 0x1d7   : > { %p741_p7 = pneg %p740_p5 }
 0x1d9   : > { %p746_p1 = pnand %p744_p10, %p741_p7 }
 0x1db   : > { %749 = shalt.err (!%p746_p1)
}
 0x1dc   : > { %553 = dma.vmem_to_hbm [thread:$0]  (%p1172_p3), %s378_s27, 128, %s1145_s3, [#allocation9]   ;;  %v346_v17 = vadd.f32 %v345_v16, %v341_v15 }
 0x1dd   : > { %s750_s6 = scalar_lea.vmem %s391_s8, 128  ;;  %p757_p12 = scmp.lt.s32.totalorder %s391_s8, %s391_s8 }
 0x1de   : > { %347 = vst.msk [vmem:[#allocation10] sm:$0xff] %vm339_vm4, %v346_v17  ;;  %p751_p0 = scmp.ne.s32.totalorder %s391_s8, %s750_s6  ;;  %p758_p2 = scmp.lt.s32.totalorder %s750_s6, %s750_s6 }
 0x1e0   : > { %p752_p9 = pnand %p751_p0, %p1172_p3  ;;  %p759_p11 = por %p758_p2, %p757_p12 }
 0x1e2   : > { %p753_p4 = pneg %p752_p9 }
 0x1e4   : > { %p760_p6 = pnand %p759_p11, %p753_p4 }
 0x1e6   : > { %763 = shalt.err (!%p760_p6)
}
 0x1e7   : > { %s764_s24 = scalar_lea.hbm %s1146_s4, 128 }
 0x1e8   : > { %p765_p8 = scmp.ne.s32.totalorder %s1146_s4, %s764_s24  ;;  %p770_p7 = scmp.lt.u32.totalorder %s764_s24, %s1146_s4 }
 0x1ea   : > { %p766_p13 = pnand %p765_p8, %p1172_p3 }
 0x1ec   : > { %p767_p5 = pneg %p766_p13 }
 0x1ee   : > { %p772_p10 = pnand %p770_p7, %p767_p5 }
 0x1f0   : > { %775 = shalt.err (!%p772_p10)
}
 0x1f1   : > { %555 = dma.vmem_to_hbm [thread:$0]  (%p1172_p3), %s391_s8, 128, %s1146_s4, [#allocation9]  }
 0x1f2   : > { %809 = dma.done.wait (%p1172_p3), [#allocation9], 256  }
 0x1f3   : > { %811 = vsyncadd (%p1172_p3), [#allocation9], 4294967040 }
 0x1f4 PF: > { %s410_s21 = sand.u32 1, %s818_s15   ;;  %p1173_p1 = scmp.ne.s32.totalorder %s1160_s29, 0 }
 0x1f5   : > { %p1174_p0 = scmp.ge.s32.totalorder %s838_s20, 2  ;;  %s411_s23 = scalar_lea.sflag [#allocation4], %s410_s21 }
 0x1f7   : > { %p570_p9 = pnand %p1174_p0, %p1173_p1 }
 0x1f9   : > { %813 = dma.done.wait (!%p570_p9), %s411_s23, 64  }
 0x1fa   : > { %815 = vsyncadd (!%p570_p9), %s411_s23, 4294967232  ;;  %s23_s20 = sadd.s32 1, %s838_s20   ;;  %s1175_s15 = smov %s822_s16 }
 0x1fb   : > { %p20_p4 = scmp.ge.s32.totalorder %s23_s20, 4   ;;  %s1176_s16 = smov %s826_s17 }
 0x1fc   : > { %s1177_s17 = smov %s1000_s10  ;;  %s1178_s18 = smov %s834_s19 }
 0x1fd   : > { %s1179_s19 = smov %s1181_s9  ;;  %22 = sbr.rel (!%p20_p4) target bundleno = 8 (0x8), region = 100 }
 0x204   :  { %416 = vsyncpa [#allocation3], 1 }
 0x205   :  { %418 = vsyncpa [#allocation3 + $0x1], 1 }
 0x206   :  { %419 = vsyncpa [#allocation6], 1 }
 0x207   :  { %420 = vsyncpa [#allocation4], 1 }
 0x208   :  { %422 = vsyncpa [#allocation4 + $0x1], 1 }
 0x209   :  { %423 = vsyncpa [#allocation9], 1 }

// kernel: grapher_forward.7
= control target key start
LH: loop header
LB: loop body
LE: loop exit
PB: predicated region body
PF: predicated region fallthrough
CT: control target
= control target key end

     0   :  { %s2095_s0 = inlined_call_operand.hbm [shape: bf16[2,8,16], index: 0, kind: input, shape index: {}, may-alias: {0,1}]   ;;  %s2096_s1 = inlined_call_operand.hbm [shape: bf16[2,8,16], index: 1, kind: input, shape index: {}, may-alias: {0,1}]   ;;  %s2097_s2 = inlined_call_operand.hbm [shape: s32[2,4,16], index: 2, kind: input, shape index: {}]   ;;  %s2098_s3 = inlined_call_operand.hbm [shape: f32[8,1], index: 3, kind: input, shape index: {}]   ;;  %s2099_s4 = inlined_call_operand.hbm [shape: f32[8,1], index: 4, kind: input, shape index: {}]   ;;  %s2100_s5 = inlined_call_operand.hbm [shape: bf16[16,8], index: 5, kind: input, shape index: {}]   ;;  %s2101_s6 = inlined_call_operand.hbm [shape: bf16[16,8], index: 6, kind: input, shape index: {}]   ;;  %s2102_s7 = inlined_call_operand.hbm [shape: f32[16,1], index: 7, kind: input, shape index: {}]   ;;  %s2103_s8 = inlined_call_operand.hbm [shape: bf16[2,16,16], index: 8, kind: output, shape index: {}]  }
   0x1   :  { %2128 = sst [smem:[#allocation30_spill]] %s2096_s1 }
   0x2   :  { %2129 = sst [smem:[#allocation31_spill]] %s2098_s3 }
   0x3   :  { %2130 = sst [smem:[#allocation32_spill]] %s2099_s4 }
   0x4   :  { %2131 = sst [smem:[#allocation33_spill]] %s2100_s5 }
   0x5   :  { %2132 = sst [smem:[#allocation34_spill]] %s2103_s8 }
   0x6   :  { %13 = vsyncpa [#allocation3], 0 }
   0x7   :  { %15 = vsyncpa [#allocation3 + $0x1], 0 }
   0x8   :  { %16 = vsyncpa [#allocation6], 0 }
   0x9   :  { %18 = vsyncpa [#allocation6 + $0x1], 0 }
   0xa   :  { %19 = vsyncpa [#allocation9], 0 }
   0xb   :  { %20 = vsyncpa [#allocation12], 0 }
   0xc   :  { %21 = vsyncpa [#allocation15], 0 }
   0xd   :  { %22 = vsyncpa [#allocation4], 0 }
   0xe   :  { %24 = vsyncpa [#allocation4 + $0x1], 0  ;;  %s1690_s27 = smov 0   ;;  %s1692_s28 = smov 0  }
   0xf   :  { %s1694_s29 = smov 0   ;;  %s1696_s30 = smov 0  }
  0x10   :  { %s1698_s9 = smov 0   ;;  %s1700_s10 = smov 0  }
  0x11 LB: > { %2133 = sst [smem:[#allocation23_spill]] %s1604_s27  ;;  %s1721_s11 = sadd.s32 4294967295, %s1624_s10   ;;  %s1624_s10 = sphi %s1700_s10, %s30_s10   ;;  %s1620_s9 = sphi %s1698_s9, %s2180_s9   ;;  %s1616_s30 = sphi %s1696_s30, %s2179_s30   ;;  %s1612_s29 = sphi %s1694_s29, %s2183_s29   ;;  %s1608_s28 = sphi %s1692_s28, %s2182_s28   ;;  %s1604_s27 = sphi %s1690_s27, %s2181_s27  }
  0x12   : > { %2134 = sst [smem:[#allocation24_spill]] %s1620_s9  ;;  %p1054_p0 = scmp.ge.s32.totalorder %s1624_s10, 1 }
  0x13   : > { %2135 = sst [smem:[#allocation25_spill]] %s1624_s10  ;;  %p2104_p1 = scmp.eq.s32.totalorder %s1721_s11, 0 }
  0x14   : > { %p262_p2 = scmp.lt.s32.totalorder %s1624_s10, 3  ;;  %s1626_s13 = smov [#allocation8]  }
  0x15   : > { %s275_s14 = sshll.u32 %s1626_s13, 4  ;;  %s1627_s15 = smov [#allocation11]   ;;  %s276_s14 = int_to_ptr.vmem [resolvable:$true] %s275_s14 }
  0x16   : > { %p1726_p3 = pnand %p1054_p0, %p262_p2  ;;  %s296_s16 = sshll.u32 %s1627_s15, 4  ;;  %s1739_s16 = int_to_ptr.vmem [resolvable:$true] %s296_s16 }
  0x17   : > { %s2138_s3 = sld [smem:[#allocation31_spill]] }
  0x18   : > { %s2136_s12 = scalar_select %p1726_p3, 1, 0 }
  0x19   : > { %p1187_p5 = pneg %p1726_p3 }
  0x1b   : > { %p1735_p6 = pnand %p1187_p5, %p2104_p1 }
  0x1d   : > { %s2137_s17 = scalar_select %p1735_p6, 1, 0 }
  0x1e   : > { %s1296_s20 = scalar_lea.hbm %s2138_s3, 128  ;;  %p1749_p8 = pneg %p1735_p6 }
  0x1f   : > { %p1297_p7 = scmp.ne.s32.totalorder %s2138_s3, %s1296_s20  ;;  %p1303_p11 = scmp.lt.u32.totalorder %s1296_s20, %s2138_s3 }
  0x20   : > { %s2139_s23 = scalar_select %p1749_p8, 1, 0 }
  0x21   : > { %p1299_p9 = pnand %p1749_p8, %p1297_p7 }
  0x23   : > { %p1300_p10 = pneg %p1299_p9 }
  0x25   : > { %p1305_p12 = pnand %p1303_p11, %p1300_p10 }
  0x27   : > { %1308 = shalt.err (!%p1305_p12)
}
  0x28   : > { %s1309_s26 = scalar_lea.vmem %s276_s14, 128  ;;  %p1317_p5 = scmp.lt.s32.totalorder %s276_s14, %s276_s14 }
  0x29   : > { %p1310_p13 = scmp.ne.s32.totalorder %s276_s14, %s1309_s26  ;;  %p1318_p4 = scmp.lt.s32.totalorder %s1309_s26, %s1309_s26 }
  0x2b   : > { %p1312_p0 = pnand %p1310_p13, %p1749_p8  ;;  %p1319_p1 = por %p1318_p4, %p1317_p5 }
  0x2d   : > { %p1313_p2 = pneg %p1312_p0 }
  0x2f   : > { %p1320_p3 = pnand %p1319_p1, %p1313_p2 }
  0x31   : > { %1323 = shalt.err (!%p1320_p3)
}
  0x32   : > { %1190 = dma.hbm_to_vmem [thread:$0]  (!%p1735_p6), %s2138_s3, 128, %s276_s14, [#allocation9]  }
  0x33   : > { %s2140_s5 = sld [smem:[#allocation33_spill]] }
  0x39   : > { %s1324_s20 = scalar_lea.hbm %s2140_s5, 128 }
  0x3a   : > { %p1325_p7 = scmp.ne.s32.totalorder %s2140_s5, %s1324_s20  ;;  %p1331_p1 = scmp.lt.u32.totalorder %s1324_s20, %s2140_s5 }
  0x3c   : > { %p1327_p9 = pnand %p1325_p7, %p1749_p8 }
  0x3e   : > { %p1328_p4 = pneg %p1327_p9 }
  0x40   : > { %p1333_p3 = pnand %p1331_p1, %p1328_p4 }
  0x42   : > { %1336 = shalt.err (!%p1333_p3)
}
  0x43   : > { %s1337_s14 = scalar_lea.vmem %s1739_s16, 128  ;;  %p1345_p13 = scmp.lt.s32.totalorder %s1739_s16, %s1739_s16 }
  0x44   : > { %p1338_p10 = scmp.ne.s32.totalorder %s1739_s16, %s1337_s14  ;;  %p1346_p0 = scmp.lt.s32.totalorder %s1337_s14, %s1337_s14 }
  0x46   : > { %p1340_p11 = pnand %p1338_p10, %p1749_p8  ;;  %p1347_p2 = por %p1346_p0, %p1345_p13 }
  0x48   : > { %p1341_p12 = pneg %p1340_p11 }
  0x4a   : > { %p1348_p5 = pnand %p1347_p2, %p1341_p12 }
  0x4c   : > { %1351 = shalt.err (!%p1348_p5)
}
  0x4d   : > { %s2106_s26 = smov 64   ;;  %s2107_s13 = smov 4  }
  0x4e   : > { %1196 = dma.hbm_to_vmem [thread:$0]  (!%p1735_p6), %s2140_s5, 128, %s1739_s16, [#allocation12], %s2106_s26, %s2106_s26, %s2107_s13  }
  0x4f   : > { %s1053_s19 = sadd.s32 4294967294, %s1624_s10   ;;  %s42_s20 = sadd.s32 1, %s1620_s9 }
  0x50   : > { %p44_p7 = scmp.ge.s32.totalorder %s42_s20, 2  ;;  %s49_s21 = sadd.s32 1, %s1612_s29 }
  0x51   : > { %p56_p9 = scmp.ne.s32.totalorder %s1612_s29, %s1608_s28  ;;  %p57_p4 = scmp.eq.s32.totalorder %s1624_s10, 0 }
  0x52   : > { %s2185_s20 = smov (%p44_p7, %s42_s20), 0  ;;  %p62_p3 = scmp.ne.s32.totalorder %s1608_s28, %s1604_s27 }
  0x53   : > { %2141 = sst [smem:[#allocation26_spill]] %s2185_s20  ;;  %p1799_p1 = por %p57_p4, %p56_p9 }
  0x54   : > { %s46_s16 = ssub.s32 %s1620_s9, %s2185_s20  ;;  %p249_p10 = scmp.eq.s32.totalorder %s1721_s11, 1 }
  0x55   : > { %p47_p11 = scmp.eq.s32.totalorder %s46_s16, 0  ;;  %p2143_p12 = scmp.eq.s32.totalorder %s1721_s11, 0 }
  0x56   : > { %p1814_p0 = por %p249_p10, %p56_p9  ;;  %p255_p2 = scmp.eq.s32.totalorder %s1053_s19, 1 }
  0x57   : > { %p1810_p13 = por %p2143_p12, %p62_p3  ;;  %p1222_p7 = scmp.lt.s32.totalorder %s1624_s10, 2 }
  0x58   : > { %s2145_s25 = scalar_select %p1814_p0, 1, 0 }
  0x59   : > { %s2144_s24 = scalar_select %p1810_p13, 1, 0 }
  0x5a   : > { %2146 = sst [smem:[#allocation27_spill]] %s2145_s25  ;;  %p1821_p5 = por %p255_p2, %p62_p3 }
  0x5b   : > { %s1819_s14 = scalar_select %p47_p11, %s1612_s29, %s49_s21  }
  0x5c   : > { %s2148_s15 = scalar_select %p1821_p5, 1, 0 }
  0x5d   : > { %2147 = sst [smem:[#allocation28_spill]] %s1819_s14  ;;  %s2109_s18 = sand.u32 1, %s1612_s29  }
  0x5e   : > { %2149 = sst [smem:[#allocation29_spill]] %s2148_s15  ;;  %s1828_s26 = sshll.u32 %s1620_s9, 6 }
  0x5f   : > { %s1832_s16 = sshll.u32 %s2109_s18, 2  ;;  %p1836_p9 = pnand %p1222_p7, %p1799_p1 }
  0x60   : > { %s354_s19 = sand.u32 1, %s1624_s10   ;;  %s2151_s1 = sld [smem:[#allocation30_spill]] }
  0x61   : > { %s2150_s13 = scalar_select %p1836_p9, 1, 0 }
  0x62   : > { %s358_s20 = scalar_lea.vmem [#allocation5], %s1832_s16  ;;  %s1850_s22 = scalar_lea.sflag [#allocation6], %s354_s19 }
  0x63   : > { %s366_s18 = sshll.u32 %s358_s20, 4  ;;  %p1856_p1 = pneg %p1836_p9  ;;  %s1848_s18 = int_to_ptr.vmem [resolvable:$true] %s366_s18 }
  0x65   : > { %s2152_s14 = scalar_select %p1856_p1, 1, 0 }
  0x66   : > { %s1845_s5 = scalar_lea.hbm %s2151_s1, %s1828_s26  ;;  %s1357_s10 = scalar_lea.hbm %s2151_s1, 128 }
  0x67   : > { %s1352_s9 = scalar_lea.hbm %s1845_s5, 64  ;;  %p1358_p11 = scmp.lt.u32.totalorder %s1845_s5, %s2151_s1 }
  0x68   : > { %p1353_p4 = scmp.ne.s32.totalorder %s1845_s5, %s1352_s9  ;;  %p1359_p12 = scmp.lt.u32.totalorder %s1357_s10, %s1352_s9 }
  0x69   : > { %p1361_p7 = scmp.lt.u32.totalorder %s1352_s9, %s1845_s5 }
  0x6a   : > { %p1355_p3 = pnand %p1856_p1, %p1353_p4  ;;  %p1360_p2 = por %p1359_p12, %p1358_p11 }
  0x6c   : > { %p1356_p10 = pneg %p1355_p3  ;;  %p1362_p5 = por %p1361_p7, %p1360_p2 }
  0x6e   : > { %p1363_p0 = pnand %p1362_p5, %p1356_p10 }
  0x70   : > { %1366 = shalt.err (!%p1363_p0)
}
  0x71   : > { %s1367_s19 = scalar_lea.vmem %s1848_s18, 64  ;;  %s1630_s3 = smov [#allocation5]  }
  0x72   : > { %p1368_p4 = scmp.ne.s32.totalorder %s1848_s18, %s1367_s19  ;;  %s1372_s21 = sshll.u32 %s1630_s3, 4  ;;  %s1373_s21 = int_to_ptr.vmem [resolvable:$false] %s1372_s21 }
  0x73   : > { %s1374_s15 = scalar_lea.vmem %s1373_s21, 128  ;;  %p1375_p6 = scmp.lt.s32.totalorder %s1848_s18, %s1373_s21 }
  0x74   : > { %p1370_p3 = pnand %p1368_p4, %p1856_p1  ;;  %p1376_p8 = scmp.lt.s32.totalorder %s1374_s15, %s1367_s19 }
  0x76   : > { %p1371_p13 = pneg %p1370_p3  ;;  %p1377_p11 = por %p1376_p8, %p1375_p6 }
  0x78   : > { %p1378_p12 = pnand %p1377_p11, %p1371_p13 }
  0x7a   : > { %1381 = shalt.err (!%p1378_p12)
}
  0x7b   : > { %1209 = dma.hbm_to_vmem [thread:$0]  (!%p1836_p9), %s1845_s5, 64, %s1848_s18, %s1850_s22  }
  0x7c   : > { %s1631_s9 = smov [#allocation10]   ;;  %s1632_s20 = smov [#allocation13]  }
  0x7d   : > { %s286_s10 = sshll.u32 %s1631_s9, 4  ;;  %s309_s1 = sshll.u32 %s1632_s20, 4  ;;  %s287_s10 = int_to_ptr.vmem [resolvable:$true] %s286_s10  ;;  %s310_s1 = int_to_ptr.vmem [resolvable:$true] %s309_s1 }
  0x7e   : > { %s2153_s4 = sld [smem:[#allocation32_spill]]  ;;  %p2154_p8 = scmp.ne.s32.totalorder %s2139_s23, 0 }
  0x84   : > { %s1382_s21 = scalar_lea.hbm %s2153_s4, 128 }
  0x85   : > { %p1383_p6 = scmp.ne.s32.totalorder %s2153_s4, %s1382_s21  ;;  %p1389_p5 = scmp.lt.u32.totalorder %s1382_s21, %s2153_s4 }
  0x87   : > { %p1385_p13 = pnand %p1383_p6, %p2154_p8 }
  0x89   : > { %p1386_p0 = pneg %p1385_p13 }
  0x8b   : > { %p1391_p10 = pnand %p1389_p5, %p1386_p0 }
  0x8d   : > { %1394 = shalt.err (!%p1391_p10)
}
  0x8e   : > { %s1395_s5 = scalar_lea.vmem %s287_s10, 128  ;;  %p1403_p3 = scmp.lt.s32.totalorder %s287_s10, %s287_s10 }
  0x8f   : > { %p1396_p2 = scmp.ne.s32.totalorder %s287_s10, %s1395_s5  ;;  %p1404_p11 = scmp.lt.s32.totalorder %s1395_s5, %s1395_s5 }
  0x91   : > { %p1398_p7 = pnand %p1396_p2, %p2154_p8  ;;  %p1405_p12 = por %p1404_p11, %p1403_p3 }
  0x93   : > { %p1399_p4 = pneg %p1398_p7 }
  0x95   : > { %p1406_p9 = pnand %p1405_p12, %p1399_p4 }
  0x97   : > { %1409 = shalt.err (!%p1406_p9)
}
  0x98   : > { %p2155_p6 = scmp.ne.s32.totalorder %s2137_s17, 0  ;;  %s1410_s9 = scalar_lea.hbm %s2101_s6, 128 }
  0x99   : > { %p1411_p13 = scmp.ne.s32.totalorder %s2101_s6, %s1410_s9  ;;  %p1417_p9 = scmp.lt.u32.totalorder %s1410_s9, %s2101_s6 }
  0x9a   : > { %1193 = dma.hbm_to_vmem [thread:$0]  (!%p2155_p6), %s2153_s4, 128, %s287_s10, [#allocation9]  }
  0x9b   : > { %p1413_p0 = pnand %p1411_p13, %p2154_p8 }
  0x9d   : > { %p1414_p5 = pneg %p1413_p0 }
  0x9f   : > { %p1419_p10 = pnand %p1417_p9, %p1414_p5 }
  0xa1   : > { %1422 = shalt.err (!%p1419_p10)
}
  0xa2   : > { %s1423_s15 = scalar_lea.vmem %s310_s1, 128  ;;  %p1431_p3 = scmp.lt.s32.totalorder %s310_s1, %s310_s1 }
  0xa3   : > { %p1424_p2 = scmp.ne.s32.totalorder %s310_s1, %s1423_s15  ;;  %p1432_p11 = scmp.lt.s32.totalorder %s1423_s15, %s1423_s15 }
  0xa5   : > { %p1426_p7 = pnand %p1424_p2, %p2154_p8  ;;  %p1433_p12 = por %p1432_p11, %p1431_p3 }
  0xa7   : > { %p1427_p4 = pneg %p1426_p7 }
  0xa9   : > { %p1434_p1 = pnand %p1433_p12, %p1427_p4 }
  0xab   : > { %1437 = shalt.err (!%p1434_p1)
}
  0xac   : > { %s2156_s10 = smov 4   ;;  %s2157_s5 = smov 64  }
  0xad   : > { %1199 = dma.hbm_to_vmem [thread:$0]  (!%p2155_p6), %s2101_s6, 128, %s310_s1, [#allocation12], %s2157_s5, %s2157_s5, %s2156_s10  }
  0xae   : > { %s1633_s8 = smov [#allocation14]   ;;  %s1438_s3 = scalar_lea.hbm %s2102_s7, 256 }
  0xaf   : > { %s322_s25 = sshll.u32 %s1633_s8, 4  ;;  %p1439_p1 = scmp.ne.s32.totalorder %s2102_s7, %s1438_s3  ;;  %s323_s25 = int_to_ptr.vmem [resolvable:$true] %s322_s25 }
  0xb0   : > { %p1445_p5 = scmp.lt.u32.totalorder %s1438_s3, %s2102_s7 }
  0xb1   : > { %p1441_p13 = pnand %p1439_p1, %p2154_p8 }
  0xb3   : > { %p1442_p0 = pneg %p1441_p13 }
  0xb5   : > { %p1447_p9 = pnand %p1445_p5, %p1442_p0 }
  0xb7   : > { %1450 = shalt.err (!%p1447_p9)
}
  0xb8   : > { %s1451_s1 = scalar_lea.vmem %s323_s25, 256  ;;  %p1459_p4 = scmp.lt.s32.totalorder %s323_s25, %s323_s25 }
  0xb9   : > { %p1452_p10 = scmp.ne.s32.totalorder %s323_s25, %s1451_s1  ;;  %p1460_p3 = scmp.lt.s32.totalorder %s1451_s1, %s1451_s1 }
  0xbb   : > { %p1454_p2 = pnand %p1452_p10, %p2154_p8  ;;  %p1461_p11 = por %p1460_p3, %p1459_p4 }
  0xbd   : > { %p1455_p7 = pneg %p1454_p2 }
  0xbf   : > { %p1462_p12 = pnand %p1461_p11, %p1455_p7 }
  0xc1   : > { %1465 = shalt.err (!%p1462_p12)
}
  0xc2   : > { %s1634_s10 = smov 128   ;;  %s1635_s4 = smov 8  }
  0xc3   : > { %1202 = dma.hbm_to_vmem [thread:$0]  (!%p2155_p6), %s2102_s7, 256, %s323_s25, [#allocation15], %s1634_s10, %s1634_s10, %s1635_s4  }
  0xc4   : > { %s1941_s8 = scalar_lea.hbm %s2095_s0, %s1828_s26  ;;  %s340_s9 = scalar_lea.vmem [#allocation2], %s1832_s16 }
  0xc5   : > { %s347_s20 = sshll.u32 %s340_s9, 4  ;;  %s2158_s3 = sand.u32 1, %s1612_s29   ;;  %s348_s20 = int_to_ptr.vmem [resolvable:$true] %s347_s20 }
  0xc6   : > { %s337_s21 = scalar_lea.sflag [#allocation3], %s2158_s3  ;;  %s1466_s19 = scalar_lea.hbm %s1941_s8, 64 }
  0xc7   : > { %p1467_p8 = scmp.ne.s32.totalorder %s1941_s8, %s1466_s19  ;;  %p2159_p1 = scmp.ne.s32.totalorder %s2152_s14, 0 }
  0xc8   : > { %s1471_s15 = scalar_lea.hbm %s2095_s0, 128  ;;  %p1472_p6 = scmp.lt.u32.totalorder %s1941_s8, %s2095_s0 }
  0xc9   : > { %p1469_p13 = pnand %p1467_p8, %p2159_p1  ;;  %p1473_p5 = scmp.lt.u32.totalorder %s1471_s15, %s1466_s19 }
  0xca   : > { %p1475_p10 = scmp.lt.u32.totalorder %s1466_s19, %s1941_s8 }
  0xcb   : > { %p1470_p0 = pneg %p1469_p13  ;;  %p1474_p9 = por %p1473_p5, %p1472_p6 }
  0xcd   : > { %p1476_p2 = por %p1475_p10, %p1474_p9 }
  0xcf   : > { %p1477_p7 = pnand %p1476_p2, %p1470_p0 }
  0xd1   : > { %1480 = shalt.err (!%p1477_p7)
}
  0xd2   : > { %s1481_s4 = scalar_lea.vmem %s348_s20, 64  ;;  %s1636_s5 = smov [#allocation2]  }
  0xd3   : > { %p1482_p4 = scmp.ne.s32.totalorder %s348_s20, %s1481_s4  ;;  %s1486_s27 = sshll.u32 %s1636_s5, 4  ;;  %s1487_s27 = int_to_ptr.vmem [resolvable:$false] %s1486_s27 }
  0xd4   : > { %s1488_s23 = scalar_lea.vmem %s1487_s27, 128  ;;  %p1489_p12 = scmp.lt.s32.totalorder %s348_s20, %s1487_s27 }
  0xd5   : > { %p1484_p3 = pnand %p1482_p4, %p2159_p1  ;;  %p1490_p8 = scmp.lt.s32.totalorder %s1488_s23, %s1481_s4 }
  0xd7   : > { %p1485_p11 = pneg %p1484_p3  ;;  %p1491_p13 = por %p1490_p8, %p1489_p12 }
  0xd9   : > { %p1492_p5 = pnand %p1491_p13, %p1485_p11 }
  0xdb   : > { %1495 = shalt.err (!%p1492_p5)
}
  0xdc   : > { %p2160_p6 = scmp.ne.s32.totalorder %s2150_s13, 0  ;;  %s1967_s3 = scalar_lea.hbm %s2097_s2, %s1828_s26 }
  0xdd   : > { %s377_s19 = scalar_lea.vmem [#allocation7], %s1832_s16  ;;  %s1496_s25 = scalar_lea.hbm %s1967_s3, 64 }
  0xde   : > { %1206 = dma.hbm_to_vmem [thread:$0]  (!%p2160_p6), %s1941_s8, 64, %s348_s20, %s337_s21  }
  0xdf   : > { %s385_s17 = sshll.u32 %s377_s19, 4  ;;  %p1497_p0 = scmp.ne.s32.totalorder %s1967_s3, %s1496_s25  ;;  %s386_s17 = int_to_ptr.vmem [resolvable:$true] %s385_s17 }
  0xe0   : > { %s1501_s8 = scalar_lea.hbm %s2097_s2, 128  ;;  %p1502_p2 = scmp.lt.u32.totalorder %s1967_s3, %s2097_s2 }
  0xe1   : > { %p1499_p9 = pnand %p1497_p0, %p2159_p1  ;;  %p1503_p7 = scmp.lt.u32.totalorder %s1501_s8, %s1496_s25 }
  0xe2   : > { %p1505_p3 = scmp.lt.u32.totalorder %s1496_s25, %s1967_s3 }
  0xe3   : > { %p1500_p10 = pneg %p1499_p9  ;;  %p1504_p4 = por %p1503_p7, %p1502_p2 }
  0xe5   : > { %p1506_p11 = por %p1505_p3, %p1504_p4 }
  0xe7   : > { %p1507_p12 = pnand %p1506_p11, %p1500_p10 }
  0xe9   : > { %1510 = shalt.err (!%p1507_p12)
}
  0xea   : > { %s1511_s26 = scalar_lea.vmem %s386_s17, 64  ;;  %s1637_s16 = smov [#allocation7]  }
  0xeb   : > { %p1512_p8 = scmp.ne.s32.totalorder %s386_s17, %s1511_s26  ;;  %s1516_s10 = sshll.u32 %s1637_s16, 4  ;;  %s1517_s10 = int_to_ptr.vmem [resolvable:$false] %s1516_s10 }
  0xec   : > { %s1518_s4 = scalar_lea.vmem %s1517_s10, 128  ;;  %p1519_p0 = scmp.lt.s32.totalorder %s386_s17, %s1517_s10 }
  0xed   : > { %p1514_p13 = pnand %p1512_p8, %p2159_p1  ;;  %p1520_p9 = scmp.lt.s32.totalorder %s1518_s4, %s1511_s26 }
  0xef   : > { %p1515_p5 = pneg %p1514_p13  ;;  %p1521_p6 = por %p1520_p9, %p1519_p0 }
  0xf1   : > { %p1522_p2 = pnand %p1521_p6, %p1515_p5 }
  0xf3   : > { %1525 = shalt.err (!%p1522_p2)
}
  0xf4   : > { %p2161_p7 = scmp.ne.s32.totalorder %s2150_s13, 0  ;;  %p2162_p10 = scmp.ne.s32.totalorder %s2136_s12, 0 }
  0xf5   : > { %s1991_s14 = sand.u32 (!%p2162_p10), 1, %s1608_s28   ;;  %p2163_p1 = scmp.ne.s32.totalorder (!%p2162_p10), %s2144_s24, 0 }
  0xf6   : > { %1212 = dma.hbm_to_vmem [thread:$0]  (!%p2161_p7), %s1967_s3, 64, %s386_s17, %s1850_s22  }
  0xf7   : > { %394 = sbr.rel (%p2162_p10) target bundleno = 752 (0x2f0), region = 52  ;;  %s1994_s5 = sshll.u32 (!%p2162_p10), %s1991_s14, 2 }
  0xf8   : > { %s397_s27 = scalar_lea.sflag (!%p2162_p10), [#allocation3], %s1991_s14  ;;  %s400_s23 = scalar_lea.vmem (!%p2162_p10), [#allocation2], %s1994_s5 }
  0xfe   : > { %1579 = dma.done.wait (%p2163_p1), %s397_s27, 64  }
  0xff   : > { %1581 = vsyncadd (%p2163_p1), %s397_s27, 4294967232  ;;  %s405_s12 = sand.u32 1, %s1721_s11   ;;  %s409_s22 = scalar_lea.vmem [#allocation5], %s1994_s5 }
 0x100   : > { %s406_s13 = scalar_lea.sflag [#allocation6], %s405_s12 }
 0x101   : > { %1583 = dma.done.wait (%p2163_p1), %s406_s13, 128  }
 0x102   : > { %1585 = vsyncadd (%p2163_p1), %s406_s13, 4294967168  ;;  %s418_s18 = scalar_lea.vmem [#allocation7], %s1994_s5  ;;  %p2164_p6 = scmp.eq.s32.totalorder %s1721_s11, 0 }
 0x104   : > { %1587 = dma.done.wait (%p2164_p6), [#allocation9], 256   ;;  %p2165_p4 = pmov %p2164_p6 }
 0x106   : > { %1589 = vsyncadd (%p2165_p4), [#allocation9], 4294967040  ;;  %p2166_p3 = pmov %p2165_p4 }
 0x108   : > { %1591 = dma.done.wait (%p2166_p3), [#allocation12], 256   ;;  %p2167_p11 = pmov %p2166_p3 }
 0x109   : > { %p2168_p12 = pmov %p2166_p3 }
 0x10a   : > { %1593 = vsyncadd (%p2167_p11), [#allocation12], 4294967040 }
 0x10b   : > { %1595 = dma.done.wait (%p2168_p12), [#allocation15], 256   ;;  %p2169_p8 = pmov %p2166_p3 }
 0x10c   : > { %v488_v0 = vlaneseq  ;;  %v1638_v1 = vmov 0.0   ;;  %vm1639_vm0 = vmmov 0   ;;  %v1640_v3 = vmov 0   ;;  %v487_v9 = vld [vmem:[%s418_s18] sm:$0xf]  ;;  %v485_v10 = vld [vmem:[#allocation8] sm:$0xff] }
 0x10d   : > { %1597 = vsyncadd (%p2169_p8), [#allocation15], 4294967040  ;;  %1123 = vmatprep.subr.bf16.mxu0 %v1638_v1  ;;  %1129 = vmatprep.subr.bf16.mxu1 %v1638_v1  ;;  %v486_v15 = vld [vmem:[#allocation10] sm:$0xff]  ;;  %v1641_v16 = vmov 1.0|1.0   ;;  %vm502_vm11 = vcmask 130048  }
 0x10e   : > { %v489_v2 = vshrl.u32 %v488_v0, 7  ;;  %1125 = vmatprep.mubr.msk.bf16.mxu0 %vm1639_vm0, %v1638_v1  ;;  %1131 = vmatprep.mubr.msk.bf16.mxu1 %vm1639_vm0, %v1638_v1  ;;  %v482_v17 = vld [vmem:[%s400_s23] sm:$0xf]  ;;  %v834_v18 = vld [vmem:[#allocation14] sm:$0xff]  ;;  %v483_v20 = vld [vmem:[%s409_s22] sm:$0xf] }
 0x10f   : > { %1292 = vset.pattern.permute.xlu0 %v1640_v3  ;;  %1293 = vset.pattern.permute.xlu1 %v1640_v3  ;;  %v835_v19 = vld [vmem:[#allocation14 + $0x8] sm:$0xff]  ;;  %v484_v21 = vunpack.c.l.bf16 %v483_v20  ;;  %vm737_vm14 = vcmask 1043456   ;;  %v1295_v28 = vld [vmem:[#allocation11] sm:$0xff]   ;;  %vm733_vm15 = vcmask 64512   ;;  %v1294_v58 = vld [vmem:[#allocation13] sm:$0xff]   ;;  %s1076_s11 = sshll.u32 %s1991_s14, 3 }
 0x110   : > { %v493_v4 = vsub.s32 0, %v489_v2  ;;  %v555_v5 = vsub.s32 1, %v489_v2  ;;  %v609_v6 = vsub.s32 2, %v489_v2  ;;  %v663_v7 = vsub.s32 3, %v489_v2  ;;  %549 = vperm.xlu0 %1292, %v485_v10   ;;  %838 = vperm.xlu1 %1293, %v834_v18   ;;  %s2170_s24 = sld [smem:[#allocation27_spill]]  ;;  %s1110_s9 = sshll.u32 %s1616_s30, 7 }
 0x111   : > { %v490_v8 = vadd.s32 8, %v489_v2  ;;  %s480_s3 = scalar_lea.vmem [#allocation16], %s1076_s11  ;;  %s2171_s15 = sld [smem:[#allocation34_spill]] }
 0x112   : > { %v494_v11 = vrot.slane %v487_v9, %v493_v4  ;;  %v556_v12 = vrot.slane %v487_v9, %v555_v5  ;;  %v610_v13 = vrot.slane %v487_v9, %v609_v6  ;;  %v664_v14 = vrot.slane %v487_v9, %v663_v7  ;;  %s876_s19 = sshll.u32 %s480_s3, 4  ;;  %s862_s8 = scalar_lea.sflag [#allocation4], %s1991_s14  ;;  %s2046_s19 = int_to_ptr.vmem [resolvable:$true] %s876_s19 }
 0x113   : > { %s1526_s30 = scalar_lea.vmem %s2046_s19, 128  ;;  %s1642_s20 = smov [#allocation16]  }
 0x114   : > { %vm495_vm1 = vcmp.eq.s32.totalorder %v489_v2, %v494_v11  ;;  %vm496_vm2 = vcmp.eq.s32.totalorder %v490_v8, %v494_v11  ;;  %vm557_vm3 = vcmp.eq.s32.totalorder %v489_v2, %v556_v12  ;;  %vm558_vm4 = vcmp.eq.s32.totalorder %v490_v8, %v556_v12  ;;  %718 = vperm.xlu0 %1292, %v486_v15   ;;  %p1527_p13 = scmp.ne.s32.totalorder %s2046_s19, %s1526_s30  ;;  %s1530_s21 = sshll.u32 %s1642_s20, 4  ;;  %s1531_s21 = int_to_ptr.vmem [resolvable:$false] %s1530_s21 }
 0x115   : > { %vm1079_vm5 = vmpackc.low %vm496_vm2, %vm495_vm1  ;;  %vm611_vm6 = vcmp.eq.s32.totalorder %v489_v2, %v610_v13  ;;  %vm612_vm7 = vcmp.eq.s32.totalorder %v490_v8, %v610_v13  ;;  %vm665_vm8 = vcmp.eq.s32.totalorder %v489_v2, %v664_v14  ;;  %vm666_vm9 = vcmp.eq.s32.totalorder %v490_v8, %v664_v14  ;;  %843 = vperm.xlu1 %1293, %v835_v19   ;;  %s1532_s26 = scalar_lea.vmem %s1531_s21, 256  ;;  %p1533_p2 = scmp.lt.s32.totalorder %s2046_s19, %s1531_s21 }
 0x116   : > { %1124 = vmatpush3.bf16.msk.msra.mxu0 %vm1079_vm5, %v1641_v16  ;;  %vm1084_vm10 = vmpackc.low %vm558_vm4, %vm557_vm3  ;;  %p2172_p5 = scmp.ne.s32.totalorder %s2170_s24, 0  ;;  %p1534_p7 = scmp.lt.s32.totalorder %s1532_s26, %s1526_s30 }
 0x117   : > { %1130 = vmatpush3.bf16.msk.msra.mxu1 %vm1084_vm10, %v1641_v16  ;;  %1135 = vmatprep.subr.bf16.mxu0 %v1638_v1  ;;  %vm1089_vm12 = vmpackc.low %vm612_vm7, %vm611_vm6  ;;  %s2044_s1 = scalar_lea.hbm %s2171_s15, %s1110_s9 }
 0x118   : > { %1141 = vmatprep.subr.bf16.mxu1 %v1638_v1  ;;  %vm1094_vm13 = vmpackc.low %vm666_vm9, %vm665_vm8  ;;  %p1528_p0 = pnand %p1527_p13, %p2172_p5  ;;  %p1535_p10 = por %p1534_p7, %p1533_p2 }
 0x119   : > { %1126 = vmatmul.mubr.msk.bf16.vlgmr.msra.gmra.mrb[0].mxu0 %vm502_vm11, %v482_v17 }
 0x11a   : > { %1132 = vmatmul.mubr.msk.bf16.vlgmr.msra.gmra.mrb[0].mxu1 %vm502_vm11, %v482_v17  ;;  %1136 = vmatpush3.bf16.msk.msra.mxu0 %vm1089_vm12, %v1641_v16  ;;  %p1529_p9 = pneg %p1528_p0 }
 0x11b   : > { %1142 = vmatpush3.bf16.msk.msra.mxu1 %vm1094_vm13, %v1641_v16  ;;  %1137 = vmatprep.mubr.msk.bf16.mxu0 %vm1639_vm0, %v1638_v1 }
 0x11c   : > { %1143 = vmatprep.mubr.msk.bf16.mxu1 %vm1639_vm0, %v1638_v1  ;;  %1153 = vmatprep.subr.bf16.mxu1 %v1638_v1  ;;  %p1536_p1 = pnand %p1535_p10, %p1529_p9 }
 0x11d   : > { %1147 = vmatprep.subr.bf16.mxu0 %v1638_v1 }
 0x121   : > { %1138 = vmatmul.mubr.msk.bf16.vlgmr.msra.gmra.mrb[4].mxu0 %vm502_vm11, %v482_v17 }
 0x122   : > { %1144 = vmatmul.mubr.msk.bf16.vlgmr.msra.gmra.mrb[4].mxu1 %vm502_vm11, %v482_v17  ;;  %1149 = vmatprep.mubr.msk.bf16.mxu0 %vm1639_vm0, %v1638_v1 }
 0x123   : > { %1155 = vmatprep.mubr.msk.bf16.mxu1 %vm1639_vm0, %v1638_v1  ;;  %vm858_vm0 = vcmask 125952  }
 0x18f   : > { %v550_v22 = vpop.permute.xlu0 %549  ;;  %v839_v63 = vpop.permute.xlu1 %838 }
 0x190   : > { %v715_v23 = vmul.f32 %v550_v22, %v484_v21 }
 0x193   : > { %v719_v24 = vpop.permute.xlu0 %718 }
 0x194   : > { %v721_v25 = vadd.f32 %v719_v24, %v715_v23  ;;  %v844_v7 = vpop.permute.xlu1 %843 }
 0x196   : > { %v722_v26 = vpack.c.bf16 %v721_v25, %v721_v25 }
 0x198   : > { %v791_v27 = vsel %vm737_vm14, %v722_v26, 0 }
 0x199   : > { %1154 = vmatpush3.bf16.msra.mxu1 %v791_v27 }
 0x19c   : > { %1156 = vmatmul.mubr.msk.bf16.vlgmr.msra.gmra.mrb[8].mxu1 %vm733_vm15, %v1295_v28 }
 0x1ec   : > { %v540_v29 = vpop.f32.mrb[0].mxu0 }
 0x1ed   : > { %v546_v30 = vsub.f32 %v540_v29, %v484_v21  ;;  %v598_v31 = vpop.f32.mrb[0].mxu1  ;;  %v1127_v32 = vpop.f32.mrb[1].mxu0 }
 0x1ee   : > { %v604_v33 = vsub.f32 %v598_v31, %v484_v21  ;;  %v1133_v34 = vpop.f32.mrb[1].mxu1  ;;  %v543_v35 = vpop.f32.mrb[2].mxu0 }
 0x1ef   : > { %v601_v36 = vpop.f32.mrb[2].mxu1  ;;  %v1128_v37 = vpop.f32.mrb[3].mxu0  ;;  %v552_v38 = vmul.f32 %v550_v22, %v546_v30 }
 0x1f0   : > { %v1134_v39 = vpop.f32.mrb[3].mxu1  ;;  %v605_v40 = vmul.f32 %v604_v33, %v550_v22 }
 0x1f2   : > { %v606_v41 = vmax.f32 %v552_v38, %v605_v40 }
 0x1f4   : > { %v652_v42 = vpop.f32.mrb[4].mxu0 }
 0x1f5   : > { %v658_v43 = vsub.f32 %v652_v42, %v484_v21  ;;  %v706_v44 = vpop.f32.mrb[4].mxu1  ;;  %v1139_v45 = vpop.f32.mrb[5].mxu0 }
 0x1f6   : > { %v712_v46 = vsub.f32 %v706_v44, %v484_v21  ;;  %v1145_v47 = vpop.f32.mrb[5].mxu1  ;;  %v655_v48 = vpop.f32.mrb[6].mxu0 }
 0x1f7   : > { %v659_v49 = vmul.f32 %v658_v43, %v550_v22  ;;  %v709_v50 = vpop.f32.mrb[6].mxu1  ;;  %v1140_v51 = vpop.f32.mrb[7].mxu0 }
 0x1f8   : > { %v1146_v52 = vpop.f32.mrb[7].mxu1  ;;  %v713_v54 = vmul.f32 %v712_v46, %v550_v22 }
 0x1f9   : > { %v660_v53 = vmax.f32 %v606_v41, %v659_v49 }
 0x1fb   : > { %v714_v55 = vmax.f32 %v660_v53, %v713_v54 }
 0x1fd   : > { %v727_v56 = vpack.c.bf16 %v714_v55, %v714_v55 }
 0x1ff   : > { %v739_v57 = vsel %vm737_vm14, %v727_v56, 0 }
 0x200   : > { %1148 = vmatpush3.bf16.msra.mxu0 %v739_v57 }
 0x203   : > { %1150 = vmatmul.mubr.msk.bf16.vlgmr.msra.gmra.mrb[8].mxu0 %vm733_vm15, %v1294_v58 }
 0x26f   : > { %v827_v59 = vpop.f32.mrb[8].mxu1 }
 0x270   : > { %v1157_v60 = vpop.f32.mrb[9].mxu1 }
 0x271   : > { %v830_v61 = vpop.f32.mrb[10].mxu1 }
 0x272   : > { %v1158_v62 = vpop.f32.mrb[11].mxu1 }
 0x2d6   : > { %v775_v0 = vpop.f32.mrb[8].mxu0 }
 0x2d7   : > { %v828_v1 = vadd.f32 %v827_v59, %v775_v0  ;;  %v1151_v2 = vpop.f32.mrb[9].mxu0 }
 0x2d8   : > { %v778_v3 = vpop.f32.mrb[10].mxu0 }
 0x2d9   : > { %v846_v4 = vadd.f32 %v839_v63, %v828_v1  ;;  %v831_v5 = vadd.f32 %v830_v61, %v778_v3  ;;  %v1152_v6 = vpop.f32.mrb[11].mxu0 }
 0x2db   : > { %v848_v8 = vmax.f32 %v846_v4, 0.0  ;;  %v847_v9 = vadd.f32 %v844_v7, %v831_v5 }
 0x2dd   : > { %v1108_v10 = vpack.c.bf16 %v848_v8, %v848_v8  ;;  %v849_v11 = vmax.f32 %v847_v9, 0.0 }
 0x2df   : > { %859 = vst.msk [vmem:[%s480_s3] sm:$0xf] %vm858_vm0, %v1108_v10  ;;  %v1109_v12 = vpack.c.bf16 %v849_v11, %v849_v11 }
 0x2e1   : > { %860 = vst.msk [vmem:[%s480_s3 + $0x4] sm:$0xf] %vm858_vm0, %v1109_v12 }
 0x2e2   : > { %1539 = shalt.err (!%p1536_p1)
}
 0x2e3   : > { %s1540_s16 = scalar_lea.hbm %s2044_s1, 128  ;;  %s1544_s5 = scalar_lea.hbm %s2171_s15, 256 }
 0x2e4   : > { %p1541_p6 = scmp.ne.s32.totalorder %s2044_s1, %s1540_s16  ;;  %p1545_p11 = scmp.lt.u32.totalorder %s2044_s1, %s2171_s15 }
 0x2e5   : > { %p1546_p12 = scmp.lt.u32.totalorder %s1544_s5, %s1540_s16  ;;  %p1548_p13 = scmp.lt.u32.totalorder %s1540_s16, %s2044_s1 }
 0x2e6   : > { %p1542_p4 = pnand %p1541_p6, %p2172_p5 }
 0x2e7   : > { %p1547_p8 = por %p1546_p12, %p1545_p11 }
 0x2e8   : > { %p1543_p3 = pneg %p1542_p4 }
 0x2e9   : > { %p1549_p0 = por %p1548_p13, %p1547_p8 }
 0x2eb   : > { %p1550_p9 = pnand %p1549_p0, %p1543_p3 }
 0x2ed   : > { %1553 = shalt.err (!%p1550_p9)
}
 0x2ee   : > { %s1643_s12 = smov 64   ;;  %s1644_s13 = smov 4  }
 0x2ef   : > { %1185 = dma.vmem_to_hbm [thread:$0]  (%p2172_p5), %s2046_s19, 128, %s2044_s1, %s862_s8, %s1643_s12, %s1643_s12, %s1644_s13  }
 0x2f0 PF: > { %s2173_s22 = sld [smem:[#allocation23_spill]]  ;;  %s2174_s18 = sld [smem:[#allocation29_spill]] }
 0x2f1   : > { %s2175_s11 = sld [smem:[#allocation25_spill]] }
 0x2f6   : > { %s891_s9 = sand.u32 1, %s2173_s22   ;;  %p2176_p2 = scmp.ne.s32.totalorder %s2174_s18, 0 }
 0x2f7   : > { %p2177_p7 = scmp.ge.s32.totalorder %s2175_s11, 2  ;;  %s892_s3 = scalar_lea.sflag [#allocation4], %s891_s9 }
 0x2f9   : > { %p1214_p10 = pnand %p2177_p7, %p2176_p2 }
 0x2fb   : > { %1599 = dma.done.wait (!%p1214_p10), %s892_s3, 128  }
 0x2fc   : > { %1601 = vsyncadd (!%p1214_p10), %s892_s3, 4294967168  ;;  %s30_s10 = sadd.s32 1, %s2175_s11   ;;  %s2178_s17 = sld [smem:[#allocation28_spill]] }
 0x2fd   : > { %p27_p1 = scmp.ge.s32.totalorder %s30_s10, 4   ;;  %s2179_s30 = sld [smem:[#allocation24_spill]] }
 0x2fe   : > { %s2180_s9 = sld [smem:[#allocation26_spill]]  ;;  %s2181_s27 = smov %s1608_s28 }
 0x2ff   : > { %s2182_s28 = smov %s1612_s29  ;;  %29 = sbr.rel (!%p27_p1) target bundleno = 17 (0x11), region = 141 }
 0x302   : > { %s2183_s29 = smov %s2178_s17 }
 0x306   :  { %897 = vsyncpa [#allocation3], 1 }
 0x307   :  { %899 = vsyncpa [#allocation3 + $0x1], 1 }
 0x308   :  { %900 = vsyncpa [#allocation6], 1 }
 0x309   :  { %902 = vsyncpa [#allocation6 + $0x1], 1 }
 0x30a   :  { %903 = vsyncpa [#allocation9], 1 }
 0x30b   :  { %904 = vsyncpa [#allocation12], 1 }
 0x30c   :  { %905 = vsyncpa [#allocation15], 1 }
 0x30d   :  { %906 = vsyncpa [#allocation4], 1 }
 0x30e   :  { %908 = vsyncpa [#allocation4 + $0x1], 1 }

// kernel: grapher_forward.9
= control target key start
LH: loop header
LB: loop body
LE: loop exit
PB: predicated region body
PF: predicated region fallthrough
CT: control target
= control target key end

     0   :  { %s1124_s0 = inlined_call_operand.hbm [shape: bf16[2,8,16], index: 0, kind: input, shape index: {}]   ;;  %s1125_s1 = inlined_call_operand.hbm [shape: f32[8,1], index: 1, kind: input, shape index: {}]   ;;  %s1126_s2 = inlined_call_operand.hbm [shape: f32[8,1], index: 2, kind: input, shape index: {}]   ;;  %s1127_s3 = inlined_call_operand.hbm [shape: f32[2,8,16], index: 3, kind: input, shape index: {}]   ;;  %s1128_s4 = inlined_call_operand.hbm [shape: f32[2,8,16], index: 4, kind: output, shape index: {}]  }
   0x1   :  { %1134 = sst [smem:[#allocation15_spill]] %s1124_s0 }
   0x2   :  { %9 = vsyncpa [#allocation3], 0 }
   0x3   :  { %11 = vsyncpa [#allocation3 + $0x1], 0 }
   0x4   :  { %12 = vsyncpa [#allocation6], 0 }
   0x5   :  { %13 = vsyncpa [#allocation9], 0 }
   0x6   :  { %15 = vsyncpa [#allocation9 + $0x1], 0 }
   0x7   :  { %16 = vsyncpa [#allocation4], 0 }
   0x8   :  { %18 = vsyncpa [#allocation4 + $0x1], 0  ;;  %s842_s15 = smov 0   ;;  %s844_s16 = smov 0  }
   0x9   :  { %s846_s17 = smov 0   ;;  %s848_s18 = smov 0  }
   0xa   :  { %s850_s19 = smov 0   ;;  %s852_s20 = smov 0  }
   0xb LB: > { %s493_s21 = sadd.s32 4294967295, %s809_s20   ;;  %s494_s22 = sadd.s32 4294967294, %s809_s20   ;;  %s809_s20 = sphi %s852_s20, %s24_s20   ;;  %s805_s19 = sphi %s850_s19, %s1155_s19   ;;  %s801_s18 = sphi %s848_s18, %s1154_s18   ;;  %s797_s17 = sphi %s846_s17, %s1153_s17   ;;  %s793_s16 = sphi %s844_s16, %s1152_s16   ;;  %s789_s15 = sphi %s842_s15, %s1151_s15  }
   0xc   : > { %p67_p0 = scmp.ne.s32.totalorder %s793_s16, %s789_s15  ;;  %p876_p1 = scmp.eq.s32.totalorder %s493_s21, 0 }
   0xd   : > { %p880_p2 = scmp.eq.s32.totalorder %s493_s21, 1  ;;  %p183_p3 = scmp.eq.s32.totalorder %s494_s22, 1 }
   0xe   : > { %s1135_s23 = scalar_select %p876_p1, 1, 0 }
   0xf   : > { %s1136_s24 = scalar_select %p880_p2, 1, 0 }
  0x10   : > { %p886_p4 = por %p876_p1, %p67_p0  ;;  %p495_p5 = scmp.ge.s32.totalorder %s809_s20, 1 }
  0x11   : > { %p891_p6 = por %p183_p3, %p67_p0  ;;  %p190_p7 = scmp.lt.s32.totalorder %s809_s20, 3 }
  0x12   : > { %s1137_s25 = scalar_select %p886_p4, 1, 0 }
  0x13   : > { %s1138_s26 = scalar_select %p891_p6, 1, 0 }
  0x14   : > { %p896_p8 = pnand %p495_p5, %p190_p7  ;;  %s811_s28 = smov [#allocation5]  }
  0x15   : > { %s205_s29 = sshll.u32 %s811_s28, 4  ;;  %s812_s30 = smov [#allocation7]   ;;  %s206_s29 = int_to_ptr.vmem [resolvable:$true] %s205_s29 }
  0x16   : > { %s1139_s27 = scalar_select %p896_p8, 1, 0 }
  0x17   : > { %p527_p10 = pneg %p896_p8  ;;  %s218_s5 = sshll.u32 %s812_s30, 4  ;;  %s909_s5 = int_to_ptr.vmem [resolvable:$true] %s218_s5 }
  0x18   : > { %s603_s9 = scalar_lea.hbm %s1125_s1, 128 }
  0x19   : > { %p905_p11 = pnand %p527_p10, %p876_p1  ;;  %p604_p12 = scmp.ne.s32.totalorder %s1125_s1, %s603_s9 }
  0x1a   : > { %p610_p5 = scmp.lt.u32.totalorder %s603_s9, %s1125_s1 }
  0x1b   : > { %p605_p13 = pneg %p905_p11 }
  0x1d   : > { %p606_p0 = pnand %p605_p13, %p604_p12 }
  0x1f   : > { %p607_p3 = pneg %p606_p0 }
  0x21   : > { %p612_p7 = pnand %p610_p5, %p607_p3 }
  0x23   : > { %615 = shalt.err (!%p612_p7)
}
  0x24   : > { %s616_s14 = scalar_lea.vmem %s206_s29, 128  ;;  %p624_p1 = scmp.lt.s32.totalorder %s206_s29, %s206_s29 }
  0x25   : > { %p617_p10 = scmp.ne.s32.totalorder %s206_s29, %s616_s14  ;;  %p625_p4 = scmp.lt.s32.totalorder %s616_s14, %s616_s14 }
  0x27   : > { %p619_p9 = pnand %p617_p10, %p605_p13  ;;  %p626_p8 = por %p625_p4, %p624_p1 }
  0x29   : > { %p620_p6 = pneg %p619_p9 }
  0x2b   : > { %p627_p2 = pnand %p626_p8, %p620_p6 }
  0x2d   : > { %630 = shalt.err (!%p627_p2)
}
  0x2e   : > { %530 = dma.hbm_to_vmem [thread:$0]  (!%p905_p11), %s1125_s1, 128, %s206_s29, [#allocation6]  }
  0x2f   : > { %s631_s7 = scalar_lea.hbm %s1126_s2, 128 }
  0x30   : > { %p632_p9 = scmp.ne.s32.totalorder %s1126_s2, %s631_s7  ;;  %p638_p2 = scmp.lt.u32.totalorder %s631_s7, %s1126_s2 }
  0x32   : > { %p634_p1 = pnand %p632_p9, %p605_p13 }
  0x34   : > { %p635_p4 = pneg %p634_p1 }
  0x36   : > { %p640_p6 = pnand %p638_p2, %p635_p4 }
  0x38   : > { %643 = shalt.err (!%p640_p6)
}
  0x39   : > { %s644_s29 = scalar_lea.vmem %s909_s5, 128  ;;  %p652_p3 = scmp.lt.s32.totalorder %s909_s5, %s909_s5 }
  0x3a   : > { %p645_p8 = scmp.ne.s32.totalorder %s909_s5, %s644_s29  ;;  %p653_p5 = scmp.lt.s32.totalorder %s644_s29, %s644_s29 }
  0x3c   : > { %p647_p12 = pnand %p645_p8, %p605_p13  ;;  %p654_p7 = por %p653_p5, %p652_p3 }
  0x3e   : > { %p648_p0 = pneg %p647_p12 }
  0x40   : > { %p655_p10 = pnand %p654_p7, %p648_p0 }
  0x42   : > { %658 = shalt.err (!%p655_p10)
}
  0x43   : > { %533 = dma.hbm_to_vmem [thread:$0]  (!%p905_p11), %s1126_s2, 128, %s909_s5, [#allocation6]  }
  0x44   : > { %s39_s14 = sadd.s32 1, %s805_s19  ;;  %s54_s21 = sadd.s32 1, %s797_s17 }
  0x45   : > { %p41_p13 = scmp.ge.s32.totalorder %s39_s14, 2  ;;  %p61_p9 = scmp.ne.s32.totalorder %s797_s17, %s793_s16 }
  0x46   : > { %p62_p1 = scmp.eq.s32.totalorder %s809_s20, 0  ;;  %p547_p4 = scmp.lt.s32.totalorder %s809_s20, 2 }
  0x47   : > { %s1157_s14 = smov (%p41_p13, %s39_s14), 0  ;;  %p1141_p6 = scmp.ne.s32.totalorder %s1136_s24, 0 }
  0x48   : > { %p63_p2 = por %p62_p1, %p61_p9  ;;  %s47_s22 = ssub.s32 %s805_s19, %s1157_s14 }
  0x49   : > { %p968_p8 = por %p1141_p6, %p61_p9  ;;  %s975_s28 = sand.u32 1, %s797_s17  }
  0x4a   : > { %p52_p11 = scmp.eq.s32.totalorder %s47_s22, 0  ;;  %s499_s5 = sshll.u32 %s975_s28, 2 }
  0x4b   : > { %s1142_s6 = scalar_select %p968_p8, 1, 0 }
  0x4c   : > { %s500_s30 = sshll.u32 %s805_s19, 6  ;;  %s1143_s0 = sld [smem:[#allocation15_spill]] }
  0x4d   : > { %s980_s7 = scalar_select %p52_p11, %s797_s17, %s54_s21  }
  0x4e   : > { %s233_s24 = scalar_lea.vmem [#allocation2], %s499_s5  ;;  %p989_p12 = pnand %p547_p4, %p63_p2 }
  0x4f   : > { %s242_s11 = sshll.u32 %s233_s24, 4  ;;  %s501_s12 = sshll.u32 %s975_s28, 3  ;;  %s993_s11 = int_to_ptr.vmem [resolvable:$true] %s242_s11 }
  0x50   : > { %s230_s13 = scalar_lea.sflag [#allocation3], %s975_s28  ;;  %p661_p3 = pneg %p989_p12 }
  0x52   : > { %s985_s10 = scalar_lea.hbm %s1143_s0, %s500_s30  ;;  %s664_s30 = scalar_lea.hbm %s1143_s0, 128 }
  0x53   : > { %s659_s21 = scalar_lea.hbm %s985_s10, 64  ;;  %p665_p10 = scmp.lt.u32.totalorder %s985_s10, %s1143_s0 }
  0x54   : > { %p660_p0 = scmp.ne.s32.totalorder %s985_s10, %s659_s21  ;;  %p666_p13 = scmp.lt.u32.totalorder %s664_s30, %s659_s21 }
  0x55   : > { %p668_p1 = scmp.lt.u32.totalorder %s659_s21, %s985_s10 }
  0x56   : > { %p662_p5 = pnand %p661_p3, %p660_p0  ;;  %p667_p9 = por %p666_p13, %p665_p10 }
  0x58   : > { %p663_p7 = pneg %p662_p5  ;;  %p669_p4 = por %p668_p1, %p667_p9 }
  0x5a   : > { %p670_p2 = pnand %p669_p4, %p663_p7 }
  0x5c   : > { %673 = shalt.err (!%p670_p2)
}
  0x5d   : > { %s674_s24 = scalar_lea.vmem %s993_s11, 64  ;;  %s813_s22 = smov [#allocation2]  }
  0x5e   : > { %p675_p6 = scmp.ne.s32.totalorder %s993_s11, %s674_s24  ;;  %s679_s5 = sshll.u32 %s813_s22, 4  ;;  %s680_s5 = int_to_ptr.vmem [resolvable:$false] %s679_s5 }
  0x5f   : > { %s681_s8 = scalar_lea.vmem %s680_s5, 128  ;;  %p682_p5 = scmp.lt.s32.totalorder %s993_s11, %s680_s5 }
  0x60   : > { %p677_p11 = pnand %p675_p6, %p661_p3  ;;  %p683_p10 = scmp.lt.s32.totalorder %s681_s8, %s674_s24 }
  0x62   : > { %p678_p0 = pneg %p677_p11  ;;  %p684_p13 = por %p683_p10, %p682_p5 }
  0x64   : > { %p685_p9 = pnand %p684_p13, %p678_p0 }
  0x66   : > { %688 = shalt.err (!%p685_p9)
}
  0x67   : > { %537 = dma.hbm_to_vmem [thread:$0]  (!%p989_p12), %s985_s10, 64, %s993_s11, %s230_s13  }
  0x68   : > { %s502_s21 = sshll.u32 %s805_s19, 7  ;;  %s253_s24 = scalar_lea.vmem [#allocation8], %s501_s12 }
  0x69   : > { %s1026_s22 = scalar_lea.hbm %s1127_s3, %s502_s21  ;;  %s262_s5 = sshll.u32 %s253_s24, 4  ;;  %s263_s5 = int_to_ptr.vmem [resolvable:$true] %s262_s5 }
  0x6a   : > { %s250_s8 = scalar_lea.sflag [#allocation9], %s975_s28  ;;  %s689_s0 = scalar_lea.hbm %s1026_s22, 128 }
  0x6b   : > { %p690_p7 = scmp.ne.s32.totalorder %s1026_s22, %s689_s0  ;;  %s694_s13 = scalar_lea.hbm %s1127_s3, 256 }
  0x6c   : > { %p695_p2 = scmp.lt.u32.totalorder %s1026_s22, %s1127_s3  ;;  %p696_p6 = scmp.lt.u32.totalorder %s694_s13, %s689_s0 }
  0x6d   : > { %p692_p1 = pnand %p690_p7, %p661_p3  ;;  %p698_p0 = scmp.lt.u32.totalorder %s689_s0, %s1026_s22 }
  0x6e   : > { %p697_p11 = por %p696_p6, %p695_p2 }
  0x6f   : > { %p693_p4 = pneg %p692_p1 }
  0x70   : > { %p699_p5 = por %p698_p0, %p697_p11 }
  0x72   : > { %p700_p10 = pnand %p699_p5, %p693_p4 }
  0x74   : > { %703 = shalt.err (!%p700_p10)
}
  0x75   : > { %s704_s28 = scalar_lea.vmem %s263_s5, 128  ;;  %s814_s12 = smov [#allocation8]  }
  0x76   : > { %p705_p13 = scmp.ne.s32.totalorder %s263_s5, %s704_s28  ;;  %s709_s9 = sshll.u32 %s814_s12, 4  ;;  %s710_s9 = int_to_ptr.vmem [resolvable:$false] %s709_s9 }
  0x77   : > { %s711_s24 = scalar_lea.vmem %s710_s9, 256  ;;  %p712_p1 = scmp.lt.s32.totalorder %s263_s5, %s710_s9 }
  0x78   : > { %p707_p9 = pnand %p705_p13, %p661_p3  ;;  %p713_p8 = scmp.lt.s32.totalorder %s711_s24, %s704_s28 }
  0x7a   : > { %p708_p7 = pneg %p707_p9  ;;  %p714_p2 = por %p713_p8, %p712_p1 }
  0x7c   : > { %p715_p6 = pnand %p714_p2, %p708_p7 }
  0x7e   : > { %718 = shalt.err (!%p715_p6)
}
  0x7f   : > { %540 = dma.hbm_to_vmem [thread:$0]  (!%p989_p12), %s1026_s22, 128, %s263_s5, %s250_s8  }
  0x80   : > { %p1145_p4 = scmp.ne.s32.totalorder %s1139_s27, 0 }
  0x81   : > { %s1053_s0 = sand.u32 (!%p1145_p4), 1, %s793_s16   ;;  %p1146_p3 = scmp.ne.s32.totalorder (!%p1145_p4), %s1137_s25, 0 }
  0x82   : > { %271 = sbr.rel (%p1145_p4) target bundleno = 296 (0x128), region = 36  ;;  %s504_s10 = sshll.u32 (!%p1145_p4), %s1053_s0, 2 }
  0x83   : > { %s274_s11 = scalar_lea.sflag (!%p1145_p4), [#allocation3], %s1053_s0  ;;  %s277_s13 = scalar_lea.vmem (!%p1145_p4), [#allocation2], %s504_s10 }
  0x89   : > { %772 = dma.done.wait (%p1146_p3), %s274_s11, 64  }
  0x8a   : > { %774 = vsyncadd (%p1146_p3), %s274_s11, 4294967232  ;;  %p1147_p8 = scmp.ne.s32.totalorder %s1135_s23, 0 }
  0x8c   : > { %776 = dma.done.wait (%p1147_p8), [#allocation6], 256  }
  0x8d   : > { %778 = vsyncadd (%p1147_p8), [#allocation6], 4294967040  ;;  %s507_s27 = sshll.u32 %s1053_s0, 3  ;;  %s291_s29 = scalar_lea.sflag [#allocation9], %s1053_s0 }
  0x8e   : > { %s294_s22 = scalar_lea.vmem [#allocation8], %s507_s27 }
  0x8f   : > { %780 = dma.done.wait (%p1146_p3), %s291_s29, 128  }
  0x90   : > { %782 = vsyncadd (%p1146_p3), %s291_s29, 4294967168  ;;  %v815_v0 = vmov 0   ;;  %v326_v1 = vld [vmem:[#allocation5] sm:$0xff]  ;;  %v333_v2 = vld [vmem:[#allocation7] sm:$0xff]  ;;  %s510_s23 = sshll.u32 %s801_s18, 7  ;;  %s323_s5 = scalar_lea.vmem [#allocation10], %s507_s27 }
  0x91   : > { %602 = vset.pattern.permute.xlu0 %v815_v0  ;;  %v324_v3 = vld [vmem:[%s277_s13] sm:$0xf]  ;;  %s360_s8 = sshll.u32 %s323_s5, 4  ;;  %vm342_vm0 = vcmask 130048   ;;  %s1075_s30 = scalar_lea.hbm %s1128_s4, %s510_s23  ;;  %s1077_s8 = int_to_ptr.vmem [resolvable:$true] %s360_s8 }
  0x92   : > { %329 = vperm.xlu0 %602, %v326_v1   ;;  %v325_v4 = vunpack.c.l.bf16 %v324_v3  ;;  %v340_v7 = vld [vmem:[%s294_s22] sm:$0xff]  ;;  %s345_s28 = scalar_lea.sflag [#allocation4], %s1053_s0  ;;  %s719_s12 = scalar_lea.vmem %s1077_s8, 128 }
  0x93   : > { %p720_p12 = scmp.ne.s32.totalorder %s1077_s8, %s719_s12  ;;  %p1148_p11 = scmp.ne.s32.totalorder %s1142_s6, 0 }
  0x94   : > { %s816_s18 = smov [#allocation10]  }
  0x95   : > { %p721_p0 = pnand %p720_p12, %p1148_p11  ;;  %s723_s9 = sshll.u32 %s816_s18, 4  ;;  %s724_s9 = int_to_ptr.vmem [resolvable:$false] %s723_s9 }
  0x96   : > { %336 = vperm.xlu0 %602, %v333_v2   ;;  %s725_s24 = scalar_lea.vmem %s724_s9, 256  ;;  %p726_p10 = scmp.lt.s32.totalorder %s1077_s8, %s724_s9 }
  0x97   : > { %p722_p5 = pneg %p721_p0  ;;  %p727_p13 = scmp.lt.s32.totalorder %s725_s24, %s719_s12 }
  0x99   : > { %p728_p9 = por %p727_p13, %p726_p10 }
  0x9b   : > { %p729_p7 = pnand %p728_p9, %p722_p5 }
 0x111   : > { %v330_v5 = vpop.permute.xlu0 %329 }
 0x112   : > { %v332_v6 = vmul.f32 %v330_v5, %v325_v4 }
 0x115   : > { %v337_v8 = vpop.permute.xlu0 %336 }
 0x116   : > { %v339_v9 = vadd.f32 %v337_v8, %v332_v6 }
 0x118   : > { %v341_v10 = vadd.f32 %v340_v7, %v339_v9 }
 0x11a   : > { %343 = vst.msk [vmem:[%s323_s5] sm:$0xff] %vm342_vm0, %v341_v10 }
 0x11b   : > { %732 = shalt.err (!%p729_p7)
}
 0x11c   : > { %s733_s0 = scalar_lea.hbm %s1075_s30, 128  ;;  %s737_s13 = scalar_lea.hbm %s1128_s4, 256 }
 0x11d   : > { %p734_p1 = scmp.ne.s32.totalorder %s1075_s30, %s733_s0  ;;  %p738_p4 = scmp.lt.u32.totalorder %s1075_s30, %s1128_s4 }
 0x11e   : > { %p739_p3 = scmp.lt.u32.totalorder %s737_s13, %s733_s0  ;;  %p741_p12 = scmp.lt.u32.totalorder %s733_s0, %s1075_s30 }
 0x11f   : > { %p735_p2 = pnand %p734_p1, %p1148_p11 }
 0x120   : > { %p740_p8 = por %p739_p3, %p738_p4 }
 0x121   : > { %p736_p6 = pneg %p735_p2 }
 0x122   : > { %p742_p0 = por %p741_p12, %p740_p8 }
 0x124   : > { %p743_p5 = pnand %p742_p0, %p736_p6 }
 0x126   : > { %746 = shalt.err (!%p743_p5)
}
 0x127   : > { %525 = dma.vmem_to_hbm [thread:$0]  (%p1148_p11), %s1077_s8, 128, %s1075_s30, %s345_s28  }
 0x128 PF: > { %s372_s22 = sand.u32 1, %s789_s15   ;;  %p1149_p10 = scmp.ne.s32.totalorder %s1138_s26, 0 }
 0x129   : > { %p1150_p13 = scmp.ge.s32.totalorder %s809_s20, 2  ;;  %s373_s23 = scalar_lea.sflag [#allocation4], %s372_s22 }
 0x12b   : > { %p542_p9 = pnand %p1150_p13, %p1149_p10 }
 0x12d   : > { %784 = dma.done.wait (!%p542_p9), %s373_s23, 128  }
 0x12e   : > { %786 = vsyncadd (!%p542_p9), %s373_s23, 4294967168  ;;  %s24_s20 = sadd.s32 1, %s809_s20   ;;  %s1151_s15 = smov %s793_s16 }
 0x12f   : > { %p21_p7 = scmp.ge.s32.totalorder %s24_s20, 4   ;;  %s1152_s16 = smov %s797_s17 }
 0x130   : > { %s1153_s17 = smov %s980_s7  ;;  %s1154_s18 = smov %s805_s19 }
 0x131   : > { %s1155_s19 = smov %s1157_s14  ;;  %23 = sbr.rel (!%p21_p7) target bundleno = 11 (0xb), region = 104 }
 0x138   :  { %378 = vsyncpa [#allocation3], 1 }
 0x139   :  { %380 = vsyncpa [#allocation3 + $0x1], 1 }
 0x13a   :  { %381 = vsyncpa [#allocation6], 1 }
 0x13b   :  { %382 = vsyncpa [#allocation9], 1 }
 0x13c   :  { %384 = vsyncpa [#allocation9 + $0x1], 1 }
 0x13d   :  { %385 = vsyncpa [#allocation4], 1 }
 0x13e   :  { %387 = vsyncpa [#allocation4 + $0x1], 1 }

</bundles_post_ra>
